<compile_context>
chip_gen: v7x
topology: tpu7x:2x2x1
jax: 0.10.0
libtpu: 0.0.40
codegen_flags: <defaults>
</compile_context>

<pallas_src>
import jax
import jax.numpy as jnp
from jax import lax
from jax.experimental import pallas as pl
from jax.experimental.pallas import tpu as pltpu

EPS = 1e-5


def _row_tile(m, cap=256):
    """Largest multiple-of-8 divisor of m that is <= cap (else m itself)."""
    best = m
    t = 8
    while t <= min(m, cap):
        if m % t == 0:
            best = t
        t += 8
    return best


# ------------------ Pallas kernel 1: BN batch statistics ---------------------

def _bn_stats_kernel(x_ref, sum_ref, sumsq_ref):
    @pl.when(pl.program_id(0) == 0)
    def _init():
        sum_ref[...] = jnp.zeros_like(sum_ref)
        sumsq_ref[...] = jnp.zeros_like(sumsq_ref)

    x = x_ref[...]
    sum_ref[...] += jnp.sum(x, axis=0, keepdims=True)
    sumsq_ref[...] += jnp.sum(x * x, axis=0, keepdims=True)


def bn_stats(x2d):
    """Per-channel (sum, sum_of_squares) over rows of (M, C), tiled & pipelined."""
    M, C = x2d.shape
    tm = _row_tile(M)
    return pl.pallas_call(
        _bn_stats_kernel,
        out_shape=(jax.ShapeDtypeStruct((1, C), jnp.float32),
                   jax.ShapeDtypeStruct((1, C), jnp.float32)),
        grid=(M // tm,),
        in_specs=[pl.BlockSpec((tm, C), lambda i: (i, 0))],
        out_specs=(pl.BlockSpec((1, C), lambda i: (0, 0)),
                   pl.BlockSpec((1, C), lambda i: (0, 0))),
        compiler_params=pltpu.CompilerParams(dimension_semantics=("arbitrary",)),
    )(x2d)


# -------- Pallas kernel 2: fused BN-apply + ReLU + 3x3 conv (+ bias) ---------

def _bn_relu_conv_kernel(xp_ref, scale_ref, shift_ref, mask_ref, w_ref, b_ref, o_ref):
    # xp_ref:    (1, H+2, W+2, C)  spatially zero-padded raw input (one sample)
    # scale/shift: (1, C)          folded BN affine (gamma*rstd, beta - mean*gamma*rstd)
    # mask_ref:  (H+2, W+2, 1)     1 in the interior, 0 on the halo
    # w_ref:     (9, C, cout)      bf16 conv weights, (kh*3+kw) major
    # b_ref:     (1, cout)
    # o_ref:     (1, H, W, cout)
    _, Hp, Wp, C = xp_ref.shape
    H, W = Hp - 2, Wp - 2
    cout = o_ref.shape[-1]

    x = xp_ref[0]                                        # (Hp, Wp, C)
    scale = scale_ref[...].reshape(1, 1, C)
    shift = shift_ref[...].reshape(1, 1, C)
    act = jnp.maximum(x * scale + shift, 0.0)            # BN (batch stats) + ReLU
    act = act * mask_ref[...]                            # zero out the 1-pixel halo

    acc = jnp.zeros((H * W, cout), jnp.float32)
    for kh in range(3):
        for kw in range(3):
            patch = act[kh:kh + H, kw:kw + W, :].reshape(H * W, C)
            acc = acc + jnp.dot(patch.astype(jnp.bfloat16), w_ref[kh * 3 + kw],
                                preferred_element_type=jnp.float32)
    o_ref[0] = (acc + b_ref[...]).reshape(H, W, cout)


def bn_relu_conv(xp, scale, shift, mask, w9, bias):
    N, Hp, Wp, C = xp.shape
    H, W = Hp - 2, Wp - 2
    cout = w9.shape[-1]
    return pl.pallas_call(
        _bn_relu_conv_kernel,
        out_shape=jax.ShapeDtypeStruct((N, H, W, cout), jnp.float32),
        grid=(N,),
        in_specs=[
            pl.BlockSpec((1, Hp, Wp, C), lambda n: (n, 0, 0, 0)),
            pl.BlockSpec((1, C), lambda n: (0, 0)),
            pl.BlockSpec((1, C), lambda n: (0, 0)),
            pl.BlockSpec((Hp, Wp, 1), lambda n: (0, 0, 0)),
            pl.BlockSpec((9, C, cout), lambda n: (0, 0, 0)),
            pl.BlockSpec((1, cout), lambda n: (0, 0)),
        ],
        out_specs=pl.BlockSpec((1, H, W, cout), lambda n: (n, 0, 0, 0)),
        compiler_params=pltpu.CompilerParams(dimension_semantics=("parallel",)),
    )(xp, scale, shift, mask, w9, bias)


# ------------------------- conv_block / DenseBlock ---------------------------

def conv_block_apply(x_nhwc, mask, gamma, beta, w_hwio, bias):
    """BN (training batch stats) -> ReLU -> Conv2d(3x3, pad=1), NHWC."""
    N, H, W, C = x_nhwc.shape
    M = N * H * W
    cout = w_hwio.shape[-1]

    # Phase 1: batch statistics (Pallas tiled reduction).
    s, ss = bn_stats(x_nhwc.reshape(M, C))
    mean = s / M
    var = ss / M - mean * mean                       # biased variance (BN training)
    scale = gamma.reshape(1, C) * lax.rsqrt(var + EPS)
    shift = beta.reshape(1, C) - mean * scale

    # Phase 2: fused BN-apply + ReLU + conv + bias (one Pallas call).
    xp = jnp.pad(x_nhwc, ((0, 0), (1, 1), (1, 1), (0, 0)))
    w9 = w_hwio.reshape(9, C, cout).astype(jnp.bfloat16)
    return bn_relu_conv(xp, scale, shift, mask, w9, bias.reshape(1, cout))


@jax.jit
def dense_block_apply(x_nchw, params):
    """params: list of (gamma, beta, w_hwio, bias) per conv_block."""
    x = jnp.transpose(x_nchw, (0, 2, 3, 1))          # NCHW -> NHWC
    _, H, W, _ = x.shape
    mask = jnp.pad(jnp.ones((H, W, 1), jnp.float32), ((1, 1), (1, 1), (0, 0)))
    for gamma, beta, w, b in params:
        y = conv_block_apply(x, mask, gamma, beta, w, b)
        x = jnp.concatenate([x, y], axis=-1)         # == torch.cat(dim=1) in NCHW
    return jnp.transpose(x, (0, 3, 1, 2))            # back to NCHW


# ---------------------------- pure-JAX reference -----------------------------

def _reference(x_nchw, params, matmul_dtype):
    x = jnp.transpose(x_nchw, (0, 2, 3, 1))
    for gamma, beta, w, b in params:
        mean = jnp.mean(x, axis=(0, 1, 2), keepdims=True)
        var = jnp.mean((x - mean) ** 2, axis=(0, 1, 2), keepdims=True)
        act = jnp.maximum((x - mean) * lax.rsqrt(var + EPS) * gamma + beta, 0.0)
        y = lax.conv_general_dilated(
            act.astype(matmul_dtype), w.astype(matmul_dtype),
            window_strides=(1, 1), padding="SAME",
            dimension_numbers=("NHWC", "HWIO", "NHWC"),
            preferred_element_type=jnp.float32,
            precision=lax.Precision.HIGHEST) + b
        x = jnp.concatenate([x, y], axis=-1)
    return jnp.transpose(x, (0, 3, 1, 2))


# ----------------------------------- main -------------------------------------

if __name__ == "__main__":
    key = jax.random.PRNGKey(0)

    N, C0, H, W = 2, 4, 16, 16        # small NCHW input
    num_convs, growth = 2, 8          # DenseBlock(num_convs=2, num_channels=8)

    key, kx = jax.random.split(key)
    x = jax.random.uniform(kx, (N, C0, H, W), dtype=jnp.float32)

    # Deterministic parameter init: BN gamma=1 / beta=0; Conv2d random HWIO weights/bias.
    params = []
    cin = C0
    for i in range(num_convs):
        key, kw_, kb_ = jax.random.split(key, 3)
        gamma = jnp.ones((cin,), jnp.float32)
        beta = jnp.zeros((cin,), jnp.float32)
        w = 0.1 * jax.random.normal(kw_, (3, 3, cin, growth), dtype=jnp.float32)
        b = 0.01 * jax.random.normal(kb_, (growth,), dtype=jnp.float32)
        params.append((gamma, beta, w, b))
        cin += growth

    out = jax.block_until_ready(dense_block_apply(x, params))
    assert out.shape == (N, C0 + num_convs * growth, H, W), out.shape

    # Apples-to-apples check: reference with bf16 matmul operands (same operand
    # rounding as the kernel's MXU path); residual differences are accumulation order.
    ref_bf16 = jax.block_until_ready(_reference(x, params, jnp.bfloat16))
    err_bf16 = float(jnp.max(jnp.abs(out - ref_bf16)))
    assert jnp.allclose(out, ref_bf16, rtol=2e-2, atol=2e-2), err_bf16

    # Sanity check against the full-f32 reference (bf16 MXU operands bound the error).
    ref_f32 = jax.block_until_ready(_reference(x, params, jnp.float32))
    err_f32 = float(jnp.max(jnp.abs(out - ref_f32)))
    assert jnp.allclose(out, ref_f32, rtol=5e-2, atol=5e-2), err_f32

    print("KERNEL_OK")
</pallas_src>

<mosaic_0001>
module attributes {stable_mosaic.version = 11 : i64} {
  func.func @_bn_stats_kernel(%arg0: i32, %arg1: memref<256x4xf32, #tpu.memory_space<vmem>>, %arg2: memref<1x4xf32, #tpu.memory_space<vmem>>, %arg3: memref<1x4xf32, #tpu.memory_space<vmem>>) attributes {dimension_semantics = [#tpu.dimension_semantics<arbitrary>], iteration_bounds = array<i64: 2>, scalar_prefetch = 0 : i64, scratch_operands = 0 : i64, tpu.core_type = #tpu.core_type<tc>, window_params = [{transform_indices = @transform_0, window_bounds = array<i64: 256, 4>}, {pipeline_mode = #tpu.pipeline_mode<synchronous>, transform_indices = @transform_1, window_bounds = array<i64: 1, 4>}, {pipeline_mode = #tpu.pipeline_mode<synchronous>, transform_indices = @transform_2, window_bounds = array<i64: 1, 4>}]} {
    %c0_i32 = arith.constant 0 : i32
    %0 = arith.cmpi eq, %arg0, %c0_i32 : i32
    %1 = arith.extui %0 : i1 to i32
    %c0_i32_0 = arith.constant 0 : i32
    %2 = arith.cmpi ne, %1, %c0_i32_0 : i32
    scf.if %2 {
      %cst_11 = arith.constant 0.000000e+00 : f32
      %15 = vector.broadcast %cst_11 : f32 to vector<1x4xf32>
      %c0_12 = arith.constant 0 : index
      %c0_13 = arith.constant 0 : index
      %16 = vector.load %arg2[%c0_12, %c0_13] : memref<1x4xf32, #tpu.memory_space<vmem>>, vector<1x4xf32>
      tpu.vector_store %arg2[%c0_12, %c0_13], %15 {strides = array<i32>} : memref<1x4xf32, #tpu.memory_space<vmem>>, vector<1x4xf32>,
      %cst_14 = arith.constant 0.000000e+00 : f32
      %17 = vector.broadcast %cst_14 : f32 to vector<1x4xf32>
      %c0_15 = arith.constant 0 : index
      %c0_16 = arith.constant 0 : index
      %18 = vector.load %arg3[%c0_15, %c0_16] : memref<1x4xf32, #tpu.memory_space<vmem>>, vector<1x4xf32>
      tpu.vector_store %arg3[%c0_15, %c0_16], %17 {strides = array<i32>} : memref<1x4xf32, #tpu.memory_space<vmem>>, vector<1x4xf32>,
    } else {
    }
    %c0 = arith.constant 0 : index
    %c0_1 = arith.constant 0 : index
    %3 = vector.load %arg1[%c0, %c0_1] : memref<256x4xf32, #tpu.memory_space<vmem>>, vector<256x4xf32>
    %c0_2 = arith.constant 0 : index
    %c0_3 = arith.constant 0 : index
    %4 = vector.load %arg2[%c0_2, %c0_3] : memref<1x4xf32, #tpu.memory_space<vmem>>, vector<1x4xf32>
    %cst = arith.constant dense<0.000000e+00> : vector<4xf32>
    %5 = vector.multi_reduction <add>, %3, %cst [0] : vector<256x4xf32> to vector<4xf32>
    %6 = vector.shape_cast %5 : vector<4xf32> to vector<1x4xf32>
    %7 = arith.addf %4, %6 : vector<1x4xf32>
    %c0_4 = arith.constant 0 : index
    %c0_5 = arith.constant 0 : index
    %8 = vector.load %arg2[%c0_4, %c0_5] : memref<1x4xf32, #tpu.memory_space<vmem>>, vector<1x4xf32>
    tpu.vector_store %arg2[%c0_4, %c0_5], %7 {strides = array<i32>} : memref<1x4xf32, #tpu.memory_space<vmem>>, vector<1x4xf32>,
    %c0_6 = arith.constant 0 : index
    %c0_7 = arith.constant 0 : index
    %9 = vector.load %arg3[%c0_6, %c0_7] : memref<1x4xf32, #tpu.memory_space<vmem>>, vector<1x4xf32>
    %10 = arith.mulf %3, %3 : vector<256x4xf32>
    %cst_8 = arith.constant dense<0.000000e+00> : vector<4xf32>
    %11 = vector.multi_reduction <add>, %10, %cst_8 [0] : vector<256x4xf32> to vector<4xf32>
    %12 = vector.shape_cast %11 : vector<4xf32> to vector<1x4xf32>
    %13 = arith.addf %9, %12 : vector<1x4xf32>
    %c0_9 = arith.constant 0 : index
    %c0_10 = arith.constant 0 : index
    %14 = vector.load %arg3[%c0_9, %c0_10] : memref<1x4xf32, #tpu.memory_space<vmem>>, vector<1x4xf32>
    tpu.vector_store %arg3[%c0_9, %c0_10], %13 {strides = array<i32>} : memref<1x4xf32, #tpu.memory_space<vmem>>, vector<1x4xf32>,
    return
  }
  func.func @transform_0(%arg0: i32) -> (i32, i32) {
    %c0_i32 = arith.constant 0 : i32
    %c0_i32_0 = arith.constant 0 : i32
    return %arg0, %c0_i32 : i32, i32
  }
  func.func @transform_1(%arg0: i32) -> (i32, i32) {
    %c0_i32 = arith.constant 0 : i32
    %c0_i32_0 = arith.constant 0 : i32
    %c0_i32_1 = arith.constant 0 : i32
    return %c0_i32, %c0_i32_0 : i32, i32
  }
  func.func @transform_2(%arg0: i32) -> (i32, i32) {
    %c0_i32 = arith.constant 0 : i32
    %c0_i32_0 = arith.constant 0 : i32
    %c0_i32_1 = arith.constant 0 : i32
    return %c0_i32, %c0_i32_0 : i32, i32
  }
}

module attributes {stable_mosaic.version = 11 : i64} {
  func.func @_bn_relu_conv_kernel(%arg0: i32, %arg1: memref<1x18x18x4xf32, #tpu.memory_space<vmem>>, %arg2: memref<1x4xf32, #tpu.memory_space<vmem>>, %arg3: memref<1x4xf32, #tpu.memory_space<vmem>>, %arg4: memref<18x18x1xf32, #tpu.memory_space<vmem>>, %arg5: memref<9x4x8xbf16, #tpu.memory_space<vmem>>, %arg6: memref<1x8xf32, #tpu.memory_space<vmem>>, %arg7: memref<1x16x16x8xf32, #tpu.memory_space<vmem>>) attributes {dimension_semantics = [#tpu.dimension_semantics<parallel>], iteration_bounds = array<i64: 2>, scalar_prefetch = 0 : i64, scratch_operands = 0 : i64, tpu.core_type = #tpu.core_type<tc>, window_params = [{transform_indices = @transform_0, window_bounds = array<i64: 1, 18, 18, 4>}, {pipeline_mode = #tpu.pipeline_mode<synchronous>, transform_indices = @transform_1, window_bounds = array<i64: 1, 4>}, {pipeline_mode = #tpu.pipeline_mode<synchronous>, transform_indices = @transform_2, window_bounds = array<i64: 1, 4>}, {pipeline_mode = #tpu.pipeline_mode<synchronous>, transform_indices = @transform_3, window_bounds = array<i64: 18, 18, 1>}, {pipeline_mode = #tpu.pipeline_mode<synchronous>, transform_indices = @transform_4, window_bounds = array<i64: 9, 4, 8>}, {pipeline_mode = #tpu.pipeline_mode<synchronous>, transform_indices = @transform_5, window_bounds = array<i64: 1, 8>}, {transform_indices = @transform_6, window_bounds = array<i64: 1, 16, 16, 8>}]} {
    %c0 = arith.constant 0 : index
    %c0_0 = arith.constant 0 : index
    %c0_1 = arith.constant 0 : index
    %c0_2 = arith.constant 0 : index
    %0 = vector.load %arg1[%c0, %c0_0, %c0_1, %c0_2] : memref<1x18x18x4xf32, #tpu.memory_space<vmem>>, vector<1x18x18x4xf32>
    %1 = vector.shape_cast %0 : vector<1x18x18x4xf32> to vector<18x18x4xf32>
    %c0_3 = arith.constant 0 : index
    %c0_4 = arith.constant 0 : index
    %2 = vector.load %arg2[%c0_3, %c0_4] : memref<1x4xf32, #tpu.memory_space<vmem>>, vector<1x4xf32>
    %3 = vector.shape_cast %2 : vector<1x4xf32> to vector<1x1x4xf32>
    %c0_5 = arith.constant 0 : index
    %c0_6 = arith.constant 0 : index
    %4 = vector.load %arg3[%c0_5, %c0_6] : memref<1x4xf32, #tpu.memory_space<vmem>>, vector<1x4xf32>
    %5 = vector.shape_cast %4 : vector<1x4xf32> to vector<1x1x4xf32>
    %6 = vector.broadcast %3 : vector<1x1x4xf32> to vector<18x18x4xf32>
    %7 = arith.mulf %1, %6 : vector<18x18x4xf32>
    %8 = vector.broadcast %5 : vector<1x1x4xf32> to vector<18x18x4xf32>
    %9 = arith.addf %7, %8 : vector<18x18x4xf32>
    %cst = arith.constant 0.000000e+00 : f32
    %10 = vector.broadcast %cst : f32 to vector<18x18x4xf32>
    %11 = arith.maximumf %9, %10 : vector<18x18x4xf32>
    %c0_7 = arith.constant 0 : index
    %c0_8 = arith.constant 0 : index
    %c0_9 = arith.constant 0 : index
    %12 = vector.load %arg4[%c0_7, %c0_8, %c0_9] : memref<18x18x1xf32, #tpu.memory_space<vmem>>, vector<18x18x1xf32>
    %13 = vector.broadcast %12 : vector<18x18x1xf32> to vector<18x18x4xf32>
    %14 = arith.mulf %11, %13 : vector<18x18x4xf32>
    %cst_10 = arith.constant 0.000000e+00 : f32
    %15 = vector.broadcast %cst_10 : f32 to vector<256x8xf32>
    %16 = vector.extract_strided_slice %14 {offsets = [0, 0, 0], sizes = [16, 16, 4], strides = [1, 1, 1]} : vector<18x18x4xf32> to vector<16x16x4xf32>
    %17 = vector.shape_cast %16 : vector<16x16x4xf32> to vector<256x4xf32>
    %18 = arith.truncf %17 : vector<256x4xf32> to vector<256x4xbf16>
    %c0_11 = arith.constant 0 : index
    %c0_12 = arith.constant 0 : index
    %c0_13 = arith.constant 0 : index
    %19 = vector.load %arg5[%c0_11, %c0_12, %c0_13] : memref<9x4x8xbf16, #tpu.memory_space<vmem>>, vector<1x4x8xbf16>
    %20 = vector.shape_cast %19 : vector<1x4x8xbf16> to vector<4x8xbf16>
    %cst_14 = arith.constant dense<0.000000e+00> : vector<256x8xf32>
    %21 = tpu.matmul %18, %20, %cst_14 {dimension_numbers = #tpu.dot_dimension_numbers<[1], [0], [0], [1], [0, 0, 1, 1], [], []>} : vector<256x4xbf16>, vector<4x8xbf16>, vector<256x8xf32> -> vector<256x8xf32>
    %22 = arith.addf %15, %21 : vector<256x8xf32>
    %23 = vector.extract_strided_slice %14 {offsets = [0, 1, 0], sizes = [16, 16, 4], strides = [1, 1, 1]} : vector<18x18x4xf32> to vector<16x16x4xf32>
    %24 = vector.shape_cast %23 : vector<16x16x4xf32> to vector<256x4xf32>
    %25 = arith.truncf %24 : vector<256x4xf32> to vector<256x4xbf16>
    %c1 = arith.constant 1 : index
    %c0_15 = arith.constant 0 : index
    %c0_16 = arith.constant 0 : index
    %26 = vector.load %arg5[%c1, %c0_15, %c0_16] : memref<9x4x8xbf16, #tpu.memory_space<vmem>>, vector<1x4x8xbf16>
    %27 = vector.shape_cast %26 : vector<1x4x8xbf16> to vector<4x8xbf16>
    %cst_17 = arith.constant dense<0.000000e+00> : vector<256x8xf32>
    %28 = tpu.matmul %25, %27, %cst_17 {dimension_numbers = #tpu.dot_dimension_numbers<[1], [0], [0], [1], [0, 0, 1, 1], [], []>} : vector<256x4xbf16>, vector<4x8xbf16>, vector<256x8xf32> -> vector<256x8xf32>
    %29 = arith.addf %22, %28 : vector<256x8xf32>
    %30 = vector.extract_strided_slice %14 {offsets = [0, 2, 0], sizes = [16, 16, 4], strides = [1, 1, 1]} : vector<18x18x4xf32> to vector<16x16x4xf32>
    %31 = vector.shape_cast %30 : vector<16x16x4xf32> to vector<256x4xf32>
    %32 = arith.truncf %31 : vector<256x4xf32> to vector<256x4xbf16>
    %c2 = arith.constant 2 : index
    %c0_18 = arith.constant 0 : index
    %c0_19 = arith.constant 0 : index
    %33 = vector.load %arg5[%c2, %c0_18, %c0_19] : memref<9x4x8xbf16, #tpu.memory_space<vmem>>, vector<1x4x8xbf16>
    %34 = vector.shape_cast %33 : vector<1x4x8xbf16> to vector<4x8xbf16>
    %cst_20 = arith.constant dense<0.000000e+00> : vector<256x8xf32>
    %35 = tpu.matmul %32, %34, %cst_20 {dimension_numbers = #tpu.dot_dimension_numbers<[1], [0], [0], [1], [0, 0, 1, 1], [], []>} : vector<256x4xbf16>, vector<4x8xbf16>, vector<256x8xf32> -> vector<256x8xf32>
    %36 = arith.addf %29, %35 : vector<256x8xf32>
    %37 = vector.extract_strided_slice %14 {offsets = [1, 0, 0], sizes = [16, 16, 4], strides = [1, 1, 1]} : vector<18x18x4xf32> to vector<16x16x4xf32>
    %38 = vector.shape_cast %37 : vector<16x16x4xf32> to vector<256x4xf32>
    %39 = arith.truncf %38 : vector<256x4xf32> to vector<256x4xbf16>
    %c3 = arith.constant 3 : index
    %c0_21 = arith.constant 0 : index
    %c0_22 = arith.constant 0 : index
    %40 = vector.load %arg5[%c3, %c0_21, %c0_22] : memref<9x4x8xbf16, #tpu.memory_space<vmem>>, vector<1x4x8xbf16>
    %41 = vector.shape_cast %40 : vector<1x4x8xbf16> to vector<4x8xbf16>
    %cst_23 = arith.constant dense<0.000000e+00> : vector<256x8xf32>
    %42 = tpu.matmul %39, %41, %cst_23 {dimension_numbers = #tpu.dot_dimension_numbers<[1], [0], [0], [1], [0, 0, 1, 1], [], []>} : vector<256x4xbf16>, vector<4x8xbf16>, vector<256x8xf32> -> vector<256x8xf32>
    %43 = arith.addf %36, %42 : vector<256x8xf32>
    %44 = vector.extract_strided_slice %14 {offsets = [1, 1, 0], sizes = [16, 16, 4], strides = [1, 1, 1]} : vector<18x18x4xf32> to vector<16x16x4xf32>
    %45 = vector.shape_cast %44 : vector<16x16x4xf32> to vector<256x4xf32>
    %46 = arith.truncf %45 : vector<256x4xf32> to vector<256x4xbf16>
    %c4 = arith.constant 4 : index
    %c0_24 = arith.constant 0 : index
    %c0_25 = arith.constant 0 : index
    %47 = vector.load %arg5[%c4, %c0_24, %c0_25] : memref<9x4x8xbf16, #tpu.memory_space<vmem>>, vector<1x4x8xbf16>
    %48 = vector.shape_cast %47 : vector<1x4x8xbf16> to vector<4x8xbf16>
    %cst_26 = arith.constant dense<0.000000e+00> : vector<256x8xf32>
    %49 = tpu.matmul %46, %48, %cst_26 {dimension_numbers = #tpu.dot_dimension_numbers<[1], [0], [0], [1], [0, 0, 1, 1], [], []>} : vector<256x4xbf16>, vector<4x8xbf16>, vector<256x8xf32> -> vector<256x8xf32>
    %50 = arith.addf %43, %49 : vector<256x8xf32>
    %51 = vector.extract_strided_slice %14 {offsets = [1, 2, 0], sizes = [16, 16, 4], strides = [1, 1, 1]} : vector<18x18x4xf32> to vector<16x16x4xf32>
    %52 = vector.shape_cast %51 : vector<16x16x4xf32> to vector<256x4xf32>
    %53 = arith.truncf %52 : vector<256x4xf32> to vector<256x4xbf16>
    %c5 = arith.constant 5 : index
    %c0_27 = arith.constant 0 : index
    %c0_28 = arith.constant 0 : index
    %54 = vector.load %arg5[%c5, %c0_27, %c0_28] : memref<9x4x8xbf16, #tpu.memory_space<vmem>>, vector<1x4x8xbf16>
    %55 = vector.shape_cast %54 : vector<1x4x8xbf16> to vector<4x8xbf16>
    %cst_29 = arith.constant dense<0.000000e+00> : vector<256x8xf32>
    %56 = tpu.matmul %53, %55, %cst_29 {dimension_numbers = #tpu.dot_dimension_numbers<[1], [0], [0], [1], [0, 0, 1, 1], [], []>} : vector<256x4xbf16>, vector<4x8xbf16>, vector<256x8xf32> -> vector<256x8xf32>
    %57 = arith.addf %50, %56 : vector<256x8xf32>
    %58 = vector.extract_strided_slice %14 {offsets = [2, 0, 0], sizes = [16, 16, 4], strides = [1, 1, 1]} : vector<18x18x4xf32> to vector<16x16x4xf32>
    %59 = vector.shape_cast %58 : vector<16x16x4xf32> to vector<256x4xf32>
    %60 = arith.truncf %59 : vector<256x4xf32> to vector<256x4xbf16>
    %c6 = arith.constant 6 : index
    %c0_30 = arith.constant 0 : index
    %c0_31 = arith.constant 0 : index
    %61 = vector.load %arg5[%c6, %c0_30, %c0_31] : memref<9x4x8xbf16, #tpu.memory_space<vmem>>, vector<1x4x8xbf16>
    %62 = vector.shape_cast %61 : vector<1x4x8xbf16> to vector<4x8xbf16>
    %cst_32 = arith.constant dense<0.000000e+00> : vector<256x8xf32>
    %63 = tpu.matmul %60, %62, %cst_32 {dimension_numbers = #tpu.dot_dimension_numbers<[1], [0], [0], [1], [0, 0, 1, 1], [], []>} : vector<256x4xbf16>, vector<4x8xbf16>, vector<256x8xf32> -> vector<256x8xf32>
    %64 = arith.addf %57, %63 : vector<256x8xf32>
    %65 = vector.extract_strided_slice %14 {offsets = [2, 1, 0], sizes = [16, 16, 4], strides = [1, 1, 1]} : vector<18x18x4xf32> to vector<16x16x4xf32>
    %66 = vector.shape_cast %65 : vector<16x16x4xf32> to vector<256x4xf32>
    %67 = arith.truncf %66 : vector<256x4xf32> to vector<256x4xbf16>
    %c7 = arith.constant 7 : index
    %c0_33 = arith.constant 0 : index
    %c0_34 = arith.constant 0 : index
    %68 = vector.load %arg5[%c7, %c0_33, %c0_34] : memref<9x4x8xbf16, #tpu.memory_space<vmem>>, vector<1x4x8xbf16>
    %69 = vector.shape_cast %68 : vector<1x4x8xbf16> to vector<4x8xbf16>
    %cst_35 = arith.constant dense<0.000000e+00> : vector<256x8xf32>
    %70 = tpu.matmul %67, %69, %cst_35 {dimension_numbers = #tpu.dot_dimension_numbers<[1], [0], [0], [1], [0, 0, 1, 1], [], []>} : vector<256x4xbf16>, vector<4x8xbf16>, vector<256x8xf32> -> vector<256x8xf32>
    %71 = arith.addf %64, %70 : vector<256x8xf32>
    %72 = vector.extract_strided_slice %14 {offsets = [2, 2, 0], sizes = [16, 16, 4], strides = [1, 1, 1]} : vector<18x18x4xf32> to vector<16x16x4xf32>
    %73 = vector.shape_cast %72 : vector<16x16x4xf32> to vector<256x4xf32>
    %74 = arith.truncf %73 : vector<256x4xf32> to vector<256x4xbf16>
    %c8 = arith.constant 8 : index
    %c0_36 = arith.constant 0 : index
    %c0_37 = arith.constant 0 : index
    %75 = vector.load %arg5[%c8, %c0_36, %c0_37] : memref<9x4x8xbf16, #tpu.memory_space<vmem>>, vector<1x4x8xbf16>
    %76 = vector.shape_cast %75 : vector<1x4x8xbf16> to vector<4x8xbf16>
    %cst_38 = arith.constant dense<0.000000e+00> : vector<256x8xf32>
    %77 = tpu.matmul %74, %76, %cst_38 {dimension_numbers = #tpu.dot_dimension_numbers<[1], [0], [0], [1], [0, 0, 1, 1], [], []>} : vector<256x4xbf16>, vector<4x8xbf16>, vector<256x8xf32> -> vector<256x8xf32>
    %78 = arith.addf %71, %77 : vector<256x8xf32>
    %c0_39 = arith.constant 0 : index
    %c0_40 = arith.constant 0 : index
    %79 = vector.load %arg6[%c0_39, %c0_40] : memref<1x8xf32, #tpu.memory_space<vmem>>, vector<1x8xf32>
    %80 = vector.broadcast %79 : vector<1x8xf32> to vector<256x8xf32>
    %81 = arith.addf %78, %80 : vector<256x8xf32>
    %82 = vector.shape_cast %81 : vector<256x8xf32> to vector<16x16x8xf32>
    %c0_41 = arith.constant 0 : index
    %c0_42 = arith.constant 0 : index
    %c0_43 = arith.constant 0 : index
    %c0_44 = arith.constant 0 : index
    %83 = vector.load %arg7[%c0_41, %c0_42, %c0_43, %c0_44] : memref<1x16x16x8xf32, #tpu.memory_space<vmem>>, vector<1x16x16x8xf32>
    %84 = vector.shape_cast %83 : vector<1x16x16x8xf32> to vector<16x16x8xf32>
    %85 = vector.shape_cast %82 : vector<16x16x8xf32> to vector<1x16x16x8xf32>
    tpu.vector_store %arg7[%c0_41, %c0_42, %c0_43, %c0_44], %85 {strides = array<i32>} : memref<1x16x16x8xf32, #tpu.memory_space<vmem>>, vector<1x16x16x8xf32>,
    return
  }
  func.func @transform_0(%arg0: i32) -> (i32, i32, i32, i32) {
    %c0_i32 = arith.constant 0 : i32
    %c0_i32_0 = arith.constant 0 : i32
    %c0_i32_1 = arith.constant 0 : i32
    %c0_i32_2 = arith.constant 0 : i32
    return %arg0, %c0_i32, %c0_i32_0, %c0_i32_1 : i32, i32, i32, i32
  }
  func.func @transform_1(%arg0: i32) -> (i32, i32) {
    %c0_i32 = arith.constant 0 : i32
    %c0_i32_0 = arith.constant 0 : i32
    %c0_i32_1 = arith.constant 0 : i32
    return %c0_i32, %c0_i32_0 : i32, i32
  }
  func.func @transform_2(%arg0: i32) -> (i32, i32) {
    %c0_i32 = arith.constant 0 : i32
    %c0_i32_0 = arith.constant 0 : i32
    %c0_i32_1 = arith.constant 0 : i32
    return %c0_i32, %c0_i32_0 : i32, i32
  }
  func.func @transform_3(%arg0: i32) -> (i32, i32, i32) {
    %c0_i32 = arith.constant 0 : i32
    %c0_i32_0 = arith.constant 0 : i32
    %c0_i32_1 = arith.constant 0 : i32
    %c0_i32_2 = arith.constant 0 : i32
    return %c0_i32, %c0_i32_0, %c0_i32_1 : i32, i32, i32
  }
  func.func @transform_4(%arg0: i32) -> (i32, i32, i32) {
    %c0_i32 = arith.constant 0 : i32
    %c0_i32_0 = arith.constant 0 : i32
    %c0_i32_1 = arith.constant 0 : i32
    %c0_i32_2 = arith.constant 0 : i32
    return %c0_i32, %c0_i32_0, %c0_i32_1 : i32, i32, i32
  }
  func.func @transform_5(%arg0: i32) -> (i32, i32) {
    %c0_i32 = arith.constant 0 : i32
    %c0_i32_0 = arith.constant 0 : i32
    %c0_i32_1 = arith.constant 0 : i32
    return %c0_i32, %c0_i32_0 : i32, i32
  }
  func.func @transform_6(%arg0: i32) -> (i32, i32, i32, i32) {
    %c0_i32 = arith.constant 0 : i32
    %c0_i32_0 = arith.constant 0 : i32
    %c0_i32_1 = arith.constant 0 : i32
    %c0_i32_2 = arith.constant 0 : i32
    return %arg0, %c0_i32, %c0_i32_0, %c0_i32_1 : i32, i32, i32, i32
  }
}

module attributes {stable_mosaic.version = 11 : i64} {
  func.func @_bn_stats_kernel(%arg0: i32, %arg1: memref<256x12xf32, #tpu.memory_space<vmem>>, %arg2: memref<1x12xf32, #tpu.memory_space<vmem>>, %arg3: memref<1x12xf32, #tpu.memory_space<vmem>>) attributes {dimension_semantics = [#tpu.dimension_semantics<arbitrary>], iteration_bounds = array<i64: 2>, scalar_prefetch = 0 : i64, scratch_operands = 0 : i64, tpu.core_type = #tpu.core_type<tc>, window_params = [{transform_indices = @transform_0, window_bounds = array<i64: 256, 12>}, {pipeline_mode = #tpu.pipeline_mode<synchronous>, transform_indices = @transform_1, window_bounds = array<i64: 1, 12>}, {pipeline_mode = #tpu.pipeline_mode<synchronous>, transform_indices = @transform_2, window_bounds = array<i64: 1, 12>}]} {
    %c0_i32 = arith.constant 0 : i32
    %0 = arith.cmpi eq, %arg0, %c0_i32 : i32
    %1 = arith.extui %0 : i1 to i32
    %c0_i32_0 = arith.constant 0 : i32
    %2 = arith.cmpi ne, %1, %c0_i32_0 : i32
    scf.if %2 {
      %cst_11 = arith.constant 0.000000e+00 : f32
      %15 = vector.broadcast %cst_11 : f32 to vector<1x12xf32>
      %c0_12 = arith.constant 0 : index
      %c0_13 = arith.constant 0 : index
      %16 = vector.load %arg2[%c0_12, %c0_13] : memref<1x12xf32, #tpu.memory_space<vmem>>, vector<1x12xf32>
      tpu.vector_store %arg2[%c0_12, %c0_13], %15 {strides = array<i32>} : memref<1x12xf32, #tpu.memory_space<vmem>>, vector<1x12xf32>,
      %cst_14 = arith.constant 0.000000e+00 : f32
      %17 = vector.broadcast %cst_14 : f32 to vector<1x12xf32>
      %c0_15 = arith.constant 0 : index
      %c0_16 = arith.constant 0 : index
      %18 = vector.load %arg3[%c0_15, %c0_16] : memref<1x12xf32, #tpu.memory_space<vmem>>, vector<1x12xf32>
      tpu.vector_store %arg3[%c0_15, %c0_16], %17 {strides = array<i32>} : memref<1x12xf32, #tpu.memory_space<vmem>>, vector<1x12xf32>,
    } else {
    }
    %c0 = arith.constant 0 : index
    %c0_1 = arith.constant 0 : index
    %3 = vector.load %arg1[%c0, %c0_1] : memref<256x12xf32, #tpu.memory_space<vmem>>, vector<256x12xf32>
    %c0_2 = arith.constant 0 : index
    %c0_3 = arith.constant 0 : index
    %4 = vector.load %arg2[%c0_2, %c0_3] : memref<1x12xf32, #tpu.memory_space<vmem>>, vector<1x12xf32>
    %cst = arith.constant dense<0.000000e+00> : vector<12xf32>
    %5 = vector.multi_reduction <add>, %3, %cst [0] : vector<256x12xf32> to vector<12xf32>
    %6 = vector.shape_cast %5 : vector<12xf32> to vector<1x12xf32>
    %7 = arith.addf %4, %6 : vector<1x12xf32>
    %c0_4 = arith.constant 0 : index
    %c0_5 = arith.constant 0 : index
    %8 = vector.load %arg2[%c0_4, %c0_5] : memref<1x12xf32, #tpu.memory_space<vmem>>, vector<1x12xf32>
    tpu.vector_store %arg2[%c0_4, %c0_5], %7 {strides = array<i32>} : memref<1x12xf32, #tpu.memory_space<vmem>>, vector<1x12xf32>,
    %c0_6 = arith.constant 0 : index
    %c0_7 = arith.constant 0 : index
    %9 = vector.load %arg3[%c0_6, %c0_7] : memref<1x12xf32, #tpu.memory_space<vmem>>, vector<1x12xf32>
    %10 = arith.mulf %3, %3 : vector<256x12xf32>
    %cst_8 = arith.constant dense<0.000000e+00> : vector<12xf32>
    %11 = vector.multi_reduction <add>, %10, %cst_8 [0] : vector<256x12xf32> to vector<12xf32>
    %12 = vector.shape_cast %11 : vector<12xf32> to vector<1x12xf32>
    %13 = arith.addf %9, %12 : vector<1x12xf32>
    %c0_9 = arith.constant 0 : index
    %c0_10 = arith.constant 0 : index
    %14 = vector.load %arg3[%c0_9, %c0_10] : memref<1x12xf32, #tpu.memory_space<vmem>>, vector<1x12xf32>
    tpu.vector_store %arg3[%c0_9, %c0_10], %13 {strides = array<i32>} : memref<1x12xf32, #tpu.memory_space<vmem>>, vector<1x12xf32>,
    return
  }
  func.func @transform_0(%arg0: i32) -> (i32, i32) {
    %c0_i32 = arith.constant 0 : i32
    %c0_i32_0 = arith.constant 0 : i32
    return %arg0, %c0_i32 : i32, i32
  }
  func.func @transform_1(%arg0: i32) -> (i32, i32) {
    %c0_i32 = arith.constant 0 : i32
    %c0_i32_0 = arith.constant 0 : i32
    %c0_i32_1 = arith.constant 0 : i32
    return %c0_i32, %c0_i32_0 : i32, i32
  }
  func.func @transform_2(%arg0: i32) -> (i32, i32) {
    %c0_i32 = arith.constant 0 : i32
    %c0_i32_0 = arith.constant 0 : i32
    %c0_i32_1 = arith.constant 0 : i32
    return %c0_i32, %c0_i32_0 : i32, i32
  }
}

module attributes {stable_mosaic.version = 11 : i64} {
  func.func @_bn_relu_conv_kernel(%arg0: i32, %arg1: memref<1x18x18x12xf32, #tpu.memory_space<vmem>>, %arg2: memref<1x12xf32, #tpu.memory_space<vmem>>, %arg3: memref<1x12xf32, #tpu.memory_space<vmem>>, %arg4: memref<18x18x1xf32, #tpu.memory_space<vmem>>, %arg5: memref<9x12x8xbf16, #tpu.memory_space<vmem>>, %arg6: memref<1x8xf32, #tpu.memory_space<vmem>>, %arg7: memref<1x16x16x8xf32, #tpu.memory_space<vmem>>) attributes {dimension_semantics = [#tpu.dimension_semantics<parallel>], iteration_bounds = array<i64: 2>, scalar_prefetch = 0 : i64, scratch_operands = 0 : i64, tpu.core_type = #tpu.core_type<tc>, window_params = [{transform_indices = @transform_0, window_bounds = array<i64: 1, 18, 18, 12>}, {pipeline_mode = #tpu.pipeline_mode<synchronous>, transform_indices = @transform_1, window_bounds = array<i64: 1, 12>}, {pipeline_mode = #tpu.pipeline_mode<synchronous>, transform_indices = @transform_2, window_bounds = array<i64: 1, 12>}, {pipeline_mode = #tpu.pipeline_mode<synchronous>, transform_indices = @transform_3, window_bounds = array<i64: 18, 18, 1>}, {pipeline_mode = #tpu.pipeline_mode<synchronous>, transform_indices = @transform_4, window_bounds = array<i64: 9, 12, 8>}, {pipeline_mode = #tpu.pipeline_mode<synchronous>, transform_indices = @transform_5, window_bounds = array<i64: 1, 8>}, {transform_indices = @transform_6, window_bounds = array<i64: 1, 16, 16, 8>}]} {
    %c0 = arith.constant 0 : index
    %c0_0 = arith.constant 0 : index
    %c0_1 = arith.constant 0 : index
    %c0_2 = arith.constant 0 : index
    %0 = vector.load %arg1[%c0, %c0_0, %c0_1, %c0_2] : memref<1x18x18x12xf32, #tpu.memory_space<vmem>>, vector<1x18x18x12xf32>
    %1 = vector.shape_cast %0 : vector<1x18x18x12xf32> to vector<18x18x12xf32>
    %c0_3 = arith.constant 0 : index
    %c0_4 = arith.constant 0 : index
    %2 = vector.load %arg2[%c0_3, %c0_4] : memref<1x12xf32, #tpu.memory_space<vmem>>, vector<1x12xf32>
    %3 = vector.shape_cast %2 : vector<1x12xf32> to vector<1x1x12xf32>
    %c0_5 = arith.constant 0 : index
    %c0_6 = arith.constant 0 : index
    %4 = vector.load %arg3[%c0_5, %c0_6] : memref<1x12xf32, #tpu.memory_space<vmem>>, vector<1x12xf32>
    %5 = vector.shape_cast %4 : vector<1x12xf32> to vector<1x1x12xf32>
    %6 = vector.broadcast %3 : vector<1x1x12xf32> to vector<18x18x12xf32>
    %7 = arith.mulf %1, %6 : vector<18x18x12xf32>
    %8 = vector.broadcast %5 : vector<1x1x12xf32> to vector<18x18x12xf32>
    %9 = arith.addf %7, %8 : vector<18x18x12xf32>
    %cst = arith.constant 0.000000e+00 : f32
    %10 = vector.broadcast %cst : f32 to vector<18x18x12xf32>
    %11 = arith.maximumf %9, %10 : vector<18x18x12xf32>
    %c0_7 = arith.constant 0 : index
    %c0_8 = arith.constant 0 : index
    %c0_9 = arith.constant 0 : index
    %12 = vector.load %arg4[%c0_7, %c0_8, %c0_9] : memref<18x18x1xf32, #tpu.memory_space<vmem>>, vector<18x18x1xf32>
    %13 = vector.broadcast %12 : vector<18x18x1xf32> to vector<18x18x12xf32>
    %14 = arith.mulf %11, %13 : vector<18x18x12xf32>
    %cst_10 = arith.constant 0.000000e+00 : f32
    %15 = vector.broadcast %cst_10 : f32 to vector<256x8xf32>
    %16 = vector.extract_strided_slice %14 {offsets = [0, 0, 0], sizes = [16, 16, 12], strides = [1, 1, 1]} : vector<18x18x12xf32> to vector<16x16x12xf32>
    %17 = vector.shape_cast %16 : vector<16x16x12xf32> to vector<256x12xf32>
    %18 = arith.truncf %17 : vector<256x12xf32> to vector<256x12xbf16>
    %c0_11 = arith.constant 0 : index
    %c0_12 = arith.constant 0 : index
    %c0_13 = arith.constant 0 : index
    %19 = vector.load %arg5[%c0_11, %c0_12, %c0_13] : memref<9x12x8xbf16, #tpu.memory_space<vmem>>, vector<1x12x8xbf16>
    %20 = vector.shape_cast %19 : vector<1x12x8xbf16> to vector<12x8xbf16>
    %cst_14 = arith.constant dense<0.000000e+00> : vector<256x8xf32>
    %21 = tpu.matmul %18, %20, %cst_14 {dimension_numbers = #tpu.dot_dimension_numbers<[1], [0], [0], [1], [0, 0, 1, 1], [], []>} : vector<256x12xbf16>, vector<12x8xbf16>, vector<256x8xf32> -> vector<256x8xf32>
    %22 = arith.addf %15, %21 : vector<256x8xf32>
    %23 = vector.extract_strided_slice %14 {offsets = [0, 1, 0], sizes = [16, 16, 12], strides = [1, 1, 1]} : vector<18x18x12xf32> to vector<16x16x12xf32>
    %24 = vector.shape_cast %23 : vector<16x16x12xf32> to vector<256x12xf32>
    %25 = arith.truncf %24 : vector<256x12xf32> to vector<256x12xbf16>
    %c1 = arith.constant 1 : index
    %c0_15 = arith.constant 0 : index
    %c0_16 = arith.constant 0 : index
    %26 = vector.load %arg5[%c1, %c0_15, %c0_16] : memref<9x12x8xbf16, #tpu.memory_space<vmem>>, vector<1x12x8xbf16>
    %27 = vector.shape_cast %26 : vector<1x12x8xbf16> to vector<12x8xbf16>
    %cst_17 = arith.constant dense<0.000000e+00> : vector<256x8xf32>
    %28 = tpu.matmul %25, %27, %cst_17 {dimension_numbers = #tpu.dot_dimension_numbers<[1], [0], [0], [1], [0, 0, 1, 1], [], []>} : vector<256x12xbf16>, vector<12x8xbf16>, vector<256x8xf32> -> vector<256x8xf32>
    %29 = arith.addf %22, %28 : vector<256x8xf32>
    %30 = vector.extract_strided_slice %14 {offsets = [0, 2, 0], sizes = [16, 16, 12], strides = [1, 1, 1]} : vector<18x18x12xf32> to vector<16x16x12xf32>
    %31 = vector.shape_cast %30 : vector<16x16x12xf32> to vector<256x12xf32>
    %32 = arith.truncf %31 : vector<256x12xf32> to vector<256x12xbf16>
    %c2 = arith.constant 2 : index
    %c0_18 = arith.constant 0 : index
    %c0_19 = arith.constant 0 : index
    %33 = vector.load %arg5[%c2, %c0_18, %c0_19] : memref<9x12x8xbf16, #tpu.memory_space<vmem>>, vector<1x12x8xbf16>
    %34 = vector.shape_cast %33 : vector<1x12x8xbf16> to vector<12x8xbf16>
    %cst_20 = arith.constant dense<0.000000e+00> : vector<256x8xf32>
    %35 = tpu.matmul %32, %34, %cst_20 {dimension_numbers = #tpu.dot_dimension_numbers<[1], [0], [0], [1], [0, 0, 1, 1], [], []>} : vector<256x12xbf16>, vector<12x8xbf16>, vector<256x8xf32> -> vector<256x8xf32>
    %36 = arith.addf %29, %35 : vector<256x8xf32>
    %37 = vector.extract_strided_slice %14 {offsets = [1, 0, 0], sizes = [16, 16, 12], strides = [1, 1, 1]} : vector<18x18x12xf32> to vector<16x16x12xf32>
    %38 = vector.shape_cast %37 : vector<16x16x12xf32> to vector<256x12xf32>
    %39 = arith.truncf %38 : vector<256x12xf32> to vector<256x12xbf16>
    %c3 = arith.constant 3 : index
    %c0_21 = arith.constant 0 : index
    %c0_22 = arith.constant 0 : index
    %40 = vector.load %arg5[%c3, %c0_21, %c0_22] : memref<9x12x8xbf16, #tpu.memory_space<vmem>>, vector<1x12x8xbf16>
    %41 = vector.shape_cast %40 : vector<1x12x8xbf16> to vector<12x8xbf16>
    %cst_23 = arith.constant dense<0.000000e+00> : vector<256x8xf32>
    %42 = tpu.matmul %39, %41, %cst_23 {dimension_numbers = #tpu.dot_dimension_numbers<[1], [0], [0], [1], [0, 0, 1, 1], [], []>} : vector<256x12xbf16>, vector<12x8xbf16>, vector<256x8xf32> -> vector<256x8xf32>
    %43 = arith.addf %36, %42 : vector<256x8xf32>
    %44 = vector.extract_strided_slice %14 {offsets = [1, 1, 0], sizes = [16, 16, 12], strides = [1, 1, 1]} : vector<18x18x12xf32> to vector<16x16x12xf32>
    %45 = vector.shape_cast %44 : vector<16x16x12xf32> to vector<256x12xf32>
    %46 = arith.truncf %45 : vector<256x12xf32> to vector<256x12xbf16>
    %c4 = arith.constant 4 : index
    %c0_24 = arith.constant 0 : index
    %c0_25 = arith.constant 0 : index
    %47 = vector.load %arg5[%c4, %c0_24, %c0_25] : memref<9x12x8xbf16, #tpu.memory_space<vmem>>, vector<1x12x8xbf16>
    %48 = vector.shape_cast %47 : vector<1x12x8xbf16> to vector<12x8xbf16>
    %cst_26 = arith.constant dense<0.000000e+00> : vector<256x8xf32>
    %49 = tpu.matmul %46, %48, %cst_26 {dimension_numbers = #tpu.dot_dimension_numbers<[1], [0], [0], [1], [0, 0, 1, 1], [], []>} : vector<256x12xbf16>, vector<12x8xbf16>, vector<256x8xf32> -> vector<256x8xf32>
    %50 = arith.addf %43, %49 : vector<256x8xf32>
    %51 = vector.extract_strided_slice %14 {offsets = [1, 2, 0], sizes = [16, 16, 12], strides = [1, 1, 1]} : vector<18x18x12xf32> to vector<16x16x12xf32>
    %52 = vector.shape_cast %51 : vector<16x16x12xf32> to vector<256x12xf32>
    %53 = arith.truncf %52 : vector<256x12xf32> to vector<256x12xbf16>
    %c5 = arith.constant 5 : index
    %c0_27 = arith.constant 0 : index
    %c0_28 = arith.constant 0 : index
    %54 = vector.load %arg5[%c5, %c0_27, %c0_28] : memref<9x12x8xbf16, #tpu.memory_space<vmem>>, vector<1x12x8xbf16>
    %55 = vector.shape_cast %54 : vector<1x12x8xbf16> to vector<12x8xbf16>
    %cst_29 = arith.constant dense<0.000000e+00> : vector<256x8xf32>
    %56 = tpu.matmul %53, %55, %cst_29 {dimension_numbers = #tpu.dot_dimension_numbers<[1], [0], [0], [1], [0, 0, 1, 1], [], []>} : vector<256x12xbf16>, vector<12x8xbf16>, vector<256x8xf32> -> vector<256x8xf32>
    %57 = arith.addf %50, %56 : vector<256x8xf32>
    %58 = vector.extract_strided_slice %14 {offsets = [2, 0, 0], sizes = [16, 16, 12], strides = [1, 1, 1]} : vector<18x18x12xf32> to vector<16x16x12xf32>
    %59 = vector.shape_cast %58 : vector<16x16x12xf32> to vector<256x12xf32>
    %60 = arith.truncf %59 : vector<256x12xf32> to vector<256x12xbf16>
    %c6 = arith.constant 6 : index
    %c0_30 = arith.constant 0 : index
    %c0_31 = arith.constant 0 : index
    %61 = vector.load %arg5[%c6, %c0_30, %c0_31] : memref<9x12x8xbf16, #tpu.memory_space<vmem>>, vector<1x12x8xbf16>
    %62 = vector.shape_cast %61 : vector<1x12x8xbf16> to vector<12x8xbf16>
    %cst_32 = arith.constant dense<0.000000e+00> : vector<256x8xf32>
    %63 = tpu.matmul %60, %62, %cst_32 {dimension_numbers = #tpu.dot_dimension_numbers<[1], [0], [0], [1], [0, 0, 1, 1], [], []>} : vector<256x12xbf16>, vector<12x8xbf16>, vector<256x8xf32> -> vector<256x8xf32>
    %64 = arith.addf %57, %63 : vector<256x8xf32>
    %65 = vector.extract_strided_slice %14 {offsets = [2, 1, 0], sizes = [16, 16, 12], strides = [1, 1, 1]} : vector<18x18x12xf32> to vector<16x16x12xf32>
    %66 = vector.shape_cast %65 : vector<16x16x12xf32> to vector<256x12xf32>
    %67 = arith.truncf %66 : vector<256x12xf32> to vector<256x12xbf16>
    %c7 = arith.constant 7 : index
    %c0_33 = arith.constant 0 : index
    %c0_34 = arith.constant 0 : index
    %68 = vector.load %arg5[%c7, %c0_33, %c0_34] : memref<9x12x8xbf16, #tpu.memory_space<vmem>>, vector<1x12x8xbf16>
    %69 = vector.shape_cast %68 : vector<1x12x8xbf16> to vector<12x8xbf16>
    %cst_35 = arith.constant dense<0.000000e+00> : vector<256x8xf32>
    %70 = tpu.matmul %67, %69, %cst_35 {dimension_numbers = #tpu.dot_dimension_numbers<[1], [0], [0], [1], [0, 0, 1, 1], [], []>} : vector<256x12xbf16>, vector<12x8xbf16>, vector<256x8xf32> -> vector<256x8xf32>
    %71 = arith.addf %64, %70 : vector<256x8xf32>
    %72 = vector.extract_strided_slice %14 {offsets = [2, 2, 0], sizes = [16, 16, 12], strides = [1, 1, 1]} : vector<18x18x12xf32> to vector<16x16x12xf32>
    %73 = vector.shape_cast %72 : vector<16x16x12xf32> to vector<256x12xf32>
    %74 = arith.truncf %73 : vector<256x12xf32> to vector<256x12xbf16>
    %c8 = arith.constant 8 : index
    %c0_36 = arith.constant 0 : index
    %c0_37 = arith.constant 0 : index
    %75 = vector.load %arg5[%c8, %c0_36, %c0_37] : memref<9x12x8xbf16, #tpu.memory_space<vmem>>, vector<1x12x8xbf16>
    %76 = vector.shape_cast %75 : vector<1x12x8xbf16> to vector<12x8xbf16>
    %cst_38 = arith.constant dense<0.000000e+00> : vector<256x8xf32>
    %77 = tpu.matmul %74, %76, %cst_38 {dimension_numbers = #tpu.dot_dimension_numbers<[1], [0], [0], [1], [0, 0, 1, 1], [], []>} : vector<256x12xbf16>, vector<12x8xbf16>, vector<256x8xf32> -> vector<256x8xf32>
    %78 = arith.addf %71, %77 : vector<256x8xf32>
    %c0_39 = arith.constant 0 : index
    %c0_40 = arith.constant 0 : index
    %79 = vector.load %arg6[%c0_39, %c0_40] : memref<1x8xf32, #tpu.memory_space<vmem>>, vector<1x8xf32>
    %80 = vector.broadcast %79 : vector<1x8xf32> to vector<256x8xf32>
    %81 = arith.addf %78, %80 : vector<256x8xf32>
    %82 = vector.shape_cast %81 : vector<256x8xf32> to vector<16x16x8xf32>
    %c0_41 = arith.constant 0 : index
    %c0_42 = arith.constant 0 : index
    %c0_43 = arith.constant 0 : index
    %c0_44 = arith.constant 0 : index
    %83 = vector.load %arg7[%c0_41, %c0_42, %c0_43, %c0_44] : memref<1x16x16x8xf32, #tpu.memory_space<vmem>>, vector<1x16x16x8xf32>
    %84 = vector.shape_cast %83 : vector<1x16x16x8xf32> to vector<16x16x8xf32>
    %85 = vector.shape_cast %82 : vector<16x16x8xf32> to vector<1x16x16x8xf32>
    tpu.vector_store %arg7[%c0_41, %c0_42, %c0_43, %c0_44], %85 {strides = array<i32>} : memref<1x16x16x8xf32, #tpu.memory_space<vmem>>, vector<1x16x16x8xf32>,
    return
  }
  func.func @transform_0(%arg0: i32) -> (i32, i32, i32, i32) {
    %c0_i32 = arith.constant 0 : i32
    %c0_i32_0 = arith.constant 0 : i32
    %c0_i32_1 = arith.constant 0 : i32
    %c0_i32_2 = arith.constant 0 : i32
    return %arg0, %c0_i32, %c0_i32_0, %c0_i32_1 : i32, i32, i32, i32
  }
  func.func @transform_1(%arg0: i32) -> (i32, i32) {
    %c0_i32 = arith.constant 0 : i32
    %c0_i32_0 = arith.constant 0 : i32
    %c0_i32_1 = arith.constant 0 : i32
    return %c0_i32, %c0_i32_0 : i32, i32
  }
  func.func @transform_2(%arg0: i32) -> (i32, i32) {
    %c0_i32 = arith.constant 0 : i32
    %c0_i32_0 = arith.constant 0 : i32
    %c0_i32_1 = arith.constant 0 : i32
    return %c0_i32, %c0_i32_0 : i32, i32
  }
  func.func @transform_3(%arg0: i32) -> (i32, i32, i32) {
    %c0_i32 = arith.constant 0 : i32
    %c0_i32_0 = arith.constant 0 : i32
    %c0_i32_1 = arith.constant 0 : i32
    %c0_i32_2 = arith.constant 0 : i32
    return %c0_i32, %c0_i32_0, %c0_i32_1 : i32, i32, i32
  }
  func.func @transform_4(%arg0: i32) -> (i32, i32, i32) {
    %c0_i32 = arith.constant 0 : i32
    %c0_i32_0 = arith.constant 0 : i32
    %c0_i32_1 = arith.constant 0 : i32
    %c0_i32_2 = arith.constant 0 : i32
    return %c0_i32, %c0_i32_0, %c0_i32_1 : i32, i32, i32
  }
  func.func @transform_5(%arg0: i32) -> (i32, i32) {
    %c0_i32 = arith.constant 0 : i32
    %c0_i32_0 = arith.constant 0 : i32
    %c0_i32_1 = arith.constant 0 : i32
    return %c0_i32, %c0_i32_0 : i32, i32
  }
  func.func @transform_6(%arg0: i32) -> (i32, i32, i32, i32) {
    %c0_i32 = arith.constant 0 : i32
    %c0_i32_0 = arith.constant 0 : i32
    %c0_i32_1 = arith.constant 0 : i32
    %c0_i32_2 = arith.constant 0 : i32
    return %arg0, %c0_i32, %c0_i32_0, %c0_i32_1 : i32, i32, i32, i32
  }
}

</mosaic_0001>

<bundles_post_ra>
// kernel: dense_block_apply.4
= control target key start
LH: loop header
LB: loop body
LE: loop exit
PB: predicated region body
PF: predicated region fallthrough
CT: control target
= control target key end

     0   :  { %s422_s9 = smov 0   ;;  %s554_s0 = inlined_call_operand.vmem [shape: f32[512,4], index: 0, kind: input, shape index: {}]   ;;  %s555_s1 = inlined_call_operand.vmem [shape: f32[1,4], index: 1, kind: output, shape index: {0}]   ;;  %s556_s2 = inlined_call_operand.vmem [shape: f32[1,4], index: 2, kind: output, shape index: {1}]  }
   0x1 LB: > { %s380_s10 = sadd.s32 4294967295, %s404_s9   ;;  %p383_p0 = scmp.ge.s32.totalorder %s404_s9, 1  ;;  %s404_s9 = sphi %s422_s9, %s13_s9  }
   0x2   : > { %p106_p1 = scmp.lt.s32.totalorder %s404_s9, 3 }
   0x4   : > { %p107_p2 = pnand %p383_p0, %p106_p1 }
   0x5   : > { %s384_s11 = sshll.u32 (!%p107_p2), %s380_s10, 5  ;;  %p386_p4 = scmp.ne.s32.totalorder (!%p107_p2), %s380_s10, 0 }
   0x6   : > { %110 = sbr.rel (%p107_p2) target bundleno = 104 (0x68), region = 24  ;;  %p124_p3 = scmp.lt.s32.totalorder (!%p107_p2), %s384_s11, 63 }
   0xd   : > { %s558_s11 = smov (!%p124_p3, %s384_s11), 63  ;;  %132 = sbr.rel (%p386_p4) target bundleno = 20 (0x14), region = 28 }
   0xe   : > { %s385_s12 = sshll.u32 %s558_s11, 3  ;;  %vm133_vm0 = vcmask (!%p386_p4), 24576   ;;  %v406_v0 = vmov (!%p386_p4), 0.0  }
   0xf   : > { %s433_s15 = scalar_lea.vmem %s554_s0, %s385_s12  ;;  %134 = vst.msk [vmem:[%s555_s1] sm:$0x1] (!%p386_p4), %vm133_vm0, %v406_v0  ;;  %135 = vst.msk [vmem:[%s556_s2] sm:$0x1] (!%p386_p4), %vm133_vm0, %v406_v0 }
  0x14 PF: > { %v136_v1 = vld [vmem:[%s433_s15] sm:$0xff]  ;;  %v137_v2 = vld [vmem:[%s433_s15 + $0x8] sm:$0xff]  ;;  %v138_v3 = vld [vmem:[%s433_s15 + $0x10] sm:$0xff]  ;;  %vm169_vm1 = vcmask 31744   ;;  %vm240_vm2 = vcmask 24576  }
  0x15   : > { %v170_v4 = vsel %vm169_vm1, %v136_v1, 0.0  ;;  %v171_v5 = vsel %vm169_vm1, %v137_v2, 0.0  ;;  %v173_v6 = vsel %vm169_vm1, %v138_v3, 0.0  ;;  %v139_v7 = vld [vmem:[%s433_s15 + $0x18] sm:$0xff]  ;;  %v140_v10 = vld [vmem:[%s433_s15 + $0x20] sm:$0xff]  ;;  %v141_v13 = vld [vmem:[%s433_s15 + $0x28] sm:$0xff]  ;;  %v243_v28 = vmul.f32 %v136_v1, %v136_v1 }
  0x16   : > { %v172_v8 = vadd.f32 %v171_v5, %v170_v4  ;;  %v175_v9 = vsel %vm169_vm1, %v139_v7, 0.0  ;;  %v177_v12 = vsel %vm169_vm1, %v140_v10, 0.0  ;;  %v179_v15 = vsel %vm169_vm1, %v141_v13, 0.0  ;;  %v142_v16 = vld [vmem:[%s433_s15 + $0x30] sm:$0xff]  ;;  %v143_v19 = vld [vmem:[%s433_s15 + $0x38] sm:$0xff]  ;;  %v144_v22 = vld [vmem:[%s433_s15 + $0x40] sm:$0xff] }
  0x17   : > { %v181_v18 = vsel %vm169_vm1, %v142_v16, 0.0  ;;  %v183_v21 = vsel %vm169_vm1, %v143_v19, 0.0  ;;  %v185_v24 = vsel %vm169_vm1, %v144_v22, 0.0  ;;  %v145_v25 = vld [vmem:[%s433_s15 + $0x48] sm:$0xff]  ;;  %v244_v29 = vmul.f32 %v137_v2, %v137_v2  ;;  %v146_v31 = vld [vmem:[%s433_s15 + $0x50] sm:$0xff]  ;;  %v147_v33 = vld [vmem:[%s433_s15 + $0x58] sm:$0xff] }
  0x18   : > { %v174_v11 = vadd.f32 %v173_v6, %v172_v8  ;;  %v187_v27 = vsel %vm169_vm1, %v145_v25, 0.0  ;;  %v245_v30 = vmul.f32 %v138_v3, %v138_v3  ;;  %v189_v34 = vsel %vm169_vm1, %v146_v31, 0.0  ;;  %v148_v42 = vld [vmem:[%s433_s15 + $0x60] sm:$0xff]  ;;  %v149_v48 = vld [vmem:[%s433_s15 + $0x68] sm:$0xff]  ;;  %v150_v54 = vld [vmem:[%s433_s15 + $0x70] sm:$0xff] }
  0x19   : > { %v246_v35 = vmul.f32 %v139_v7, %v139_v7  ;;  %v191_v37 = vsel %vm169_vm1, %v147_v33, 0.0  ;;  %v247_v38 = vmul.f32 %v140_v10, %v140_v10  ;;  %v275_v39 = vsel %vm169_vm1, %v243_v28, 0.0  ;;  %v151_v60 = vld [vmem:[%s433_s15 + $0x78] sm:$0xff]  ;;  %v152_v2 = vld [vmem:[%s433_s15 + $0x80] sm:$0xff]  ;;  %v153_v8 = vld [vmem:[%s433_s15 + $0x88] sm:$0xff] }
  0x1a   : > { %v176_v14 = vadd.f32 %v175_v9, %v174_v11  ;;  %v276_v40 = vsel %vm169_vm1, %v244_v29, 0.0  ;;  %v278_v41 = vsel %vm169_vm1, %v245_v30, 0.0  ;;  %v193_v45 = vsel %vm169_vm1, %v148_v42, 0.0 }
  0x1b   : > { %v277_v44 = vadd.f32 %v276_v40, %v275_v39  ;;  %v248_v46 = vmul.f32 %v141_v13, %v141_v13  ;;  %v280_v47 = vsel %vm169_vm1, %v246_v35, 0.0  ;;  %v195_v51 = vsel %vm169_vm1, %v149_v48, 0.0 }
  0x1c   : > { %v178_v17 = vadd.f32 %v177_v12, %v176_v14  ;;  %v249_v52 = vmul.f32 %v142_v16, %v142_v16  ;;  %v282_v53 = vsel %vm169_vm1, %v247_v38, 0.0  ;;  %v197_v57 = vsel %vm169_vm1, %v150_v54, 0.0  ;;  %v154_v14 = vld [vmem:[%s433_s15 + $0x90] sm:$0xff] }
  0x1d   : > { %v279_v50 = vadd.f32 %v278_v41, %v277_v44  ;;  %v250_v58 = vmul.f32 %v143_v19, %v143_v19  ;;  %v284_v59 = vsel %vm169_vm1, %v248_v46, 0.0  ;;  %v199_v63 = vsel %vm169_vm1, %v151_v60, 0.0  ;;  %v158_v38 = vld [vmem:[%s433_s15 + $0xb0] sm:$0xff]  ;;  %v159_v44 = vld [vmem:[%s433_s15 + $0xb8] sm:$0xff] }
  0x1e   : > { %v180_v20 = vadd.f32 %v179_v15, %v178_v17  ;;  %v251_v0 = vmul.f32 %v144_v22, %v144_v22  ;;  %v286_v1 = vsel %vm169_vm1, %v249_v52, 0.0  ;;  %v201_v5 = vsel %vm169_vm1, %v152_v2, 0.0 }
  0x1f   : > { %v281_v56 = vadd.f32 %v280_v47, %v279_v50  ;;  %v252_v6 = vmul.f32 %v145_v25, %v145_v25  ;;  %v288_v7 = vsel %vm169_vm1, %v250_v58, 0.0  ;;  %v203_v11 = vsel %vm169_vm1, %v153_v8, 0.0  ;;  %v160_v50 = vld [vmem:[%s433_s15 + $0xc0] sm:$0xff] }
  0x20   : > { %v182_v23 = vadd.f32 %v181_v18, %v180_v20  ;;  %v253_v12 = vmul.f32 %v146_v31, %v146_v31  ;;  %v290_v13 = vsel %vm169_vm1, %v251_v0, 0.0  ;;  %v205_v17 = vsel %vm169_vm1, %v154_v14, 0.0  ;;  %v155_v20 = vld [vmem:[%s433_s15 + $0x98] sm:$0xff] }
  0x21   : > { %v283_v62 = vadd.f32 %v282_v53, %v281_v56  ;;  %v254_v18 = vmul.f32 %v147_v33, %v147_v33  ;;  %v292_v19 = vsel %vm169_vm1, %v252_v6, 0.0  ;;  %v256_v30 = vmul.f32 %v149_v48, %v149_v48  ;;  %v161_v56 = vld [vmem:[%s433_s15 + $0xc8] sm:$0xff] }
  0x22   : > { %v184_v26 = vadd.f32 %v183_v21, %v182_v23  ;;  %v207_v23 = vsel %vm169_vm1, %v155_v20, 0.0  ;;  %v294_v25 = vsel %vm169_vm1, %v253_v12, 0.0  ;;  %v213_v41 = vsel %vm169_vm1, %v158_v38, 0.0 }
  0x23   : > { %v285_v4 = vadd.f32 %v284_v59, %v283_v62  ;;  %v296_v31 = vsel %vm169_vm1, %v254_v18, 0.0  ;;  %v215_v47 = vsel %vm169_vm1, %v159_v44, 0.0  ;;  %v259_v48 = vmul.f32 %v152_v2, %v152_v2  ;;  %v162_v62 = vld [vmem:[%s433_s15 + $0xd0] sm:$0xff] }
  0x24   : > { %v186_v32 = vadd.f32 %v185_v24, %v184_v26  ;;  %v255_v24 = vmul.f32 %v148_v42, %v148_v42  ;;  %v156_v26 = vld [vmem:[%s433_s15 + $0xa0] sm:$0xff]  ;;  %v258_v42 = vmul.f32 %v151_v60, %v151_v60  ;;  %v217_v53 = vsel %vm169_vm1, %v160_v50, 0.0 }
  0x25   : > { %v287_v10 = vadd.f32 %v286_v1, %v285_v4  ;;  %v209_v29 = vsel %vm169_vm1, %v156_v26, 0.0  ;;  %v219_v59 = vsel %vm169_vm1, %v161_v56, 0.0  ;;  %v261_v60 = vmul.f32 %v154_v14, %v154_v14  ;;  %v163_v4 = vld [vmem:[%s433_s15 + $0xd8] sm:$0xff] }
  0x26   : > { %v188_v36 = vadd.f32 %v187_v27, %v186_v32  ;;  %v157_v32 = vld [vmem:[%s433_s15 + $0xa8] sm:$0xff]  ;;  %v221_v1 = vsel %vm169_vm1, %v162_v62, 0.0  ;;  %v262_v2 = vmul.f32 %v155_v20, %v155_v20  ;;  %v265_v20 = vmul.f32 %v158_v38, %v158_v38 }
  0x27   : > { %v289_v16 = vadd.f32 %v288_v7, %v287_v10  ;;  %v211_v35 = vsel %vm169_vm1, %v157_v32, 0.0  ;;  %v223_v7 = vsel %vm169_vm1, %v163_v4, 0.0  ;;  %v164_v10 = vld [vmem:[%s433_s15 + $0xe0] sm:$0xff]  ;;  %v264_v14 = vmul.f32 %v157_v32, %v157_v32 }
  0x28   : > { %v190_v43 = vadd.f32 %v189_v34, %v188_v36  ;;  %v257_v36 = vmul.f32 %v150_v54, %v150_v54  ;;  %v260_v54 = vmul.f32 %v153_v8, %v153_v8  ;;  %v263_v8 = vmul.f32 %v156_v26, %v156_v26 }
  0x29   : > { %v291_v22 = vadd.f32 %v290_v13, %v289_v16  ;;  %v225_v13 = vsel %vm169_vm1, %v164_v10, 0.0  ;;  %v165_v16 = vld [vmem:[%s433_s15 + $0xe8] sm:$0xff]  ;;  %v266_v26 = vmul.f32 %v159_v44, %v159_v44  ;;  %v267_v32 = vmul.f32 %v160_v50, %v160_v50 }
  0x2a   : > { %v192_v49 = vadd.f32 %v191_v37, %v190_v43  ;;  %v298_v37 = vsel %vm169_vm1, %v255_v24, 0.0  ;;  %v300_v43 = vsel %vm169_vm1, %v256_v30, 0.0  ;;  %v270_v44 = vmul.f32 %v163_v4, %v163_v4 }
  0x2b   : > { %v293_v28 = vadd.f32 %v292_v19, %v291_v22  ;;  %v227_v19 = vsel %vm169_vm1, %v165_v16, 0.0  ;;  %v166_v22 = vld [vmem:[%s433_s15 + $0xf0] sm:$0xff] }
  0x2c   : > { %v194_v55 = vadd.f32 %v193_v45, %v192_v49  ;;  %v302_v49 = vsel %vm169_vm1, %v257_v36, 0.0  ;;  %v268_v36 = vmul.f32 %v161_v56, %v161_v56  ;;  %v273_v56 = vmul.f32 %v166_v22, %v166_v22 }
  0x2d   : > { %v295_v34 = vadd.f32 %v294_v25, %v293_v28  ;;  %v229_v25 = vsel %vm169_vm1, %v166_v22, 0.0  ;;  %v167_v28 = vld [vmem:[%s433_s15 + $0xf8] sm:$0xff] }
  0x2e   : > { %v196_v61 = vadd.f32 %v195_v51, %v194_v55  ;;  %v304_v55 = vsel %vm169_vm1, %v258_v42, 0.0 }
  0x2f   : > { %v297_v40 = vadd.f32 %v296_v31, %v295_v34  ;;  %v231_v31 = vsel %vm169_vm1, %v167_v28, 0.0 }
  0x30   : > { %v198_v3 = vadd.f32 %v197_v57, %v196_v61  ;;  %v306_v61 = vsel %vm169_vm1, %v259_v48, 0.0  ;;  %v271_v48 = vmul.f32 %v164_v10, %v164_v10 }
  0x31   : > { %v299_v46 = vadd.f32 %v298_v37, %v297_v40  ;;  %v320_v37 = vsel %vm169_vm1, %v266_v26, 0.0  ;;  %v269_v40 = vmul.f32 %v162_v62, %v162_v62 }
  0x32   : > { %v200_v9 = vadd.f32 %v199_v63, %v198_v3  ;;  %v308_v3 = vsel %vm169_vm1, %v260_v54, 0.0 }
  0x33   : > { %v301_v52 = vadd.f32 %v300_v43, %v299_v46 }
  0x34   : > { %v202_v15 = vadd.f32 %v201_v5, %v200_v9  ;;  %v310_v9 = vsel %vm169_vm1, %v261_v60, 0.0  ;;  %v168_v60 = vld [vmem:[%s555_s1] sm:$0x1] }
  0x35   : > { %v303_v58 = vadd.f32 %v302_v49, %v301_v52  ;;  %v326_v49 = vsel %vm169_vm1, %v269_v40, 0.0  ;;  %v272_v52 = vmul.f32 %v165_v16, %v165_v16 }
  0x36   : > { %v204_v21 = vadd.f32 %v203_v11, %v202_v15  ;;  %v312_v15 = vsel %vm169_vm1, %v262_v2, 0.0 }
  0x37   : > { %v305_v0 = vadd.f32 %v304_v55, %v303_v58  ;;  %v332_v62 = vsel %vm169_vm1, %v272_v52, 0.0 }
  0x38   : > { %v206_v27 = vadd.f32 %v205_v17, %v204_v21  ;;  %v314_v21 = vsel %vm169_vm1, %v263_v8, 0.0 }
  0x39   : > { %v307_v6 = vadd.f32 %v306_v61, %v305_v0  ;;  %v274_v61 = vmul.f32 %v167_v28, %v167_v28 }
  0x3a   : > { %v208_v33 = vadd.f32 %v207_v23, %v206_v27  ;;  %v316_v27 = vsel %vm169_vm1, %v264_v14, 0.0 }
  0x3b   : > { %v309_v12 = vadd.f32 %v308_v3, %v307_v6  ;;  %v336_v4 = vsel %vm169_vm1, %v274_v61, 0.0 }
  0x3c   : > { %v210_v39 = vadd.f32 %v209_v29, %v208_v33  ;;  %v318_v33 = vsel %vm169_vm1, %v265_v20, 0.0 }
  0x3d   : > { %v311_v18 = vadd.f32 %v310_v9, %v309_v12  ;;  %v242_v12 = vld [vmem:[%s556_s2] sm:$0x1] }
  0x3e   : > { %v212_v45 = vadd.f32 %v211_v35, %v210_v39 }
  0x3f   : > { %v313_v24 = vadd.f32 %v312_v15, %v311_v18 }
  0x40   : > { %v214_v51 = vadd.f32 %v213_v41, %v212_v45  ;;  %v322_v41 = vsel %vm169_vm1, %v267_v32, 0.0  ;;  %v324_v45 = vsel %vm169_vm1, %v268_v36, 0.0 }
  0x41   : > { %v315_v30 = vadd.f32 %v314_v21, %v313_v24 }
  0x42   : > { %v216_v57 = vadd.f32 %v215_v47, %v214_v51 }
  0x43   : > { %v317_v35 = vadd.f32 %v316_v27, %v315_v30 }
  0x44   : > { %v218_v63 = vadd.f32 %v217_v53, %v216_v57  ;;  %v328_v53 = vsel %vm169_vm1, %v270_v44, 0.0  ;;  %v330_v57 = vsel %vm169_vm1, %v271_v48, 0.0 }
  0x45   : > { %v319_v39 = vadd.f32 %v318_v33, %v317_v35 }
  0x46   : > { %v220_v5 = vadd.f32 %v219_v59, %v218_v63 }
  0x47   : > { %v321_v43 = vadd.f32 %v320_v37, %v319_v39 }
  0x48   : > { %v222_v11 = vadd.f32 %v221_v1, %v220_v5  ;;  %v334_v1 = vsel %vm169_vm1, %v273_v56, 0.0 }
  0x49   : > { %v323_v47 = vadd.f32 %v322_v41, %v321_v43 }
  0x4a   : > { %v224_v17 = vadd.f32 %v223_v7, %v222_v11 }
  0x4b   : > { %v325_v51 = vadd.f32 %v324_v45, %v323_v47 }
  0x4c   : > { %v226_v23 = vadd.f32 %v225_v13, %v224_v17 }
  0x4d   : > { %v327_v55 = vadd.f32 %v326_v49, %v325_v51 }
  0x4e   : > { %v228_v29 = vadd.f32 %v227_v19, %v226_v23 }
  0x4f   : > { %v329_v59 = vadd.f32 %v328_v53, %v327_v55 }
  0x50   : > { %v230_v34 = vadd.f32 %v229_v25, %v228_v29 }
  0x51   : > { %v331_v0 = vadd.f32 %v330_v57, %v329_v59 }
  0x52   : > { %v232_v38 = vadd.f32 %v231_v31, %v230_v34 }
  0x53   : > { %v333_v3 = vadd.f32 %v332_v62, %v331_v0 }
  0x54   : > { %v233_v42 = vrot.slane %v232_v38, 4 }
  0x55   : > { %v335_v5 = vadd.f32 %v334_v1, %v333_v3 }
  0x56   : > { %v234_v46 = vadd.f32 %v233_v42, %v232_v38 }
  0x57   : > { %v337_v6 = vadd.f32 %v336_v4, %v335_v5 }
  0x58   : > { %v235_v50 = vrot.slane %v234_v46, 2 }
  0x59   : > { %v338_v7 = vrot.slane %v337_v6, 4 }
  0x5a   : > { %v236_v54 = vadd.f32 %v235_v50, %v234_v46 }
  0x5b   : > { %v339_v8 = vadd.f32 %v338_v7, %v337_v6 }
  0x5c   : > { %v237_v58 = vrot.slane %v236_v54, 1 }
  0x5d   : > { %v340_v9 = vrot.slane %v339_v8, 2 }
  0x5e   : > { %v238_v63 = vadd.f32 %v237_v58, %v236_v54 }
  0x5f   : > { %v341_v10 = vadd.f32 %v340_v9, %v339_v8 }
  0x60   : > { %v239_v2 = vadd.f32 %v238_v63, %v168_v60 }
  0x61   : > { %v342_v11 = vrot.slane %v341_v10, 1 }
  0x62   : > { %241 = vst.msk [vmem:[%s555_s1] sm:$0x1] %vm240_vm2, %v239_v2 }
  0x63   : > { %v343_v13 = vadd.f32 %v342_v11, %v341_v10 }
  0x65   : > { %v344_v14 = vadd.f32 %v343_v13, %v242_v12 }
  0x67   : > { %345 = vst.msk [vmem:[%s556_s2] sm:$0x1] %vm240_vm2, %v344_v14 }
  0x68 PF: > { %s13_s9 = sadd.s32 1, %s404_s9  }
  0x69   : > { %p10_p5 = scmp.ge.s32.totalorder %s13_s9, 4  }
  0x6b   :  { %12 = sbr.rel (!%p10_p5) target bundleno = 1 (0x1), region = 62 }

// kernel: dense_block_apply.6
= control target key start
LH: loop header
LB: loop body
LE: loop exit
PB: predicated region body
PF: predicated region fallthrough
CT: control target
= control target key end

     0   :  { %s422_s9 = smov 0   ;;  %s554_s0 = inlined_call_operand.vmem [shape: f32[512,12], index: 0, kind: input, shape index: {}]   ;;  %s555_s1 = inlined_call_operand.vmem [shape: f32[1,12], index: 1, kind: output, shape index: {0}]   ;;  %s556_s2 = inlined_call_operand.vmem [shape: f32[1,12], index: 2, kind: output, shape index: {1}]  }
   0x1 LB: > { %s380_s10 = sadd.s32 4294967295, %s404_s9   ;;  %p383_p0 = scmp.ge.s32.totalorder %s404_s9, 1  ;;  %s404_s9 = sphi %s422_s9, %s13_s9  }
   0x2   : > { %p106_p1 = scmp.lt.s32.totalorder %s404_s9, 3 }
   0x4   : > { %p107_p2 = pnand %p383_p0, %p106_p1 }
   0x5   : > { %s384_s11 = sshll.u32 (!%p107_p2), %s380_s10, 5  ;;  %p386_p4 = scmp.ne.s32.totalorder (!%p107_p2), %s380_s10, 0 }
   0x6   : > { %110 = sbr.rel (%p107_p2) target bundleno = 104 (0x68), region = 24  ;;  %p124_p3 = scmp.lt.s32.totalorder (!%p107_p2), %s384_s11, 63 }
   0xd   : > { %s558_s11 = smov (!%p124_p3, %s384_s11), 63  ;;  %132 = sbr.rel (%p386_p4) target bundleno = 20 (0x14), region = 28 }
   0xe   : > { %s385_s12 = sshll.u32 %s558_s11, 3  ;;  %vm133_vm0 = vcmask (!%p386_p4), 90112   ;;  %v406_v0 = vmov (!%p386_p4), 0.0  }
   0xf   : > { %s433_s15 = scalar_lea.vmem %s554_s0, %s385_s12  ;;  %134 = vst.msk [vmem:[%s555_s1] sm:$0x1] (!%p386_p4), %vm133_vm0, %v406_v0  ;;  %135 = vst.msk [vmem:[%s556_s2] sm:$0x1] (!%p386_p4), %vm133_vm0, %v406_v0 }
  0x14 PF: > { %v136_v1 = vld [vmem:[%s433_s15] sm:$0xff]  ;;  %v137_v2 = vld [vmem:[%s433_s15 + $0x8] sm:$0xff]  ;;  %v138_v3 = vld [vmem:[%s433_s15 + $0x10] sm:$0xff]  ;;  %vm169_vm1 = vcmask 97280   ;;  %vm240_vm2 = vcmask 90112  }
  0x15   : > { %v170_v4 = vsel %vm169_vm1, %v136_v1, 0.0  ;;  %v171_v5 = vsel %vm169_vm1, %v137_v2, 0.0  ;;  %v173_v6 = vsel %vm169_vm1, %v138_v3, 0.0  ;;  %v139_v7 = vld [vmem:[%s433_s15 + $0x18] sm:$0xff]  ;;  %v140_v10 = vld [vmem:[%s433_s15 + $0x20] sm:$0xff]  ;;  %v141_v13 = vld [vmem:[%s433_s15 + $0x28] sm:$0xff]  ;;  %v243_v28 = vmul.f32 %v136_v1, %v136_v1 }
  0x16   : > { %v172_v8 = vadd.f32 %v171_v5, %v170_v4  ;;  %v175_v9 = vsel %vm169_vm1, %v139_v7, 0.0  ;;  %v177_v12 = vsel %vm169_vm1, %v140_v10, 0.0  ;;  %v179_v15 = vsel %vm169_vm1, %v141_v13, 0.0  ;;  %v142_v16 = vld [vmem:[%s433_s15 + $0x30] sm:$0xff]  ;;  %v143_v19 = vld [vmem:[%s433_s15 + $0x38] sm:$0xff]  ;;  %v144_v22 = vld [vmem:[%s433_s15 + $0x40] sm:$0xff] }
  0x17   : > { %v181_v18 = vsel %vm169_vm1, %v142_v16, 0.0  ;;  %v183_v21 = vsel %vm169_vm1, %v143_v19, 0.0  ;;  %v185_v24 = vsel %vm169_vm1, %v144_v22, 0.0  ;;  %v145_v25 = vld [vmem:[%s433_s15 + $0x48] sm:$0xff]  ;;  %v244_v29 = vmul.f32 %v137_v2, %v137_v2  ;;  %v146_v31 = vld [vmem:[%s433_s15 + $0x50] sm:$0xff]  ;;  %v147_v33 = vld [vmem:[%s433_s15 + $0x58] sm:$0xff] }
  0x18   : > { %v174_v11 = vadd.f32 %v173_v6, %v172_v8  ;;  %v187_v27 = vsel %vm169_vm1, %v145_v25, 0.0  ;;  %v245_v30 = vmul.f32 %v138_v3, %v138_v3  ;;  %v189_v34 = vsel %vm169_vm1, %v146_v31, 0.0  ;;  %v148_v42 = vld [vmem:[%s433_s15 + $0x60] sm:$0xff]  ;;  %v149_v48 = vld [vmem:[%s433_s15 + $0x68] sm:$0xff]  ;;  %v150_v54 = vld [vmem:[%s433_s15 + $0x70] sm:$0xff] }
  0x19   : > { %v246_v35 = vmul.f32 %v139_v7, %v139_v7  ;;  %v191_v37 = vsel %vm169_vm1, %v147_v33, 0.0  ;;  %v247_v38 = vmul.f32 %v140_v10, %v140_v10  ;;  %v275_v39 = vsel %vm169_vm1, %v243_v28, 0.0  ;;  %v151_v60 = vld [vmem:[%s433_s15 + $0x78] sm:$0xff]  ;;  %v152_v2 = vld [vmem:[%s433_s15 + $0x80] sm:$0xff]  ;;  %v153_v8 = vld [vmem:[%s433_s15 + $0x88] sm:$0xff] }
  0x1a   : > { %v176_v14 = vadd.f32 %v175_v9, %v174_v11  ;;  %v276_v40 = vsel %vm169_vm1, %v244_v29, 0.0  ;;  %v278_v41 = vsel %vm169_vm1, %v245_v30, 0.0  ;;  %v193_v45 = vsel %vm169_vm1, %v148_v42, 0.0 }
  0x1b   : > { %v277_v44 = vadd.f32 %v276_v40, %v275_v39  ;;  %v248_v46 = vmul.f32 %v141_v13, %v141_v13  ;;  %v280_v47 = vsel %vm169_vm1, %v246_v35, 0.0  ;;  %v195_v51 = vsel %vm169_vm1, %v149_v48, 0.0 }
  0x1c   : > { %v178_v17 = vadd.f32 %v177_v12, %v176_v14  ;;  %v249_v52 = vmul.f32 %v142_v16, %v142_v16  ;;  %v282_v53 = vsel %vm169_vm1, %v247_v38, 0.0  ;;  %v197_v57 = vsel %vm169_vm1, %v150_v54, 0.0  ;;  %v154_v14 = vld [vmem:[%s433_s15 + $0x90] sm:$0xff] }
  0x1d   : > { %v279_v50 = vadd.f32 %v278_v41, %v277_v44  ;;  %v250_v58 = vmul.f32 %v143_v19, %v143_v19  ;;  %v284_v59 = vsel %vm169_vm1, %v248_v46, 0.0  ;;  %v199_v63 = vsel %vm169_vm1, %v151_v60, 0.0  ;;  %v158_v38 = vld [vmem:[%s433_s15 + $0xb0] sm:$0xff]  ;;  %v159_v44 = vld [vmem:[%s433_s15 + $0xb8] sm:$0xff] }
  0x1e   : > { %v180_v20 = vadd.f32 %v179_v15, %v178_v17  ;;  %v251_v0 = vmul.f32 %v144_v22, %v144_v22  ;;  %v286_v1 = vsel %vm169_vm1, %v249_v52, 0.0  ;;  %v201_v5 = vsel %vm169_vm1, %v152_v2, 0.0 }
  0x1f   : > { %v281_v56 = vadd.f32 %v280_v47, %v279_v50  ;;  %v252_v6 = vmul.f32 %v145_v25, %v145_v25  ;;  %v288_v7 = vsel %vm169_vm1, %v250_v58, 0.0  ;;  %v203_v11 = vsel %vm169_vm1, %v153_v8, 0.0  ;;  %v160_v50 = vld [vmem:[%s433_s15 + $0xc0] sm:$0xff] }
  0x20   : > { %v182_v23 = vadd.f32 %v181_v18, %v180_v20  ;;  %v253_v12 = vmul.f32 %v146_v31, %v146_v31  ;;  %v290_v13 = vsel %vm169_vm1, %v251_v0, 0.0  ;;  %v205_v17 = vsel %vm169_vm1, %v154_v14, 0.0  ;;  %v155_v20 = vld [vmem:[%s433_s15 + $0x98] sm:$0xff] }
  0x21   : > { %v283_v62 = vadd.f32 %v282_v53, %v281_v56  ;;  %v254_v18 = vmul.f32 %v147_v33, %v147_v33  ;;  %v292_v19 = vsel %vm169_vm1, %v252_v6, 0.0  ;;  %v256_v30 = vmul.f32 %v149_v48, %v149_v48  ;;  %v161_v56 = vld [vmem:[%s433_s15 + $0xc8] sm:$0xff] }
  0x22   : > { %v184_v26 = vadd.f32 %v183_v21, %v182_v23  ;;  %v207_v23 = vsel %vm169_vm1, %v155_v20, 0.0  ;;  %v294_v25 = vsel %vm169_vm1, %v253_v12, 0.0  ;;  %v213_v41 = vsel %vm169_vm1, %v158_v38, 0.0 }
  0x23   : > { %v285_v4 = vadd.f32 %v284_v59, %v283_v62  ;;  %v296_v31 = vsel %vm169_vm1, %v254_v18, 0.0  ;;  %v215_v47 = vsel %vm169_vm1, %v159_v44, 0.0  ;;  %v259_v48 = vmul.f32 %v152_v2, %v152_v2  ;;  %v162_v62 = vld [vmem:[%s433_s15 + $0xd0] sm:$0xff] }
  0x24   : > { %v186_v32 = vadd.f32 %v185_v24, %v184_v26  ;;  %v255_v24 = vmul.f32 %v148_v42, %v148_v42  ;;  %v156_v26 = vld [vmem:[%s433_s15 + $0xa0] sm:$0xff]  ;;  %v258_v42 = vmul.f32 %v151_v60, %v151_v60  ;;  %v217_v53 = vsel %vm169_vm1, %v160_v50, 0.0 }
  0x25   : > { %v287_v10 = vadd.f32 %v286_v1, %v285_v4  ;;  %v209_v29 = vsel %vm169_vm1, %v156_v26, 0.0  ;;  %v219_v59 = vsel %vm169_vm1, %v161_v56, 0.0  ;;  %v261_v60 = vmul.f32 %v154_v14, %v154_v14  ;;  %v163_v4 = vld [vmem:[%s433_s15 + $0xd8] sm:$0xff] }
  0x26   : > { %v188_v36 = vadd.f32 %v187_v27, %v186_v32  ;;  %v157_v32 = vld [vmem:[%s433_s15 + $0xa8] sm:$0xff]  ;;  %v221_v1 = vsel %vm169_vm1, %v162_v62, 0.0  ;;  %v262_v2 = vmul.f32 %v155_v20, %v155_v20  ;;  %v265_v20 = vmul.f32 %v158_v38, %v158_v38 }
  0x27   : > { %v289_v16 = vadd.f32 %v288_v7, %v287_v10  ;;  %v211_v35 = vsel %vm169_vm1, %v157_v32, 0.0  ;;  %v223_v7 = vsel %vm169_vm1, %v163_v4, 0.0  ;;  %v164_v10 = vld [vmem:[%s433_s15 + $0xe0] sm:$0xff]  ;;  %v264_v14 = vmul.f32 %v157_v32, %v157_v32 }
  0x28   : > { %v190_v43 = vadd.f32 %v189_v34, %v188_v36  ;;  %v257_v36 = vmul.f32 %v150_v54, %v150_v54  ;;  %v260_v54 = vmul.f32 %v153_v8, %v153_v8  ;;  %v263_v8 = vmul.f32 %v156_v26, %v156_v26 }
  0x29   : > { %v291_v22 = vadd.f32 %v290_v13, %v289_v16  ;;  %v225_v13 = vsel %vm169_vm1, %v164_v10, 0.0  ;;  %v165_v16 = vld [vmem:[%s433_s15 + $0xe8] sm:$0xff]  ;;  %v266_v26 = vmul.f32 %v159_v44, %v159_v44  ;;  %v267_v32 = vmul.f32 %v160_v50, %v160_v50 }
  0x2a   : > { %v192_v49 = vadd.f32 %v191_v37, %v190_v43  ;;  %v298_v37 = vsel %vm169_vm1, %v255_v24, 0.0  ;;  %v300_v43 = vsel %vm169_vm1, %v256_v30, 0.0  ;;  %v270_v44 = vmul.f32 %v163_v4, %v163_v4 }
  0x2b   : > { %v293_v28 = vadd.f32 %v292_v19, %v291_v22  ;;  %v227_v19 = vsel %vm169_vm1, %v165_v16, 0.0  ;;  %v166_v22 = vld [vmem:[%s433_s15 + $0xf0] sm:$0xff] }
  0x2c   : > { %v194_v55 = vadd.f32 %v193_v45, %v192_v49  ;;  %v302_v49 = vsel %vm169_vm1, %v257_v36, 0.0  ;;  %v268_v36 = vmul.f32 %v161_v56, %v161_v56  ;;  %v273_v56 = vmul.f32 %v166_v22, %v166_v22 }
  0x2d   : > { %v295_v34 = vadd.f32 %v294_v25, %v293_v28  ;;  %v229_v25 = vsel %vm169_vm1, %v166_v22, 0.0  ;;  %v167_v28 = vld [vmem:[%s433_s15 + $0xf8] sm:$0xff] }
  0x2e   : > { %v196_v61 = vadd.f32 %v195_v51, %v194_v55  ;;  %v304_v55 = vsel %vm169_vm1, %v258_v42, 0.0 }
  0x2f   : > { %v297_v40 = vadd.f32 %v296_v31, %v295_v34  ;;  %v231_v31 = vsel %vm169_vm1, %v167_v28, 0.0 }
  0x30   : > { %v198_v3 = vadd.f32 %v197_v57, %v196_v61  ;;  %v306_v61 = vsel %vm169_vm1, %v259_v48, 0.0  ;;  %v271_v48 = vmul.f32 %v164_v10, %v164_v10 }
  0x31   : > { %v299_v46 = vadd.f32 %v298_v37, %v297_v40  ;;  %v320_v37 = vsel %vm169_vm1, %v266_v26, 0.0  ;;  %v269_v40 = vmul.f32 %v162_v62, %v162_v62 }
  0x32   : > { %v200_v9 = vadd.f32 %v199_v63, %v198_v3  ;;  %v308_v3 = vsel %vm169_vm1, %v260_v54, 0.0 }
  0x33   : > { %v301_v52 = vadd.f32 %v300_v43, %v299_v46 }
  0x34   : > { %v202_v15 = vadd.f32 %v201_v5, %v200_v9  ;;  %v310_v9 = vsel %vm169_vm1, %v261_v60, 0.0  ;;  %v168_v60 = vld [vmem:[%s555_s1] sm:$0x1] }
  0x35   : > { %v303_v58 = vadd.f32 %v302_v49, %v301_v52  ;;  %v326_v49 = vsel %vm169_vm1, %v269_v40, 0.0  ;;  %v272_v52 = vmul.f32 %v165_v16, %v165_v16 }
  0x36   : > { %v204_v21 = vadd.f32 %v203_v11, %v202_v15  ;;  %v312_v15 = vsel %vm169_vm1, %v262_v2, 0.0 }
  0x37   : > { %v305_v0 = vadd.f32 %v304_v55, %v303_v58  ;;  %v332_v62 = vsel %vm169_vm1, %v272_v52, 0.0 }
  0x38   : > { %v206_v27 = vadd.f32 %v205_v17, %v204_v21  ;;  %v314_v21 = vsel %vm169_vm1, %v263_v8, 0.0 }
  0x39   : > { %v307_v6 = vadd.f32 %v306_v61, %v305_v0  ;;  %v274_v61 = vmul.f32 %v167_v28, %v167_v28 }
  0x3a   : > { %v208_v33 = vadd.f32 %v207_v23, %v206_v27  ;;  %v316_v27 = vsel %vm169_vm1, %v264_v14, 0.0 }
  0x3b   : > { %v309_v12 = vadd.f32 %v308_v3, %v307_v6  ;;  %v336_v4 = vsel %vm169_vm1, %v274_v61, 0.0 }
  0x3c   : > { %v210_v39 = vadd.f32 %v209_v29, %v208_v33  ;;  %v318_v33 = vsel %vm169_vm1, %v265_v20, 0.0 }
  0x3d   : > { %v311_v18 = vadd.f32 %v310_v9, %v309_v12  ;;  %v242_v12 = vld [vmem:[%s556_s2] sm:$0x1] }
  0x3e   : > { %v212_v45 = vadd.f32 %v211_v35, %v210_v39 }
  0x3f   : > { %v313_v24 = vadd.f32 %v312_v15, %v311_v18 }
  0x40   : > { %v214_v51 = vadd.f32 %v213_v41, %v212_v45  ;;  %v322_v41 = vsel %vm169_vm1, %v267_v32, 0.0  ;;  %v324_v45 = vsel %vm169_vm1, %v268_v36, 0.0 }
  0x41   : > { %v315_v30 = vadd.f32 %v314_v21, %v313_v24 }
  0x42   : > { %v216_v57 = vadd.f32 %v215_v47, %v214_v51 }
  0x43   : > { %v317_v35 = vadd.f32 %v316_v27, %v315_v30 }
  0x44   : > { %v218_v63 = vadd.f32 %v217_v53, %v216_v57  ;;  %v328_v53 = vsel %vm169_vm1, %v270_v44, 0.0  ;;  %v330_v57 = vsel %vm169_vm1, %v271_v48, 0.0 }
  0x45   : > { %v319_v39 = vadd.f32 %v318_v33, %v317_v35 }
  0x46   : > { %v220_v5 = vadd.f32 %v219_v59, %v218_v63 }
  0x47   : > { %v321_v43 = vadd.f32 %v320_v37, %v319_v39 }
  0x48   : > { %v222_v11 = vadd.f32 %v221_v1, %v220_v5  ;;  %v334_v1 = vsel %vm169_vm1, %v273_v56, 0.0 }
  0x49   : > { %v323_v47 = vadd.f32 %v322_v41, %v321_v43 }
  0x4a   : > { %v224_v17 = vadd.f32 %v223_v7, %v222_v11 }
  0x4b   : > { %v325_v51 = vadd.f32 %v324_v45, %v323_v47 }
  0x4c   : > { %v226_v23 = vadd.f32 %v225_v13, %v224_v17 }
  0x4d   : > { %v327_v55 = vadd.f32 %v326_v49, %v325_v51 }
  0x4e   : > { %v228_v29 = vadd.f32 %v227_v19, %v226_v23 }
  0x4f   : > { %v329_v59 = vadd.f32 %v328_v53, %v327_v55 }
  0x50   : > { %v230_v34 = vadd.f32 %v229_v25, %v228_v29 }
  0x51   : > { %v331_v0 = vadd.f32 %v330_v57, %v329_v59 }
  0x52   : > { %v232_v38 = vadd.f32 %v231_v31, %v230_v34 }
  0x53   : > { %v333_v3 = vadd.f32 %v332_v62, %v331_v0 }
  0x54   : > { %v233_v42 = vrot.slane %v232_v38, 4 }
  0x55   : > { %v335_v5 = vadd.f32 %v334_v1, %v333_v3 }
  0x56   : > { %v234_v46 = vadd.f32 %v233_v42, %v232_v38 }
  0x57   : > { %v337_v6 = vadd.f32 %v336_v4, %v335_v5 }
  0x58   : > { %v235_v50 = vrot.slane %v234_v46, 2 }
  0x59   : > { %v338_v7 = vrot.slane %v337_v6, 4 }
  0x5a   : > { %v236_v54 = vadd.f32 %v235_v50, %v234_v46 }
  0x5b   : > { %v339_v8 = vadd.f32 %v338_v7, %v337_v6 }
  0x5c   : > { %v237_v58 = vrot.slane %v236_v54, 1 }
  0x5d   : > { %v340_v9 = vrot.slane %v339_v8, 2 }
  0x5e   : > { %v238_v63 = vadd.f32 %v237_v58, %v236_v54 }
  0x5f   : > { %v341_v10 = vadd.f32 %v340_v9, %v339_v8 }
  0x60   : > { %v239_v2 = vadd.f32 %v238_v63, %v168_v60 }
  0x61   : > { %v342_v11 = vrot.slane %v341_v10, 1 }
  0x62   : > { %241 = vst.msk [vmem:[%s555_s1] sm:$0x1] %vm240_vm2, %v239_v2 }
  0x63   : > { %v343_v13 = vadd.f32 %v342_v11, %v341_v10 }
  0x65   : > { %v344_v14 = vadd.f32 %v343_v13, %v242_v12 }
  0x67   : > { %345 = vst.msk [vmem:[%s556_s2] sm:$0x1] %vm240_vm2, %v344_v14 }
  0x68 PF: > { %s13_s9 = sadd.s32 1, %s404_s9  }
  0x69   : > { %p10_p5 = scmp.ge.s32.totalorder %s13_s9, 4  }
  0x6b   :  { %12 = sbr.rel (!%p10_p5) target bundleno = 1 (0x1), region = 62 }

// kernel: dense_block_apply.5
= control target key start
LH: loop header
LB: loop body
LE: loop exit
PB: predicated region body
PF: predicated region fallthrough
CT: control target
= control target key end

     0   :  { %s4182_s21 = smov 0   ;;  %s5587_s0 = inlined_call_operand.vmem [shape: f32[2,18,18,4], index: 0, kind: input, shape index: {}]   ;;  %s5588_s1 = inlined_call_operand.vmem [shape: f32[1,4], index: 1, kind: input, shape index: {}]   ;;  %s5589_s2 = inlined_call_operand.vmem [shape: f32[1,4], index: 2, kind: input, shape index: {}]   ;;  %s5590_s3 = inlined_call_operand.vmem [shape: f32[18,18,1], index: 3, kind: input, shape index: {}]   ;;  %s5591_s4 = inlined_call_operand.vmem [shape: bf16[9,4,8], index: 4, kind: input, shape index: {}]   ;;  %s5592_s5 = inlined_call_operand.vmem [shape: f32[1,8], index: 5, kind: input, shape index: {}]   ;;  %s5593_s6 = inlined_call_operand.vmem [shape: f32[2,16,16,8], index: 6, kind: output, shape index: {}]  }
   0x1 LB: > { %s3231_s22 = sadd.s32 4294967295, %s4144_s21   ;;  %p3235_p0 = scmp.ge.s32.totalorder %s4144_s21, 1  ;;  %s4144_s21 = sphi %s4182_s21, %s16_s21  }
   0x2   : > { %p212_p1 = scmp.lt.s32.totalorder %s4144_s21, 3 }
   0x4   : > { %p213_p2 = pnand %p3235_p0, %p212_p1 }
   0x6   : > { %216 = sbr.rel (%p213_p2) target bundleno = 687 (0x2af), region = 44 }
   0xd   : > { %v485_v0 = vld [vmem:[%s5590_s3 + $0x10] sm:$0x3]  ;;  %v483_v1 = vld [vmem:[%s5590_s3] sm:$0xff]  ;;  %v4146_v2 = vmov 0   ;;  %v486_v3 = vld [vmem:[%s5590_s3 + $0x18] sm:$0xff]  ;;  %vm1106_vm0 = vcmask 1041408  }
   0xe   : > { %4135 = vset.pattern.permute.xlu1 %v4146_v2  ;;  %4134 = vset.pattern.permute.xlu0 %v4146_v2  ;;  %v484_v4 = vld [vmem:[%s5590_s3 + $0x8] sm:$0xff]  ;;  %v487_v6 = vld [vmem:[%s5590_s3 + $0x20] sm:$0xff]  ;;  %v490_v7 = vld [vmem:[%s5590_s3 + $0x38] sm:$0xff]  ;;  %p242_p3 = scmp.lt.s32.totalorder %s3231_s22, 1  ;;  %vm926_vm1 = vcmask 1046528   ;;  %vm1483_vm2 = vcmask 1045504  }
   0xf   : > { %549 = vperm.xlu1 %4135, %v485_v0   ;;  %539 = vperm.xlu0 %4134, %v483_v1   ;;  %v488_v5 = vld [vmem:[%s5590_s3 + $0x28] sm:$0x3]  ;;  %v489_v8 = vld [vmem:[%s5590_s3 + $0x30] sm:$0xff]  ;;  %v491_v10 = vld [vmem:[%s5590_s3 + $0x40] sm:$0x3]  ;;  %vm1057_vm3 = vcmask 31744  }
  0x10   : > { %v492_v9 = vld [vmem:[%s5590_s3 + $0x48] sm:$0xff]  ;;  %v494_v11 = vld [vmem:[%s5590_s3 + $0x58] sm:$0x3]  ;;  %v493_v12 = vld [vmem:[%s5590_s3 + $0x50] sm:$0xff]  ;;  %s5684_s22 = smov (!%p242_p3, %s3231_s22), 1  ;;  %vm3143_vm4 = vcmask 64512  }
  0x11   : > { %v3241_v13 = vld [vmem:[%s5591_s4 + $0x2] sm:$0x3]  ;;  %v3308_v15 = vld [vmem:[%s5591_s4 + $0x8] sm:$0x3]  ;;  %v498_v19 = vld [vmem:[%s5590_s3 + $0x78] sm:$0xff]  ;;  %s4124_s29 = smul.u32 432, %s5684_s22 }
  0x12   : > { %4114 = vmatprep.subr.msk.bf16.mxu1 %vm1106_vm0, %v3241_v13  ;;  %v1108_v14 = vsel %vm1106_vm0, %v3241_v13, 0  ;;  %v496_v16 = vld [vmem:[%s5590_s3 + $0x68] sm:$0xff]  ;;  %v495_v17 = vld [vmem:[%s5590_s3 + $0x60] sm:$0xff]  ;;  %4118 = vmatprep.subr.msk.bf16.mxu0 %vm1106_vm0, %v3308_v15  ;;  %v4242_v18 = vsel %vm1106_vm0, %v3308_v15, 0  ;;  %v497_v20 = vld [vmem:[%s5590_s3 + $0x70] sm:$0x3] }
  0x13   : > { %554 = vperm.xlu1 %4135, %v486_v3   ;;  %544 = vperm.xlu0 %4134, %v484_v4   ;;  %5619 = vst [vmem:[#allocation2_spill] sm:$0xff] %v4242_v18  ;;  %v500_v21 = vld [vmem:[%s5590_s3 + $0x88] sm:$0x3]  ;;  %v499_v22 = vld [vmem:[%s5590_s3 + $0x80] sm:$0xff]  ;;  %v502_v23 = vld [vmem:[%s5590_s3 + $0x98] sm:$0xff]  ;;  %s4389_s8 = scalar_lea.vmem %s5587_s0, %s4124_s29  ;;  %s3396_s29 = sshll.u32 %s5684_s22, 8 }
  0x14   : > { %3551 = vmatpush3.bf16.msra.mxu1 %v1108_v14  ;;  %3687 = vmatpush3.bf16.msra.mxu0 %v4242_v18  ;;  %v501_v24 = vld [vmem:[%s5590_s3 + $0x90] sm:$0xff]  ;;  %v504_v25 = vld [vmem:[%s5590_s3 + $0xa8] sm:$0xff]  ;;  %v503_v26 = vld [vmem:[%s5590_s3 + $0xa0] sm:$0x3]  ;;  %s5486_s10 = scalar_lea.vmem %s5593_s6, %s3396_s29 }
  0x15   : > { %v506_v27 = vld [vmem:[%s5590_s3 + $0xb8] sm:$0x3]  ;;  %v505_v28 = vld [vmem:[%s5590_s3 + $0xb0] sm:$0xff]  ;;  %v4278_v29 = vld [vmem:[%s5591_s4] sm:$0x3] }
  0x16   : > { %v4283_v30 = vld [vmem:[%s5591_s4 + $0xa] sm:$0x3]  ;;  %v507_v32 = vld [vmem:[%s5590_s3 + $0xc0] sm:$0xff]  ;;  %4115 = vmatprep.subr.msk.bf16.mxu1 %vm1106_vm0, %v4278_v29  ;;  %v510_v33 = vld [vmem:[%s5590_s3 + $0xd8] sm:$0xff] }
  0x17   : > { %564 = vperm.xlu1 %4135, %v488_v5   ;;  %559 = vperm.xlu0 %4134, %v487_v6   ;;  %v508_v31 = vld [vmem:[%s5590_s3 + $0xc8] sm:$0xff]  ;;  %v509_v34 = vld [vmem:[%s5590_s3 + $0xd0] sm:$0x3]  ;;  %v511_v36 = vld [vmem:[%s5590_s3 + $0xe0] sm:$0xff] }
  0x18   : > { %4120 = vmatprep.subr.msk.bf16.mxu0 %vm1106_vm0, %v4283_v30  ;;  %v512_v35 = vld [vmem:[%s5590_s3 + $0xe8] sm:$0x3]  ;;  %v514_v37 = vld [vmem:[%s5590_s3 + $0xf8] sm:$0xff]  ;;  %v513_v38 = vld [vmem:[%s5590_s3 + $0xf0] sm:$0xff] }
  0x19   : > { %v516_v39 = vld [vmem:[%s5590_s3 + $0x108] sm:$0xff]  ;;  %v515_v40 = vld [vmem:[%s5590_s3 + $0x100] sm:$0x3]  ;;  %v518_v41 = vld [vmem:[%s5590_s3 + $0x118] sm:$0x3] }
  0x1a   : > { %v517_v42 = vld [vmem:[%s5590_s3 + $0x110] sm:$0xff]  ;;  %v520_v43 = vld [vmem:[%s5590_s3 + $0x128] sm:$0xff]  ;;  %v519_v44 = vld [vmem:[%s5590_s3 + $0x120] sm:$0xff] }
  0x1b   : > { %574 = vperm.xlu1 %4135, %v490_v7   ;;  %569 = vperm.xlu0 %4134, %v489_v8   ;;  %v522_v45 = vld [vmem:[%s5590_s3 + $0x138] sm:$0xff]  ;;  %v521_v46 = vld [vmem:[%s5590_s3 + $0x130] sm:$0x3]  ;;  %v524_v47 = vld [vmem:[%s5590_s3 + $0x148] sm:$0x3] }
  0x1c   : > { %v523_v48 = vld [vmem:[%s5590_s3 + $0x140] sm:$0xff]  ;;  %v526_v49 = vld [vmem:[%s5590_s3 + $0x158] sm:$0xff]  ;;  %v525_v50 = vld [vmem:[%s5590_s3 + $0x150] sm:$0xff] }
  0x1d   : > { %v528_v51 = vld [vmem:[%s5590_s3 + $0x168] sm:$0xff]  ;;  %v527_v52 = vld [vmem:[%s5590_s3 + $0x160] sm:$0x3]  ;;  %v530_v53 = vld [vmem:[%s5590_s3 + $0x178] sm:$0x3] }
  0x1e   : > { %v529_v54 = vld [vmem:[%s5590_s3 + $0x170] sm:$0xff]  ;;  %v532_v55 = vld [vmem:[%s5590_s3 + $0x188] sm:$0xff]  ;;  %v531_v56 = vld [vmem:[%s5590_s3 + $0x180] sm:$0xff] }
  0x1f   : > { %584 = vperm.xlu1 %4135, %v492_v9   ;;  %579 = vperm.xlu0 %4134, %v491_v10   ;;  %v534_v57 = vld [vmem:[%s5590_s3 + $0x198] sm:$0xff]  ;;  %v533_v58 = vld [vmem:[%s5590_s3 + $0x190] sm:$0x3]  ;;  %v536_v59 = vld [vmem:[%s5590_s3 + $0x1a8] sm:$0x3] }
  0x20   : > { %v535_v60 = vld [vmem:[%s5590_s3 + $0x1a0] sm:$0xff]  ;;  %v255_v61 = vld [vmem:[%s4389_s8 + $0x10] sm:$0x3]  ;;  %v254_v1 = vld [vmem:[%s4389_s8 + $0x8] sm:$0xff] }
  0x21   : > { %v4395_v62 = vld [vmem:[%s5588_s1] ss:$0 sm:$0xff]  ;;  %v256_v4 = vld [vmem:[%s4389_s8 + $0x18] sm:$0xff]  ;;  %v258_v6 = vld [vmem:[%s4389_s8 + $0x28] sm:$0x3] }
  0x22   : > { %v253_v63 = vld [vmem:[%s4389_s8] sm:$0xff]  ;;  %v317_v0 = vmul.f32 %v4395_v62, %v255_v61  ;;  %v316_v5 = vmul.f32 %v4395_v62, %v254_v1  ;;  %v260_v9 = vld [vmem:[%s4389_s8 + $0x38] sm:$0xff]  ;;  %v320_v13 = vmul.f32 %v4395_v62, %v258_v6 }
  0x23   : > { %594 = vperm.xlu1 %4135, %v494_v11   ;;  %589 = vperm.xlu0 %4134, %v493_v12   ;;  %v4403_v2 = vld [vmem:[%s5589_s2] ss:$0 sm:$0xff]  ;;  %v315_v3 = vmul.f32 %v4395_v62, %v253_v63  ;;  %v318_v11 = vmul.f32 %v4395_v62, %v256_v4  ;;  %v259_v12 = vld [vmem:[%s4389_s8 + $0x30] sm:$0xff] }
  0x24   : > { %v257_v7 = vld [vmem:[%s4389_s8 + $0x20] sm:$0xff]  ;;  %v377_v8 = vadd.f32 %v4403_v2, %v317_v0  ;;  %v376_v15 = vadd.f32 %v4403_v2, %v316_v5 }
  0x25   : > { %v375_v10 = vadd.f32 %v4403_v2, %v315_v3  ;;  %v319_v14 = vmul.f32 %v4395_v62, %v257_v7 }
  0x27   : > { %604 = vperm.xlu1 %4135, %v496_v16   ;;  %599 = vperm.xlu0 %4134, %v495_v17   ;;  %v322_v16 = vmul.f32 %v4395_v62, %v260_v9  ;;  %v431_v17 = vmax.f32 %v377_v8, 0.0 }
  0x2b   : > { %614 = vperm.xlu1 %4135, %v498_v19   ;;  %609 = vperm.xlu0 %4134, %v497_v20   ;;  %v321_v19 = vmul.f32 %v4395_v62, %v259_v12  ;;  %v262_v20 = vld [vmem:[%s4389_s8 + $0x48] sm:$0xff] }
  0x2f   : > { %624 = vperm.xlu1 %4135, %v500_v21   ;;  %619 = vperm.xlu0 %4134, %v499_v22   ;;  %v429_v21 = vmax.f32 %v375_v10, 0.0  ;;  %v378_v22 = vadd.f32 %v4403_v2, %v318_v11 }
  0x33   : > { %634 = vperm.xlu1 %4135, %v502_v23   ;;  %629 = vperm.xlu0 %4134, %v501_v24  }
  0x37   : > { %644 = vperm.xlu1 %4135, %v504_v25   ;;  %639 = vperm.xlu0 %4134, %v503_v26   ;;  %v380_v25 = vadd.f32 %v4403_v2, %v320_v13  ;;  %v379_v26 = vadd.f32 %v4403_v2, %v319_v14  ;;  %v268_v14 = vld [vmem:[%s4389_s8 + $0x78] sm:$0xff] }
  0x3b   : > { %654 = vperm.xlu1 %4135, %v506_v27   ;;  %649 = vperm.xlu0 %4134, %v505_v28   ;;  %v430_v27 = vmax.f32 %v376_v15, 0.0  ;;  %v382_v28 = vadd.f32 %v4403_v2, %v322_v16 }
  0x3f   : > { %664 = vperm.xlu1 %4135, %v508_v31   ;;  %659 = vperm.xlu0 %4134, %v507_v32   ;;  %v324_v31 = vmul.f32 %v4395_v62, %v262_v20  ;;  %v261_v32 = vld [vmem:[%s4389_s8 + $0x40] sm:$0x3] }
  0x43   : > { %674 = vperm.xlu1 %4135, %v510_v33   ;;  %669 = vperm.xlu0 %4134, %v509_v34   ;;  %v381_v34 = vadd.f32 %v4403_v2, %v321_v19 }
  0x47   : > { %684 = vperm.xlu1 %4135, %v512_v35   ;;  %679 = vperm.xlu0 %4134, %v511_v36   ;;  %v264_v35 = vld [vmem:[%s4389_s8 + $0x58] sm:$0x3] }
  0x4b   : > { %694 = vperm.xlu1 %4135, %v514_v37   ;;  %689 = vperm.xlu0 %4134, %v513_v38   ;;  %v432_v37 = vmax.f32 %v378_v22, 0.0  ;;  %v263_v38 = vld [vmem:[%s4389_s8 + $0x50] sm:$0xff] }
  0x4f   : > { %704 = vperm.xlu1 %4135, %v516_v39   ;;  %699 = vperm.xlu0 %4134, %v515_v40   ;;  %v266_v39 = vld [vmem:[%s4389_s8 + $0x68] sm:$0xff] }
  0x53   : > { %714 = vperm.xlu1 %4135, %v518_v41   ;;  %709 = vperm.xlu0 %4134, %v517_v42   ;;  %v434_v42 = vmax.f32 %v380_v25, 0.0 }
  0x57   : > { %724 = vperm.xlu1 %4135, %v520_v43   ;;  %719 = vperm.xlu0 %4134, %v519_v44   ;;  %v433_v43 = vmax.f32 %v379_v26, 0.0  ;;  %v323_v44 = vmul.f32 %v4395_v62, %v261_v32  ;;  %v330_v32 = vmul.f32 %v4395_v62, %v268_v14 }
  0x59   : > { %v383_v0 = vadd.f32 %v4403_v2, %v323_v44 }
  0x5b   : > { %734 = vperm.xlu1 %4135, %v522_v45   ;;  %729 = vperm.xlu0 %4134, %v521_v46   ;;  %v436_v46 = vmax.f32 %v382_v28, 0.0 }
  0x5f   : > { %744 = vperm.xlu1 %4135, %v524_v47   ;;  %739 = vperm.xlu0 %4134, %v523_v48   ;;  %v4437_v47 = vadd.f32 %v4403_v2, %v324_v31  ;;  %v326_v48 = vmul.f32 %v4395_v62, %v264_v35 }
  0x61   : > { %v386_v19 = vadd.f32 %v4403_v2, %v326_v48  ;;  %v438_v35 = vmax.f32 %v4437_v47, 0.0  ;;  %v269_v48 = vld [vmem:[%s4389_s8 + $0x80] sm:$0xff] }
  0x63   : > { %754 = vperm.xlu1 %4135, %v526_v49   ;;  %749 = vperm.xlu0 %4134, %v525_v50   ;;  %v435_v50 = vmax.f32 %v381_v34, 0.0 }
  0x67   : > { %764 = vperm.xlu1 %4135, %v528_v51   ;;  %759 = vperm.xlu0 %4134, %v527_v52   ;;  %v325_v51 = vmul.f32 %v4395_v62, %v263_v38  ;;  %v328_v52 = vmul.f32 %v4395_v62, %v266_v39  ;;  %v4500_v39 = vld [vmem:[%s5591_s4 + $0x4] sm:$0x3] }
  0x69   : > { %v385_v20 = vadd.f32 %v4403_v2, %v325_v51  ;;  %v388_v31 = vadd.f32 %v4403_v2, %v328_v52  ;;  %v4513_v52 = vadd.f32 %v4403_v2, %v330_v32 }
  0x6b   : > { %774 = vperm.xlu1 %4135, %v530_v53   ;;  %769 = vperm.xlu0 %4134, %v529_v54   ;;  %v439_v47 = vmax.f32 %v385_v20, 0.0  ;;  %v442_v51 = vmax.f32 %v388_v31, 0.0 }
  0x6f   : > { %784 = vperm.xlu1 %4135, %v532_v55   ;;  %779 = vperm.xlu0 %4134, %v531_v56   ;;  %v290_v55 = vld [vmem:[%s4389_s8 + $0x128] sm:$0xff] }
  0x73   : > { %794 = vperm.xlu1 %4135, %v534_v57   ;;  %789 = vperm.xlu0 %4134, %v533_v58   ;;  %v265_v57 = vld [vmem:[%s4389_s8 + $0x60] sm:$0xff] }
  0x74   : > { %v327_v7 = vmul.f32 %v4395_v62, %v265_v57 }
  0x77   : > { %804 = vperm.xlu1 %4135, %v536_v59   ;;  %799 = vperm.xlu0 %4134, %v535_v60  }
  0x8e   : > { %v550_v23 = vpop.permute.xlu1 %549  ;;  %v540_v24 = vpop.permute.xlu0 %539 }
  0x8f   : > { %v809_v33 = vmul.f32 %v550_v23, %v431_v17  ;;  %v4429_v36 = vmul.f32 %v540_v24, %v429_v21  ;;  %v437_v17 = vmax.f32 %v383_v0, 0.0  ;;  %v267_v21 = vld [vmem:[%s4389_s8 + $0x70] sm:$0x3] }
  0x90   : > { %v329_v38 = vmul.f32 %v4395_v62, %v267_v21 }
  0x91   : > { %v930_v49 = vrot.slane %v809_v33, 1  ;;  %v927_v53 = vrot.slane %v4429_v36, 1  ;;  %v1487_v58 = vrot.slane %v809_v33, 2  ;;  %v1484_v59 = vrot.slane %v4429_v36, 2 }
  0x92   : > { %v555_v40 = vpop.permute.xlu1 %554  ;;  %v545_v41 = vpop.permute.xlu0 %544  ;;  %v1320_v33 = vsel %vm1106_vm0, %v4278_v29, 0 }
  0x93   : > { %v4434_v45 = vmul.f32 %v545_v41, %v430_v27  ;;  %v4443_v54 = vmul.f32 %v555_v40, %v432_v37  ;;  %v270_v27 = vld [vmem:[%s4389_s8 + $0x88] sm:$0x3]  ;;  %v387_v37 = vadd.f32 %v4403_v2, %v327_v7  ;;  %v440_v41 = vmax.f32 %v386_v19, 0.0 }
  0x94   : > { %v2286_v19 = vsel %vm1106_vm0, %v4283_v30, 0 }
  0x95   : > { %v928_v56 = vrot.slane %v4434_v45, 1  ;;  %v1485_v60 = vrot.slane %v4434_v45, 2  ;;  %v932_v10 = vrot.slane %v4443_v54, 1  ;;  %v441_v57 = vmax.f32 %v387_v37, 0.0  ;;  %v275_v37 = vld [vmem:[%s4389_s8 + $0xb0] sm:$0xff] }
  0x96   : > { %v565_v61 = vpop.permute.xlu1 %564  ;;  %v560_v63 = vpop.permute.xlu0 %559 }
  0x97   : > { %v4452_v1 = vmul.f32 %v565_v61, %v434_v42  ;;  %v4454_v3 = vmul.f32 %v560_v63, %v433_v43  ;;  %v929_v4 = vsel %vm926_vm1, %v927_v53, %v928_v56  ;;  %v931_v5 = vsel %vm926_vm1, %v928_v56, %v930_v49  ;;  %v272_v49 = vld [vmem:[%s4389_s8 + $0x98] sm:$0xff] }
  0x98   : > { %v1039_v6 = vpack.c.bf16 %v931_v5, %v929_v4  ;;  %v4460_v8 = vsel %vm1483_vm2, %v1484_v59, %v1485_v60  ;;  %v4463_v9 = vsel %vm1483_vm2, %v1485_v60, %v1487_v58  ;;  %v332_v42 = vmul.f32 %v4395_v62, %v270_v27  ;;  %v274_v59 = vld [vmem:[%s4389_s8 + $0xa8] sm:$0xff]  ;;  %v273_v60 = vld [vmem:[%s4389_s8 + $0xa0] sm:$0x3] }
  0x99   : > { %5620 = vst [vmem:[#allocation3_spill] sm:$0xff] %v4460_v8  ;;  %5621 = vst [vmem:[#allocation4_spill] sm:$0xff] %v4463_v9  ;;  %v935_v11 = vrot.slane %v4452_v1, 1  ;;  %v4469_v12 = vpack.c.bf16 %v4454_v3, %v4443_v54  ;;  %v933_v13 = vrot.slane %v4454_v3, 1  ;;  %v389_v58 = vadd.f32 %v4403_v2, %v329_v38  ;;  %v4552_v27 = vld [vmem:[%s5591_s4 + $0xc] sm:$0x3] }
  0x9a   : > { %v575_v15 = vpop.permute.xlu1 %574  ;;  %v570_v16 = vpop.permute.xlu0 %569  ;;  %3552 = vmatprep.mubr.msk.bf16.mxu1 %vm1057_vm3, %v1039_v6  ;;  %v4524_v0 = vadd.f32 %v4403_v2, %v332_v42  ;;  %v331_v4 = vmul.f32 %v4395_v62, %v269_v48  ;;  %v334_v5 = vmul.f32 %v4395_v62, %v272_v49  ;;  %v278_v38 = vld [vmem:[%s4389_s8 + $0xc8] sm:$0xff] }
  0x9b   : > { %v4479_v23 = vmul.f32 %v575_v15, %v436_v46  ;;  %v4481_v24 = vmul.f32 %v570_v16, %v435_v50  ;;  %v934_v25 = vsel %vm926_vm1, %v932_v10, %v933_v13  ;;  %v936_v26 = vsel %vm926_vm1, %v933_v13, %v935_v11  ;;  %v271_v50 = vld [vmem:[%s4389_s8 + $0x90] sm:$0xff] }
  0x9c   : > { %v1040_v28 = vpack.c.bf16 %v936_v26, %v934_v25  ;;  %v333_v6 = vmul.f32 %v4395_v62, %v271_v50  ;;  %v336_v15 = vmul.f32 %v4395_v62, %v274_v59  ;;  %v335_v16 = vmul.f32 %v4395_v62, %v273_v60 }
  0x9d   : > { %v4492_v34 = vpack.c.bf16 %v4479_v23, %v4481_v24  ;;  %v938_v43 = vrot.slane %v4479_v23, 1  ;;  %v937_v44 = vrot.slane %v4481_v24, 1  ;;  %v443_v30 = vmax.f32 %v389_v58, 0.0 }
  0x9e   : > { %v585_v40 = vpop.permute.xlu1 %584  ;;  %v580_v29 = vpop.permute.xlu0 %579  ;;  %3553 = vmatmul.mubr.msk.bf16.vlgmr.msra.gmra.mrb[0].mxu1 %vm1057_vm3, %v1040_v28  ;;  %3688 = vmatprep.mubr.msk.bf16.mxu0 %vm1057_vm3, %v1040_v28  ;;  %v391_v32 = vadd.f32 %v4403_v2, %v331_v4  ;;  %v4580_v48 = vadd.f32 %v4403_v2, %v335_v16  ;;  %v446_v60 = vmax.f32 %v4524_v0, 0.0  ;;  %v280_v4 = vld [vmem:[%s4389_s8 + $0xd8] sm:$0xff] }
  0x9f   : > { %v4507_v46 = vmul.f32 %v580_v29, %v437_v17  ;;  %3585 = vmatpush3.bf16.msra.mxu1 %v1320_v33  ;;  %v4517_v53 = vmul.f32 %v585_v40, %v438_v35  ;;  %v939_v13 = vsel %vm926_vm1, %v937_v44, %v938_v43  ;;  %v276_v17 = vld [vmem:[%s4389_s8 + $0xb8] sm:$0x3]  ;;  %v4560_v33 = vadd.f32 %v4403_v2, %v334_v5 }
  0xa0   : > { %4116 = vmatprep.subr.msk.bf16.mxu1 %vm1106_vm0, %v4500_v39  ;;  %v4563_v35 = vadd.f32 %v4403_v2, %v333_v6  ;;  %v338_v49 = vmul.f32 %v4395_v62, %v276_v17  ;;  %v449_v17 = vmax.f32 %v4580_v48, 0.0 }
  0xa1   : > { %v940_v56 = vrot.slane %v4507_v46, 1  ;;  %v942_v20 = vrot.slane %v4517_v53, 1 }
  0xa2   : > { %v595_v61 = vpop.permute.xlu1 %594  ;;  %v590_v63 = vpop.permute.xlu0 %589  ;;  %v447_v16 = vmax.f32 %v4563_v35, 0.0 }
  0xa3   : > { %v941_v7 = vsel %vm926_vm1, %v938_v43, %v940_v56  ;;  %v4530_v10 = vmul.f32 %v595_v61, %v440_v41  ;;  %v4532_v11 = vmul.f32 %v590_v63, %v439_v47  ;;  %v277_v43 = vld [vmem:[%s4389_s8 + $0xc0] sm:$0xff]  ;;  %v4577_v47 = vadd.f32 %v4403_v2, %v336_v15  ;;  %v282_v15 = vld [vmem:[%s4389_s8 + $0xe8] sm:$0x3] }
  0xa4   : > { %v4535_v14 = vpack.c.bf16 %v941_v7, %v939_v13  ;;  %v337_v56 = vmul.f32 %v4395_v62, %v275_v37  ;;  %v445_v61 = vmax.f32 %v391_v32, 0.0  ;;  %v448_v63 = vmax.f32 %v4560_v33, 0.0  ;;  %v279_v13 = vld [vmem:[%s4389_s8 + $0xd0] sm:$0x3] }
  0xa5   : > { %v945_v21 = vrot.slane %v4530_v10, 1  ;;  %v4546_v25 = vpack.c.bf16 %v4532_v11, %v4517_v53  ;;  %v943_v26 = vrot.slane %v4532_v11, 1  ;;  %v283_v32 = vld [vmem:[%s4389_s8 + $0xf0] sm:$0xff]  ;;  %v5630_v18 = vmax.f32 %v4577_v47, 0.0 }
  0xa6   : > { %5622 = vst [vmem:[#allocation5_spill] sm:$0xff] %v4535_v14  ;;  %v605_v28 = vpop.permute.xlu1 %604  ;;  %v600_v31 = vpop.permute.xlu0 %599  ;;  %3556 = vmatprep.mubr.msk.bf16.mxu1 %vm1057_vm3, %v4535_v14  ;;  %3689 = vmatmul.mubr.msk.bf16.vlgmr.msra.gmra.mrb[0].mxu0 %vm1057_vm3, %v4535_v14  ;;  %v352_v47 = vmul.f32 %v4395_v62, %v290_v55 }
  0xa7   : > { %5623 = vst [vmem:[#allocation6_spill] sm:$0xff] %v4546_v25  ;;  %v4567_v40 = vmul.f32 %v605_v28, %v442_v51  ;;  %v4569_v29 = vmul.f32 %v600_v31, %v441_v57  ;;  %v944_v41 = vsel %vm926_vm1, %v942_v20, %v943_v26  ;;  %v946_v42 = vsel %vm926_vm1, %v943_v26, %v945_v21  ;;  %v281_v31 = vld [vmem:[%s4389_s8 + $0xe0] sm:$0xff] }
  0xa8   : > { %3721 = vmatpush3.bf16.msra.mxu0 %v2286_v19  ;;  %v4574_v44 = vpack.c.bf16 %v946_v42, %v944_v41  ;;  %v444_v51 = vmax.f32 %v4513_v52, 0.0  ;;  %v340_v57 = vmul.f32 %v4395_v62, %v278_v38  ;;  %v339_v52 = vmul.f32 %v4395_v62, %v277_v43 }
  0xa9   : > { %4121 = vmatprep.subr.msk.bf16.mxu0 %vm1106_vm0, %v4552_v27  ;;  %v4587_v50 = vpack.c.bf16 %v4567_v40, %v4569_v29  ;;  %v948_v5 = vrot.slane %v4567_v40, 1  ;;  %v947_v6 = vrot.slane %v4569_v29, 1  ;;  %v4610_v19 = vadd.f32 %v4403_v2, %v338_v49 }
  0xaa   : > { %5624 = vst [vmem:[#allocation7_spill] sm:$0xff] %v4574_v44  ;;  %v615_v58 = vpop.permute.xlu1 %614  ;;  %v610_v59 = vpop.permute.xlu0 %609  ;;  %3557 = vmatmul.mubr.msk.bf16.gmra.mrb[4].mxu1 %vm1057_vm3, %v4574_v44  ;;  %3692 = vmatprep.mubr.msk.bf16.mxu0 %vm1057_vm3, %v4574_v44  ;;  %v4616_v26 = vadd.f32 %v4403_v2, %v337_v56  ;;  %v4619_v28 = vadd.f32 %v4403_v2, %v340_v57  ;;  %v286_v56 = vld [vmem:[%s4389_s8 + $0x108] sm:$0xff]  ;;  %v291_v44 = vld [vmem:[%s4389_s8 + $0x130] sm:$0x3] }
  0xab   : > { %5625 = vst [vmem:[#allocation8_spill] sm:$0xff] %v4587_v50  ;;  %v4602_v7 = vmul.f32 %v610_v59, %v443_v30  ;;  %v4612_v20 = vmul.f32 %v615_v58, %v444_v51  ;;  %v284_v30 = vld [vmem:[%s4389_s8 + $0xf8] sm:$0xff]  ;;  %v4625_v37 = vadd.f32 %v4403_v2, %v339_v52  ;;  %v342_v38 = vmul.f32 %v4395_v62, %v280_v4 }
  0xac   : > { %v341_v41 = vmul.f32 %v4395_v62, %v279_v13  ;;  %v344_v42 = vmul.f32 %v4395_v62, %v282_v15  ;;  %v949_v51 = vsel %vm926_vm1, %v947_v6, %v948_v5  ;;  %v343_v58 = vmul.f32 %v4395_v62, %v281_v31 }
  0xad   : > { %v950_v21 = vrot.slane %v4602_v7, 1  ;;  %v346_v59 = vmul.f32 %v4395_v62, %v284_v30  ;;  %v345_v52 = vmul.f32 %v4395_v62, %v283_v32  ;;  %v952_v4 = vrot.slane %v4612_v20, 1  ;;  %v285_v32 = vld [vmem:[%s4389_s8 + $0x100] sm:$0x3] }
  0xae   : > { %v625_v33 = vpop.permute.xlu1 %624  ;;  %v620_v35 = vpop.permute.xlu0 %619  ;;  %v452_v15 = vmax.f32 %v4610_v19, 0.0  ;;  %v4658_v31 = vadd.f32 %v4403_v2, %v341_v41  ;;  %v348_v30 = vmul.f32 %v4395_v62, %v286_v56  ;;  %v4671_v19 = vadd.f32 %v4403_v2, %v344_v42 }
  0xaf   : > { %v951_v43 = vsel %vm926_vm1, %v948_v5, %v950_v21  ;;  %v4631_v48 = vmul.f32 %v625_v33, %v446_v60  ;;  %v4633_v49 = vmul.f32 %v620_v35, %v445_v61  ;;  %v4655_v21 = vadd.f32 %v4403_v2, %v342_v38 }
  0xb0   : > { %v4637_v57 = vpack.c.bf16 %v951_v43, %v949_v51  ;;  %v4674_v38 = vadd.f32 %v4403_v2, %v343_v58  ;;  %v4677_v41 = vadd.f32 %v4403_v2, %v346_v59  ;;  %v4685_v56 = vadd.f32 %v4403_v2, %v345_v52 }
  0xb1   : > { %v955_v13 = vrot.slane %v4631_v48, 1  ;;  %v4646_v60 = vpack.c.bf16 %v4633_v49, %v4612_v20  ;;  %v953_v61 = vrot.slane %v4633_v49, 1  ;;  %v347_v42 = vmul.f32 %v4395_v62, %v285_v32 }
  0xb2   : > { %5626 = vst [vmem:[#allocation9_spill] sm:$0xff] %v4637_v57  ;;  %v635_v5 = vpop.permute.xlu1 %634  ;;  %v630_v6 = vpop.permute.xlu0 %629  ;;  %3560 = vmatprep.mubr.msk.bf16.mxu1 %vm1057_vm3, %v4637_v57  ;;  %3693 = vmatmul.mubr.msk.bf16.gmra.mrb[4].mxu0 %vm1057_vm3, %v4637_v57  ;;  %v454_v59 = vmax.f32 %v4619_v28, 0.0  ;;  %v289_v28 = vld [vmem:[%s4389_s8 + $0x120] sm:$0xff]  ;;  %v292_v57 = vld [vmem:[%s4389_s8 + $0x138] sm:$0xff] }
  0xb3   : > { %5627 = vst [vmem:[#allocation10_spill] sm:$0xff] %v4646_v60  ;;  %v4662_v33 = vmul.f32 %v635_v5, %v448_v63  ;;  %v4664_v35 = vmul.f32 %v630_v6, %v447_v16  ;;  %v954_v43 = vsel %vm926_vm1, %v952_v4, %v953_v61  ;;  %v956_v51 = vsel %vm926_vm1, %v953_v61, %v955_v13  ;;  %v288_v4 = vld [vmem:[%s4389_s8 + $0x118] sm:$0x3] }
  0xb4   : > { %v4668_v22 = vpack.c.bf16 %v956_v51, %v954_v43  ;;  %v451_v16 = vmax.f32 %v4616_v26, 0.0  ;;  %v453_v26 = vmax.f32 %v4625_v37, 0.0  ;;  %v4697_v61 = vadd.f32 %v4403_v2, %v348_v30  ;;  %v287_v51 = vld [vmem:[%s4389_s8 + $0x110] sm:$0xff] }
  0xb5   : > { %v4681_v63 = vpack.c.bf16 %v4662_v33, %v4664_v35  ;;  %v958_v5 = vrot.slane %v4662_v33, 1  ;;  %v957_v6 = vrot.slane %v4664_v35, 1  ;;  %v350_v0 = vmul.f32 %v4395_v62, %v288_v4 }
  0xb6   : > { %5628 = vst [vmem:[#allocation11_spill] sm:$0xff] %v4668_v22  ;;  %v645_v58 = vpop.permute.xlu1 %644  ;;  %v640_v13 = vpop.permute.xlu0 %639  ;;  %3561 = vmatmul.mubr.msk.bf16.gmra.mrb[8].mxu1 %vm1057_vm3, %v4668_v22  ;;  %3696 = vmatprep.mubr.msk.bf16.mxu0 %vm1057_vm3, %v4668_v22  ;;  %v4718_v43 = vadd.f32 %v4403_v2, %v347_v42  ;;  %v349_v4 = vmul.f32 %v4395_v62, %v287_v51 }
  0xb7   : > { %5629 = vst [vmem:[#allocation12_spill] sm:$0xff] %v4681_v63  ;;  %v4701_v32 = vmul.f32 %v640_v13, %v449_v17  ;;  %v4713_v22 = vmul.f32 %v645_v58, %v5630_v18  ;;  %v351_v18 = vmul.f32 %v4395_v62, %v289_v28  ;;  %v959_v42 = vsel %vm926_vm1, %v957_v6, %v958_v5  ;;  %v296_v63 = vld [vmem:[%s4389_s8 + $0x158] sm:$0xff] }
  0xb8   : > { %v4735_v9 = vadd.f32 %v4403_v2, %v350_v0  ;;  %v354_v52 = vmul.f32 %v4395_v62, %v292_v57  ;;  %v353_v51 = vmul.f32 %v4395_v62, %v291_v44  ;;  %v4753_v57 = vadd.f32 %v4403_v2, %v349_v4 }
  0xb9   : > { %v960_v17 = vrot.slane %v4701_v32, 1  ;;  %v962_v55 = vrot.slane %v4713_v22, 1  ;;  %v4756_v6 = vadd.f32 %v4403_v2, %v352_v47 }
  0xba   : > { %v655_v37 = vpop.permute.xlu1 %654  ;;  %v650_v14 = vpop.permute.xlu0 %649  ;;  %v4772_v4 = vadd.f32 %v4403_v2, %v354_v52  ;;  %v4775_v47 = vadd.f32 %v4403_v2, %v353_v51  ;;  %v358_v51 = vmul.f32 %v4395_v62, %v296_v63 }
  0xbb   : > { %v961_v58 = vsel %vm926_vm1, %v958_v5, %v960_v17  ;;  %v4727_v30 = vmul.f32 %v655_v37, %v452_v15  ;;  %v4729_v13 = vmul.f32 %v650_v14, %v451_v16  ;;  %v294_v16 = vld [vmem:[%s4389_s8 + $0x148] sm:$0x3]  ;;  %v4759_v37 = vadd.f32 %v4403_v2, %v351_v18 }
  0xbc   : > { %v4732_v8 = vpack.c.bf16 %v961_v58, %v959_v42  ;;  %v356_v18 = vmul.f32 %v4395_v62, %v294_v16  ;;  %v1489_v16 = vrot.slane %v4443_v54, 2  ;;  %v5636_v54 = vmax.f32 %v4655_v21, 0.0 }
  0xbd   : > { %v965_v28 = vrot.slane %v4727_v30, 1  ;;  %v4743_v14 = vpack.c.bf16 %v4729_v13, %v4713_v22  ;;  %v963_v15 = vrot.slane %v4729_v13, 1  ;;  %v4823_v21 = vadd.f32 %v4403_v2, %v358_v51 }
  0xbe   : > { %5631 = vst [vmem:[#allocation13_spill] sm:$0xff] %v4732_v8  ;;  %v665_v5 = vpop.permute.xlu1 %664  ;;  %v660_v0 = vpop.permute.xlu0 %659  ;;  %3564 = vmatprep.mubr.msk.bf16.mxu1 %vm1057_vm3, %v4732_v8  ;;  %3697 = vmatmul.mubr.msk.bf16.gmra.mrb[8].mxu0 %vm1057_vm3, %v4732_v8  ;;  %v293_v8 = vld [vmem:[%s4389_s8 + $0x140] sm:$0xff] }
  0xbf   : > { %5632 = vst [vmem:[#allocation14_spill] sm:$0xff] %v4743_v14  ;;  %v4761_v17 = vmul.f32 %v665_v5, %v454_v59  ;;  %v4763_v58 = vmul.f32 %v660_v0, %v453_v26  ;;  %v964_v42 = vsel %vm926_vm1, %v962_v55, %v963_v15  ;;  %v966_v14 = vsel %vm926_vm1, %v963_v15, %v965_v28 }
  0xc0   : > { %v4769_v44 = vpack.c.bf16 %v966_v14, %v964_v42  ;;  %v1492_v59 = vrot.slane %v4452_v1, 2  ;;  %v1490_v26 = vrot.slane %v4454_v3, 2  ;;  %v355_v3 = vmul.f32 %v4395_v62, %v293_v8 }
  0xc1   : > { %v4782_v55 = vpack.c.bf16 %v4761_v17, %v4763_v58  ;;  %v968_v5 = vrot.slane %v4761_v17, 1  ;;  %v967_v0 = vrot.slane %v4763_v58, 1  ;;  %v5635_v42 = vmax.f32 %v4658_v31, 0.0 }
  0xc2   : > { %5633 = vst [vmem:[#allocation15_spill] sm:$0xff] %v4769_v44  ;;  %v675_v14 = vpop.permute.xlu1 %674  ;;  %v670_v15 = vpop.permute.xlu0 %669  ;;  %3565 = vmatmul.mubr.msk.bf16.gmra.mrb[12].mxu1 %vm1057_vm3, %v4769_v44  ;;  %3700 = vmatprep.mubr.msk.bf16.mxu0 %vm1057_vm3, %v4769_v44  ;;  %v295_v44 = vld [vmem:[%s4389_s8 + $0x150] sm:$0xff]  ;;  %v4805_v8 = vadd.f32 %v4403_v2, %v356_v18  ;;  %v1491_v31 = vsel %vm1483_vm2, %v1489_v16, %v1490_v26  ;;  %v4817_v1 = vsel %vm1106_vm0, %v4552_v27, 0 }
  0xc3   : > { %5634 = vst [vmem:[#allocation16_spill] sm:$0xff] %v4782_v55  ;;  %v4798_v28 = vmul.f32 %v670_v15, %v5635_v42  ;;  %v4809_v63 = vmul.f32 %v675_v14, %v5636_v54  ;;  %v1493_v15 = vsel %vm1483_vm2, %v1490_v26, %v1492_v59  ;;  %v298_v42 = vld [vmem:[%s4389_s8 + $0x168] sm:$0xff]  ;;  %v4820_v18 = vadd.f32 %v4403_v2, %v355_v3 }
  0xc4   : > { %v357_v14 = vmul.f32 %v4395_v62, %v295_v44  ;;  %v5637_v59 = vmax.f32 %v4671_v19, 0.0  ;;  %v5638_v54 = vmax.f32 %v4674_v38, 0.0  ;;  %v969_v27 = vsel %vm926_vm1, %v967_v0, %v968_v5 }
  0xc5   : > { %v970_v60 = vrot.slane %v4798_v28, 1  ;;  %v1497_v3 = vrot.slane %v4507_v46, 2  ;;  %v4839_v51 = vpack.c.bf16 %v1493_v15, %v1491_v31  ;;  %v360_v44 = vmul.f32 %v4395_v62, %v298_v42 }
  0xc6   : > { %v685_v50 = vpop.permute.xlu1 %684  ;;  %v680_v52 = vpop.permute.xlu0 %679  ;;  %v1494_v46 = vrot.slane %v4481_v24, 2  ;;  %v1502_v0 = vrot.slane %v4530_v10, 2  ;;  %v1500_v31 = vrot.slane %v4532_v11, 2  ;;  %v1499_v11 = vrot.slane %v4517_v53, 2 }
  0xc7   : > { %v971_v16 = vsel %vm926_vm1, %v968_v5, %v970_v60  ;;  %v4829_v26 = vmul.f32 %v685_v50, %v5637_v59  ;;  %v4833_v55 = vmul.f32 %v680_v52, %v5638_v54  ;;  %5640 = vst [vmem:[#allocation18_spill] sm:$0xff] %v4839_v51  ;;  %v972_v60 = vrot.slane %v4809_v63, 1  ;;  %v297_v52 = vld [vmem:[%s4389_s8 + $0x160] sm:$0x3] }
  0xc8   : > { %v4837_v25 = vpack.c.bf16 %v971_v16, %v969_v27  ;;  %v1495_v5 = vrot.slane %v4479_v23, 2  ;;  %v5641_v16 = vmax.f32 %v4677_v41, 0.0  ;;  %v5642_v23 = vmax.f32 %v4685_v56, 0.0 }
  0xc9   : > { %v975_v19 = vrot.slane %v4829_v26, 1  ;;  %v4846_v50 = vpack.c.bf16 %v4833_v55, %v4809_v63  ;;  %v973_v38 = vrot.slane %v4833_v55, 1  ;;  %v359_v41 = vmul.f32 %v4395_v62, %v297_v52 }
  0xca   : > { %5639 = vst [vmem:[#allocation17_spill] sm:$0xff] %v4837_v25  ;;  %v695_v15 = vpop.permute.xlu1 %694  ;;  %v690_v42 = vpop.permute.xlu0 %689  ;;  %3568 = vmatprep.mubr.msk.bf16.mxu1 %vm1057_vm3, %v4837_v25  ;;  %3701 = vmatmul.mubr.msk.bf16.gmra.mrb[12].mxu0 %vm1057_vm3, %v4837_v25  ;;  %v4874_v25 = vadd.f32 %v4403_v2, %v357_v14  ;;  %v1498_v56 = vsel %vm1483_vm2, %v1495_v5, %v1497_v3  ;;  %v5646_v52 = vmax.f32 %v4697_v61, 0.0 }
  0xcb   : > { %v4860_v59 = vmul.f32 %v695_v15, %v5641_v16  ;;  %v4864_v54 = vmul.f32 %v690_v42, %v5642_v23  ;;  %3722 = vmatprep.mubr.msk.bf16.mxu0 %vm1057_vm3, %v4839_v51  ;;  %v974_v24 = vsel %vm926_vm1, %v972_v60, %v973_v38  ;;  %v976_v10 = vsel %vm926_vm1, %v973_v38, %v975_v19  ;;  %v301_v51 = vld [vmem:[%s4389_s8 + $0x180] sm:$0xff] }
  0xcc   : > { %v4871_v27 = vpack.c.bf16 %v976_v10, %v974_v24  ;;  %v4884_v60 = vadd.f32 %v4403_v2, %v360_v44  ;;  %v1501_v14 = vsel %vm1483_vm2, %v1499_v11, %v1500_v31  ;;  %v1503_v38 = vsel %vm1483_vm2, %v1500_v31, %v1502_v0 }
  0xcd   : > { %v4880_v15 = vpack.c.bf16 %v4860_v59, %v4864_v54  ;;  %v1496_v16 = vsel %vm1483_vm2, %v1494_v46, %v1495_v5  ;;  %v978_v23 = vrot.slane %v4860_v59, 1  ;;  %v977_v44 = vrot.slane %v4864_v54, 1 }
  0xce   : > { %5643 = vst [vmem:[#allocation19_spill] sm:$0xff] %v4871_v27  ;;  %v705_v19 = vpop.permute.xlu1 %704  ;;  %v700_v53 = vpop.permute.xlu0 %699  ;;  %3569 = vmatmul.mubr.msk.bf16.gmra.mrb[16].mxu1 %vm1057_vm3, %v4871_v27  ;;  %v5644_v24 = vmax.f32 %v4718_v43, 0.0  ;;  %v4899_v42 = vpack.c.bf16 %v1498_v56, %v1496_v16  ;;  %v1507_v11 = vrot.slane %v4602_v7, 2  ;;  %v4904_v31 = vadd.f32 %v4403_v2, %v359_v41  ;;  %v300_v56 = vld [vmem:[%s4389_s8 + $0x178] sm:$0x3] }
  0xcf   : > { %v4908_v5 = vmul.f32 %v705_v19, %v5646_v52  ;;  %v4911_v3 = vpack.c.bf16 %v1503_v38, %v1501_v14  ;;  %v1504_v7 = vrot.slane %v4569_v29, 2  ;;  %v1512_v16 = vrot.slane %v4631_v48, 2  ;;  %v4924_v19 = vld [vmem:[%s5591_s4 + $0xe] sm:$0x3]  ;;  %v299_v52 = vld [vmem:[%s4389_s8 + $0x170] sm:$0xff] }
  0xd0   : > { %v4897_v10 = vmul.f32 %v700_v53, %v5644_v24  ;;  %5645 = vst [vmem:[#allocation20_spill] sm:$0xff] %v4899_v42  ;;  %v1505_v53 = vrot.slane %v4567_v40, 2  ;;  %v1510_v41 = vrot.slane %v4633_v49, 2  ;;  %v5648_v40 = vmax.f32 %v4735_v9, 0.0 }
  0xd1   : > { %5647 = vst [vmem:[#allocation21_spill] sm:$0xff] %v4911_v3  ;;  %v5649_v48 = vmax.f32 %v4753_v57, 0.0  ;;  %v979_v38 = vsel %vm926_vm1, %v977_v44, %v978_v23  ;;  %v1509_v43 = vrot.slane %v4612_v20, 2  ;;  %v362_v9 = vmul.f32 %v4395_v62, %v300_v56  ;;  %v302_v20 = vld [vmem:[%s4389_s8 + $0x188] sm:$0xff] }
  0xd2   : > { %v980_v46 = vrot.slane %v4897_v10, 1  ;;  %v715_v24 = vpop.permute.xlu1 %714  ;;  %v710_v61 = vpop.permute.xlu0 %709  ;;  %3723 = vmatmul.mubr.msk.bf16.vlgmr.msra.gmra.mrb[0].mxu0 %vm1057_vm3, %v4899_v42  ;;  %v1508_v0 = vsel %vm1483_vm2, %v1505_v53, %v1507_v11  ;;  %v982_v57 = vrot.slane %v4908_v5, 1 }
  0xd3   : > { %v4929_v29 = vmul.f32 %v715_v24, %v5648_v40  ;;  %v4933_v49 = vmul.f32 %v710_v61, %v5649_v48  ;;  %3726 = vmatprep.mubr.msk.bf16.mxu0 %vm1057_vm3, %v4911_v3  ;;  %3755 = vmatpush3.bf16.msra.mxu0 %v4817_v1  ;;  %v1506_v1 = vsel %vm1483_vm2, %v1504_v7, %v1505_v53  ;;  %v5651_v40 = vmax.f32 %v4756_v6, 0.0 }
  0xd4   : > { %v981_v14 = vsel %vm926_vm1, %v978_v23, %v980_v46  ;;  %4122 = vmatprep.subr.msk.bf16.mxu0 %vm1106_vm0, %v4924_v19  ;;  %v1511_v56 = vsel %vm1483_vm2, %v1509_v43, %v1510_v41  ;;  %v1513_v61 = vsel %vm1483_vm2, %v1510_v41, %v1512_v16  ;;  %v1517_v53 = vrot.slane %v4701_v32, 2 }
  0xd5   : > { %v4941_v27 = vpack.c.bf16 %v981_v14, %v979_v38  ;;  %v985_v46 = vrot.slane %v4929_v29, 1  ;;  %v4949_v24 = vpack.c.bf16 %v4933_v49, %v4908_v5  ;;  %v983_v23 = vrot.slane %v4933_v49, 1 }
  0xd6   : > { %v725_v44 = vpop.permute.xlu1 %724  ;;  %v720_v11 = vpop.permute.xlu0 %719  ;;  %v361_v14 = vmul.f32 %v4395_v62, %v299_v52  ;;  %v5652_v38 = vmax.f32 %v4759_v37, 0.0  ;;  %v4975_v7 = vpack.c.bf16 %v1508_v0, %v1506_v1  ;;  %v364_v16 = vmul.f32 %v4395_v62, %v302_v20  ;;  %v304_v20 = vld [vmem:[%s4389_s8 + $0x198] sm:$0xff] }
  0xd7   : > { %5650 = vst [vmem:[#allocation22_spill] sm:$0xff] %v4941_v27  ;;  %3572 = vmatprep.mubr.msk.bf16.mxu1 %vm1057_vm3, %v4941_v27  ;;  %v4963_v48 = vmul.f32 %v725_v44, %v5651_v40  ;;  %v984_v42 = vsel %vm926_vm1, %v982_v57, %v983_v23  ;;  %v986_v27 = vsel %vm926_vm1, %v983_v23, %v985_v46  ;;  %v1522_v6 = vrot.slane %v4727_v30, 2  ;;  %v303_v44 = vld [vmem:[%s4389_s8 + $0x190] sm:$0x3] }
  0xd8   : > { %v4967_v3 = vmul.f32 %v720_v11, %v5652_v38  ;;  %v4973_v43 = vpack.c.bf16 %v986_v27, %v984_v42  ;;  %v1520_v41 = vrot.slane %v4729_v13, 2  ;;  %v4984_v52 = vpack.c.bf16 %v1513_v61, %v1511_v56 }
  0xd9   : > { %v1515_v32 = vrot.slane %v4662_v33, 2  ;;  %v1514_v27 = vrot.slane %v4664_v35, 2  ;;  %v473_v30 = vmax.f32 %v4904_v31, 0.0  ;;  %v363_v13 = vmul.f32 %v4395_v62, %v301_v51 }
  0xda   : > { %v4982_v37 = vpack.c.bf16 %v4963_v48, %v4967_v3  ;;  %v735_v42 = vpop.permute.xlu1 %734  ;;  %v730_v0 = vpop.permute.xlu0 %729  ;;  %3573 = vmatmul.mubr.msk.bf16.gmra.mrb[20].mxu1 %vm1057_vm3, %v4973_v43  ;;  %3727 = vmatmul.mubr.msk.bf16.gmra.mrb[4].mxu0 %vm1057_vm3, %v4975_v7  ;;  %v1519_v57 = vrot.slane %v4713_v22, 2  ;;  %v988_v46 = vrot.slane %v4963_v48, 1  ;;  %v987_v33 = vrot.slane %v4967_v3, 1 }
  0xdb   : > { %v5653_v35 = vmax.f32 %v4775_v47, 0.0  ;;  %3730 = vmatprep.mubr.msk.bf16.mxu0 %vm1057_vm3, %v4984_v52  ;;  %v1518_v11 = vsel %vm1483_vm2, %v1515_v32, %v1517_v53  ;;  %v5007_v1 = vadd.f32 %v4403_v2, %v362_v9  ;;  %v5010_v22 = vadd.f32 %v4403_v2, %v361_v14 }
  0xdc   : > { %v5013_v51 = vadd.f32 %v4403_v2, %v364_v16  ;;  %v5654_v47 = vmax.f32 %v4772_v4, 0.0  ;;  %v1521_v40 = vsel %vm1483_vm2, %v1519_v57, %v1520_v41  ;;  %v1523_v38 = vsel %vm1483_vm2, %v1520_v41, %v1522_v6 }
  0xdd   : > { %v4999_v23 = vmul.f32 %v730_v0, %v5653_v35  ;;  %v1516_v9 = vsel %vm1483_vm2, %v1514_v27, %v1515_v32  ;;  %v5024_v14 = vadd.f32 %v4403_v2, %v363_v13  ;;  %v366_v16 = vmul.f32 %v4395_v62, %v304_v20 }
  0xde   : > { %v5017_v56 = vmul.f32 %v735_v42, %v5654_v47  ;;  %v745_v53 = vpop.permute.xlu1 %744  ;;  %v740_v0 = vpop.permute.xlu0 %739  ;;  %v365_v35 = vmul.f32 %v4395_v62, %v303_v44  ;;  %v5655_v42 = vmax.f32 %v4805_v8, 0.0  ;;  %v5656_v57 = vmax.f32 %v4820_v18, 0.0 }
  0xdf   : > { %v990_v61 = vrot.slane %v4999_v23, 1  ;;  %v989_v41 = vsel %vm926_vm1, %v987_v33, %v988_v46  ;;  %v1527_v32 = vrot.slane %v4798_v28, 2  ;;  %v5041_v13 = vpack.c.bf16 %v1518_v11, %v1516_v9 }
  0xe0   : > { %v5031_v47 = vmul.f32 %v745_v53, %v5655_v42  ;;  %v5035_v6 = vmul.f32 %v740_v0, %v5656_v57  ;;  %v5043_v20 = vpack.c.bf16 %v1523_v38, %v1521_v40  ;;  %v992_v44 = vrot.slane %v5017_v56, 1 }
  0xe1   : > { %v991_v4 = vsel %vm926_vm1, %v988_v46, %v990_v61  ;;  %v1525_v46 = vrot.slane %v4761_v17, 2  ;;  %v1524_v28 = vrot.slane %v4763_v58, 2  ;;  %v1532_v33 = vrot.slane %v4829_v26, 2 }
  0xe2   : > { %v5039_v27 = vpack.c.bf16 %v991_v4, %v989_v41  ;;  %v995_v8 = vrot.slane %v5031_v47, 1  ;;  %v5049_v61 = vpack.c.bf16 %v5035_v6, %v5017_v56  ;;  %v993_v18 = vrot.slane %v5035_v6, 1  ;;  %v755_v40 = vpop.permute.xlu1 %754  ;;  %v750_v38 = vpop.permute.xlu0 %749  ;;  %3731 = vmatmul.mubr.msk.bf16.gmra.mrb[8].mxu0 %vm1057_vm3, %v5041_v13 }
  0xe3   : > { %v1530_v11 = vrot.slane %v4833_v55, 2  ;;  %v5657_v53 = vmax.f32 %v4823_v21, 0.0  ;;  %v5658_v17 = vmax.f32 %v4874_v25, 0.0  ;;  %3734 = vmatprep.mubr.msk.bf16.mxu0 %vm1057_vm3, %v5043_v20  ;;  %v1529_v9 = vrot.slane %v4809_v63, 2 }
  0xe4   : > { %3576 = vmatprep.mubr.msk.bf16.mxu1 %vm1057_vm3, %v5039_v27  ;;  %v994_v55 = vsel %vm926_vm1, %v992_v44, %v993_v18  ;;  %v996_v26 = vsel %vm926_vm1, %v993_v18, %v995_v8  ;;  %v476_v21 = vmax.f32 %v5007_v1, 0.0  ;;  %v5077_v42 = vadd.f32 %v4403_v2, %v365_v35  ;;  %v306_v8 = vld [vmem:[%s4389_s8 + $0x1a8] sm:$0x3] }
  0xe5   : > { %v5062_v0 = vmul.f32 %v755_v40, %v5657_v53  ;;  %v5066_v58 = vmul.f32 %v750_v38, %v5658_v17  ;;  %v5073_v4 = vpack.c.bf16 %v996_v26, %v994_v55  ;;  %v1528_v25 = vsel %vm1483_vm2, %v1525_v46, %v1527_v32  ;;  %v305_v38 = vld [vmem:[%s4389_s8 + $0x1a0] sm:$0xff] }
  0xe6   : > { %v475_v41 = vmax.f32 %v5010_v22, 0.0  ;;  %v478_v44 = vmax.f32 %v5013_v51, 0.0  ;;  %v765_v63 = vpop.permute.xlu1 %764  ;;  %v760_v18 = vpop.permute.xlu0 %759  ;;  %v1531_v1 = vsel %vm1483_vm2, %v1529_v9, %v1530_v11  ;;  %v1533_v35 = vsel %vm1483_vm2, %v1530_v11, %v1532_v33 }
  0xe7   : > { %v5082_v57 = vpack.c.bf16 %v5062_v0, %v5066_v58  ;;  %3577 = vmatmul.mubr.msk.bf16.gmra.mrb[24].mxu1 %vm1057_vm3, %v5073_v4  ;;  %v477_v32 = vmax.f32 %v5024_v14, 0.0  ;;  %v5093_v40 = vadd.f32 %v4403_v2, %v366_v16  ;;  %v998_v22 = vrot.slane %v5062_v0, 1 }
  0xe8   : > { %v997_v51 = vrot.slane %v5066_v58, 1  ;;  %v5100_v53 = vmul.f32 %v760_v18, %v473_v30  ;;  %v1526_v17 = vsel %vm1483_vm2, %v1524_v28, %v1525_v46  ;;  %v1537_v55 = vrot.slane %v4897_v10, 2 }
  0xe9   : > { %v5104_v26 = vpack.c.bf16 %v1528_v25, %v1526_v17  ;;  %v479_v14 = vmax.f32 %v5077_v42, 0.0  ;;  %v368_v2 = vmul.f32 %v4395_v62, %v306_v8  ;;  %v5659_v16 = vmax.f32 %v4884_v60, 0.0 }
  0xea   : > { %v1000_v11 = vrot.slane %v5100_v53, 1  ;;  %v5113_v9 = vpack.c.bf16 %v1533_v35, %v1531_v1  ;;  %v367_v31 = vmul.f32 %v4395_v62, %v305_v38  ;;  %v1535_v30 = vrot.slane %v4860_v59, 2  ;;  %v775_v42 = vpop.permute.xlu1 %774  ;;  %v770_v25 = vpop.permute.xlu0 %769 }
  0xeb   : > { %v5110_v33 = vmul.f32 %v765_v63, %v5659_v16  ;;  %v1534_v10 = vrot.slane %v4864_v54, 2  ;;  %v1542_v46 = vrot.slane %v4929_v29, 2  ;;  %v1540_v28 = vrot.slane %v4933_v49, 2  ;;  %3735 = vmatmul.mubr.msk.bf16.gmra.mrb[12].mxu0 %vm1057_vm3, %v5104_v26  ;;  %v4136_v49 = vld [vmem:[%s5589_s2] ss:$0 sm:$0xff] }
  0xec   : > { %v1001_v60 = vsel %vm926_vm1, %v998_v22, %v1000_v11  ;;  %v5123_v8 = vmul.f32 %v775_v42, %v476_v21  ;;  %v5125_v63 = vmul.f32 %v770_v25, %v475_v41  ;;  %3738 = vmatprep.mubr.msk.bf16.mxu0 %vm1057_vm3, %v5113_v9  ;;  %v999_v62 = vsel %vm926_vm1, %v997_v51, %v998_v22 }
  0xed   : > { %v1539_v59 = vrot.slane %v4908_v5, 2  ;;  %v1538_v54 = vsel %vm1483_vm2, %v1535_v30, %v1537_v55  ;;  %v5132_v29 = vpack.c.bf16 %v1001_v60, %v999_v62  ;;  %v428_v18 = vadd.f32 %v4136_v49, %v368_v2 }
  0xee   : > { %v1002_v21 = vrot.slane %v5110_v33, 1  ;;  %v1005_v41 = vrot.slane %v5123_v8, 1  ;;  %v5141_v1 = vpack.c.bf16 %v5125_v63, %v5110_v33  ;;  %v1003_v35 = vrot.slane %v5125_v63, 1  ;;  %v785_v5 = vpop.permute.xlu1 %784  ;;  %v780_v38 = vpop.permute.xlu0 %779 }
  0xef   : > { %3580 = vmatprep.mubr.msk.bf16.mxu1 %vm1057_vm3, %v5132_v29  ;;  %v1536_v22 = vsel %vm1483_vm2, %v1534_v10, %v1535_v30  ;;  %v1541_v51 = vsel %vm1483_vm2, %v1539_v59, %v1540_v28  ;;  %v1543_v17 = vsel %vm1483_vm2, %v1540_v28, %v1542_v46  ;;  %v427_v55 = vadd.f32 %v4136_v49, %v367_v31 }
  0xf0   : > { %v5149_v2 = vmul.f32 %v785_v5, %v478_v44  ;;  %v5151_v16 = vmul.f32 %v780_v38, %v477_v32  ;;  %v1004_v11 = vsel %vm926_vm1, %v1002_v21, %v1003_v35  ;;  %v1006_v42 = vsel %vm926_vm1, %v1003_v35, %v1005_v41 }
  0xf1   : > { %v480_v25 = vmax.f32 %v5093_v40, 0.0  ;;  %v5156_v60 = vpack.c.bf16 %v1006_v42, %v1004_v11  ;;  %v5158_v62 = vpack.c.bf16 %v1538_v54, %v1536_v22  ;;  %v1547_v30 = vrot.slane %v4999_v23, 2 }
  0xf2   : > { %v2064_v10 = vrot.slane %v5149_v2, 1  ;;  %v2063_v31 = vrot.slane %v5151_v16, 1  ;;  %v5163_v44 = vpack.c.bf16 %v1543_v17, %v1541_v51  ;;  %v1552_v32 = vrot.slane %v5031_v47, 2  ;;  %v795_v28 = vpop.permute.xlu1 %794  ;;  %v790_v59 = vpop.permute.xlu0 %789 }
  0xf3   : > { %v1550_v46 = vrot.slane %v5035_v6, 2  ;;  %3581 = vmatmul.mubr.msk.bf16.gmra.mrb[28].mxu1 %vm1057_vm3, %v5156_v60  ;;  %3739 = vmatmul.mubr.msk.bf16.gmra.mrb[16].mxu0 %vm1057_vm3, %v5158_v62  ;;  %v482_v40 = vmax.f32 %v428_v18, 0.0  ;;  %v481_v23 = vmax.f32 %v427_v55, 0.0  ;;  %v1545_v54 = vrot.slane %v4963_v48, 2 }
  0xf4   : > { %v1544_v49 = vrot.slane %v4967_v3, 2  ;;  %v857_v21 = vmul.f32 %v790_v59, %v479_v14  ;;  %v5660_v47 = vpack.c.bf16 %v4434_v45, %v4429_v36  ;;  %3742 = vmatprep.mubr.msk.bf16.mxu0 %vm1057_vm3, %v5163_v44  ;;  %v2065_v6 = vsel %vm926_vm1, %v2063_v31, %v2064_v10 }
  0xf5   : > { %v1549_v41 = vrot.slane %v5017_v56, 2  ;;  %v1548_v18 = vsel %vm1483_vm2, %v1545_v54, %v1547_v30  ;;  %v5182_v5 = vmul.f32 %v795_v28, %v480_v25  ;;  %v1553_v36 = vsel %vm1483_vm2, %v1550_v46, %v1552_v32  ;;  %v3291_v30 = vld [vmem:[%s5591_s4 + $0x6] sm:$0x3] }
  0xf6   : > { %3586 = vmatprep.mubr.msk.bf16.mxu1 %vm1057_vm3, %v5660_v47  ;;  %v2066_v35 = vrot.slane %v857_v21, 1  ;;  %v805_v48 = vpop.permute.xlu1 %804  ;;  %v800_v3 = vpop.permute.xlu0 %799  ;;  %v1546_v51 = vsel %vm1483_vm2, %v1544_v49, %v1545_v54  ;;  %v1663_v56 = vsel %vm1106_vm0, %v4500_v39, 0  ;;  %v1557_v11 = vrot.slane %v5100_v53, 2  ;;  %v5661_v47 = vld [vmem:[#allocation6_spill] sm:$0xff] }
  0xf7   : > { %v1551_v14 = vsel %vm1483_vm2, %v1549_v41, %v1550_v46  ;;  %v5187_v38 = vmul.f32 %v805_v48, %v482_v40  ;;  %v5189_v22 = vmul.f32 %v800_v3, %v481_v23  ;;  %v5194_v17 = vpack.c.bf16 %v1548_v18, %v1546_v51  ;;  %v5662_v18 = vld [vmem:[#allocation8_spill] sm:$0xff]  ;;  %v5663_v3 = vld [vmem:[#allocation10_spill] sm:$0xff] }
  0xf8   : > { %v2067_v45 = vsel %vm926_vm1, %v2064_v10, %v2066_v35  ;;  %v5200_v25 = vpack.c.bf16 %v1553_v36, %v1551_v14  ;;  %v1562_v10 = vrot.slane %v5123_v8, 2  ;;  %v1560_v31 = vrot.slane %v5125_v63, 2  ;;  %v5664_v14 = vld [vmem:[#allocation12_spill] sm:$0xff] }
  0xf9   : > { %v5196_v55 = vpack.c.bf16 %v2067_v45, %v2065_v6  ;;  %v2898_v42 = vrot.slane %v5187_v38, 2  ;;  %v2895_v39 = vrot.slane %v5182_v5, 2  ;;  %v2896_v32 = vrot.slane %v5189_v22, 2  ;;  %v5665_v45 = vld [vmem:[#allocation14_spill] sm:$0xff]  ;;  %v3376_v51 = vld [vmem:[%s5591_s4 + $0x10] sm:$0x3] }
  0xfa   : > { %v1555_v53 = vrot.slane %v5062_v0, 2  ;;  %v1554_v46 = vrot.slane %v5066_v58, 2  ;;  %v1559_v8 = vrot.slane %v5110_v33, 2  ;;  %v1563_v33 = vsel %vm1483_vm2, %v1560_v31, %v1562_v10 }
  0xfb   : > { %3587 = vmatmul.mubr.msk.bf16.vlgmr.msra.gmra.mrb[0].mxu1 %vm1057_vm3, %v4469_v12  ;;  %3743 = vmatmul.mubr.msk.bf16.gmra.mrb[20].mxu0 %vm1057_vm3, %v5194_v17  ;;  %v5222_v63 = vsel %vm1483_vm2, %v2895_v39, %v2896_v32  ;;  %v5225_v28 = vsel %vm1483_vm2, %v2896_v32, %v2898_v42  ;;  %v2275_v54 = vrot.slane %v857_v21, 2  ;;  %v2273_v6 = vrot.slane %v5149_v2, 2  ;;  %v5671_v39 = vld [vmem:[#allocation20_spill] sm:$0xff]  ;;  %v4137_v32 = vld [vmem:[%s5591_s4 + $0x8] sm:$0x3] }
  0xfc   : > { %3619 = vmatpush3.bf16.msra.mxu1 %v1663_v56  ;;  %3590 = vmatprep.mubr.msk.bf16.mxu1 %vm1057_vm3, %v4492_v34  ;;  %v1558_v0 = vsel %vm1483_vm2, %v1555_v53, %v1557_v11  ;;  %v2902_v58 = vpack.c.bf16 %v5225_v28, %v5222_v63  ;;  %v1561_v59 = vsel %vm1483_vm2, %v1559_v8, %v1560_v31  ;;  %v2272_v41 = vrot.slane %v5151_v16, 2  ;;  %v5666_v56 = vld [vmem:[#allocation16_spill] sm:$0xff]  ;;  %v5668_v11 = vld [vmem:[#allocation3_spill] sm:$0xff]  ;;  %v5670_v31 = vld [vmem:[#allocation18_spill] sm:$0xff] }
  0xfd   : > { %3746 = vmatprep.mubr.msk.bf16.mxu0 %vm1057_vm3, %v5200_v25  ;;  %4117 = vmatprep.subr.msk.bf16.mxu1 %vm1106_vm0, %v3291_v30  ;;  %v1556_v40 = vsel %vm1483_vm2, %v1554_v46, %v1555_v53  ;;  %v5235_v49 = vpack.c.bf16 %v1563_v33, %v1561_v59  ;;  %v2276_v21 = vsel %vm1483_vm2, %v2273_v6, %v2275_v54  ;;  %v2700_v36 = vsel %vm1106_vm0, %v4924_v19, 0  ;;  %v5667_v19 = vld [vmem:[#allocation4_spill] sm:$0xff]  ;;  %v5672_v53 = vld [vmem:[#allocation21_spill] sm:$0xff]  ;;  %v5674_v8 = vld [vmem:[#allocation7_spill] sm:$0xff] }
  0xfe   : > { %v5233_v23 = vpack.c.bf16 %v1558_v0, %v1556_v40  ;;  %v2274_v35 = vsel %vm1483_vm2, %v2272_v41, %v2273_v6  ;;  %v5669_v42 = vpack.c.bf16 %v5667_v19, %v5668_v11  ;;  %v1865_v10 = vsel %vm1106_vm0, %v3291_v30, 0  ;;  %v5675_v0 = vld [vmem:[#allocation9_spill] sm:$0xff]  ;;  %v5676_v59 = vld [vmem:[#allocation11_spill] sm:$0xff]  ;;  %v5681_v41 = vld [vmem:[#allocation22_spill] sm:$0xff] }
  0xff   : > { %v5249_v48 = vpack.c.bf16 %v2276_v21, %v2274_v35  ;;  %v5322_v30 = vpack.c.bf16 %v5149_v2, %v5151_v16  ;;  %v2481_v46 = vpack.c.bf16 %v5189_v22, %v5182_v5  ;;  %v5673_v2 = vld [vmem:[#allocation5_spill] sm:$0xff]  ;;  %v2909_v16 = vsel %vm1106_vm0, %v3376_v51, 0  ;;  %v5678_v40 = vld [vmem:[#allocation15_spill] sm:$0xff]  ;;  %v5682_v21 = vld [vmem:[#allocation2_spill] sm:$0xff] }
 0x100   : > { %v5677_v33 = vld [vmem:[#allocation13_spill] sm:$0xff]  ;;  %v5680_v6 = vld [vmem:[#allocation19_spill] sm:$0xff]  ;;  %v2689_v35 = vrot.slane %v5187_v38, 1 }
 0x101   : > { %v5679_v54 = vld [vmem:[#allocation17_spill] sm:$0xff] }
 0x103   : > { %3591 = vmatmul.mubr.msk.bf16.gmra.mrb[4].mxu1 %vm1057_vm3, %v5661_v47  ;;  %3747 = vmatmul.mubr.msk.bf16.gmra.mrb[24].mxu0 %vm1057_vm3, %v5233_v23 }
 0x104   : > { %3594 = vmatprep.mubr.msk.bf16.mxu1 %vm1057_vm3, %v5662_v18  ;;  %3750 = vmatprep.mubr.msk.bf16.mxu0 %vm1057_vm3, %v5235_v49 }
 0x10b   : > { %3595 = vmatmul.mubr.msk.bf16.gmra.mrb[8].mxu1 %vm1057_vm3, %v5663_v3  ;;  %3751 = vmatmul.mubr.msk.bf16.gmra.mrb[28].mxu0 %vm1057_vm3, %v5249_v48 }
 0x10c   : > { %3598 = vmatprep.mubr.msk.bf16.mxu1 %vm1057_vm3, %v5664_v14  ;;  %3756 = vmatprep.mubr.msk.bf16.mxu0 %vm1057_vm3, %v4492_v34 }
 0x113   : > { %3599 = vmatmul.mubr.msk.bf16.gmra.mrb[12].mxu1 %vm1057_vm3, %v5665_v45  ;;  %3757 = vmatmul.mubr.msk.bf16.vlgmr.msra.gmra.mrb[0].mxu0 %vm1057_vm3, %v5661_v47 }
 0x114   : > { %3602 = vmatprep.mubr.msk.bf16.mxu1 %vm1057_vm3, %v5666_v56  ;;  %3760 = vmatprep.mubr.msk.bf16.mxu0 %vm1057_vm3, %v5662_v18 }
 0x115   : > { %3789 = vmatpush3.bf16.msra.mxu0 %v2700_v36 }
 0x116   : > { %4123 = vmatprep.subr.msk.bf16.mxu0 %vm1106_vm0, %v3376_v51 }
 0x11b   : > { %3603 = vmatmul.mubr.msk.bf16.gmra.mrb[16].mxu1 %vm1057_vm3, %v4846_v50  ;;  %3761 = vmatmul.mubr.msk.bf16.gmra.mrb[4].mxu0 %vm1057_vm3, %v5663_v3 }
 0x11c   : > { %3606 = vmatprep.mubr.msk.bf16.mxu1 %vm1057_vm3, %v4880_v15  ;;  %3764 = vmatprep.mubr.msk.bf16.mxu0 %vm1057_vm3, %v5664_v14 }
 0x123   : > { %3607 = vmatmul.mubr.msk.bf16.gmra.mrb[20].mxu1 %vm1057_vm3, %v4949_v24  ;;  %3765 = vmatmul.mubr.msk.bf16.gmra.mrb[8].mxu0 %vm1057_vm3, %v5665_v45 }
 0x124   : > { %3610 = vmatprep.mubr.msk.bf16.mxu1 %vm1057_vm3, %v4982_v37  ;;  %3768 = vmatprep.mubr.msk.bf16.mxu0 %vm1057_vm3, %v5666_v56 }
 0x12b   : > { %3611 = vmatmul.mubr.msk.bf16.gmra.mrb[24].mxu1 %vm1057_vm3, %v5049_v61  ;;  %3769 = vmatmul.mubr.msk.bf16.gmra.mrb[12].mxu0 %vm1057_vm3, %v4846_v50 }
 0x12c   : > { %3614 = vmatprep.mubr.msk.bf16.mxu1 %vm1057_vm3, %v5082_v57  ;;  %3772 = vmatprep.mubr.msk.bf16.mxu0 %vm1057_vm3, %v4880_v15 }
 0x133   : > { %3615 = vmatmul.mubr.msk.bf16.gmra.mrb[28].mxu1 %vm1057_vm3, %v5141_v1  ;;  %3773 = vmatmul.mubr.msk.bf16.gmra.mrb[16].mxu0 %vm1057_vm3, %v4949_v24 }
 0x134   : > { %3620 = vmatprep.mubr.msk.bf16.mxu1 %vm1057_vm3, %v5669_v42  ;;  %3776 = vmatprep.mubr.msk.bf16.mxu0 %vm1057_vm3, %v4982_v37 }
 0x13b   : > { %3621 = vmatmul.mubr.msk.bf16.vlgmr.msra.gmra.mrb[0].mxu1 %vm1057_vm3, %v5670_v31  ;;  %3777 = vmatmul.mubr.msk.bf16.gmra.mrb[20].mxu0 %vm1057_vm3, %v5049_v61 }
 0x13c   : > { %3653 = vmatpush3.bf16.msra.mxu1 %v1865_v10  ;;  %3624 = vmatprep.mubr.msk.bf16.mxu1 %vm1057_vm3, %v5671_v39 }
 0x13d   : > { %3780 = vmatprep.mubr.msk.bf16.mxu0 %vm1057_vm3, %v5082_v57  ;;  %4119 = vmatprep.subr.msk.bf16.mxu1 %vm1106_vm0, %v4137_v32 }
 0x143   : > { %3625 = vmatmul.mubr.msk.bf16.gmra.mrb[4].mxu1 %vm1057_vm3, %v5672_v53  ;;  %3781 = vmatmul.mubr.msk.bf16.gmra.mrb[24].mxu0 %vm1057_vm3, %v5141_v1 }
 0x144   : > { %3628 = vmatprep.mubr.msk.bf16.mxu1 %vm1057_vm3, %v4975_v7  ;;  %3784 = vmatprep.mubr.msk.bf16.mxu0 %vm1057_vm3, %v5322_v30 }
 0x14b   : > { %3629 = vmatmul.mubr.msk.bf16.gmra.mrb[8].mxu1 %vm1057_vm3, %v4984_v52  ;;  %3785 = vmatmul.mubr.msk.bf16.gmra.mrb[28].mxu0 %vm1057_vm3, %v2481_v46 }
 0x14c   : > { %3632 = vmatprep.mubr.msk.bf16.mxu1 %vm1057_vm3, %v5041_v13  ;;  %3790 = vmatprep.mubr.msk.bf16.mxu0 %vm1057_vm3, %v5673_v2 }
 0x153   : > { %3633 = vmatmul.mubr.msk.bf16.gmra.mrb[12].mxu1 %vm1057_vm3, %v5043_v20  ;;  %3791 = vmatmul.mubr.msk.bf16.vlgmr.msra.gmra.mrb[0].mxu0 %vm1057_vm3, %v5674_v8 }
 0x154   : > { %3636 = vmatprep.mubr.msk.bf16.mxu1 %vm1057_vm3, %v5104_v26  ;;  %3794 = vmatprep.mubr.msk.bf16.mxu0 %vm1057_vm3, %v5675_v0 }
 0x155   : > { %3823 = vmatpush3.bf16.msra.mxu0 %v2909_v16 }
 0x15b   : > { %3637 = vmatmul.mubr.msk.bf16.gmra.mrb[16].mxu1 %vm1057_vm3, %v5113_v9  ;;  %3795 = vmatmul.mubr.msk.bf16.gmra.mrb[4].mxu0 %vm1057_vm3, %v5676_v59 }
 0x15c   : > { %3640 = vmatprep.mubr.msk.bf16.mxu1 %vm1057_vm3, %v5158_v62  ;;  %3798 = vmatprep.mubr.msk.bf16.mxu0 %vm1057_vm3, %v5677_v33 }
 0x163   : > { %3641 = vmatmul.mubr.msk.bf16.gmra.mrb[20].mxu1 %vm1057_vm3, %v5163_v44  ;;  %3799 = vmatmul.mubr.msk.bf16.gmra.mrb[8].mxu0 %vm1057_vm3, %v5678_v40 }
 0x164   : > { %3644 = vmatprep.mubr.msk.bf16.mxu1 %vm1057_vm3, %v5194_v17  ;;  %3802 = vmatprep.mubr.msk.bf16.mxu0 %vm1057_vm3, %v5679_v54 }
 0x16b   : > { %3645 = vmatmul.mubr.msk.bf16.gmra.mrb[24].mxu1 %vm1057_vm3, %v5200_v25  ;;  %3803 = vmatmul.mubr.msk.bf16.gmra.mrb[12].mxu0 %vm1057_vm3, %v5680_v6 }
 0x16c   : > { %3648 = vmatprep.mubr.msk.bf16.mxu1 %vm1057_vm3, %v5233_v23  ;;  %3806 = vmatprep.mubr.msk.bf16.mxu0 %vm1057_vm3, %v5681_v41 }
 0x173   : > { %3649 = vmatmul.mubr.msk.bf16.gmra.mrb[28].mxu1 %vm1057_vm3, %v5235_v49  ;;  %3807 = vmatmul.mubr.msk.bf16.gmra.mrb[16].mxu0 %vm1057_vm3, %v4973_v43 }
 0x174   : > { %3654 = vmatprep.mubr.msk.bf16.mxu1 %vm1057_vm3, %v4469_v12  ;;  %3810 = vmatprep.mubr.msk.bf16.mxu0 %vm1057_vm3, %v5039_v27  ;;  %v2687_v12 = vrot.slane %v5189_v22, 1 }
 0x176   : > { %v2690_v38 = vsel %vm926_vm1, %v2687_v12, %v2689_v35 }
 0x17b   : > { %3655 = vmatmul.mubr.msk.bf16.vlgmr.msra.gmra.mrb[0].mxu1 %vm1057_vm3, %v4492_v34  ;;  %3811 = vmatmul.mubr.msk.bf16.gmra.mrb[20].mxu0 %vm1057_vm3, %v5073_v4  ;;  %v2686_v34 = vrot.slane %v5182_v5, 1 }
 0x17c   : > { %3857 = vmatpush3.bf16.msra.mxu1 %v5682_v21  ;;  %3658 = vmatprep.mubr.msk.bf16.mxu1 %vm1057_vm3, %v5661_v47 }
 0x17d   : > { %3814 = vmatprep.mubr.msk.bf16.mxu0 %vm1057_vm3, %v5132_v29  ;;  %v2688_v47 = vsel %vm926_vm1, %v2686_v34, %v2687_v12 }
 0x17e   : > { %v2693_v36 = vpack.c.bf16 %v2690_v38, %v2688_v47 }
 0x183   : > { %3659 = vmatmul.mubr.msk.bf16.gmra.mrb[4].mxu1 %vm1057_vm3, %v5662_v18  ;;  %3815 = vmatmul.mubr.msk.bf16.gmra.mrb[24].mxu0 %vm1057_vm3, %v5156_v60 }
 0x184   : > { %3662 = vmatprep.mubr.msk.bf16.mxu1 %vm1057_vm3, %v5663_v3  ;;  %3818 = vmatprep.mubr.msk.bf16.mxu0 %vm1057_vm3, %v5196_v55 }
 0x18b   : > { %3663 = vmatmul.mubr.msk.bf16.gmra.mrb[8].mxu1 %vm1057_vm3, %v5664_v14  ;;  %3819 = vmatmul.mubr.msk.bf16.gmra.mrb[28].mxu0 %vm1057_vm3, %v2693_v36 }
 0x18c   : > { %3666 = vmatprep.mubr.msk.bf16.mxu1 %vm1057_vm3, %v5665_v45  ;;  %3824 = vmatprep.mubr.msk.bf16.mxu0 %vm1057_vm3, %v5671_v39 }
 0x193   : > { %3667 = vmatmul.mubr.msk.bf16.gmra.mrb[12].mxu1 %vm1057_vm3, %v5666_v56  ;;  %3825 = vmatmul.mubr.msk.bf16.vlgmr.msra.gmra.mrb[0].mxu0 %vm1057_vm3, %v5672_v53 }
 0x194   : > { %3670 = vmatprep.mubr.msk.bf16.mxu1 %vm1057_vm3, %v4846_v50  ;;  %3828 = vmatprep.mubr.msk.bf16.mxu0 %vm1057_vm3, %v4975_v7 }
 0x19b   : > { %3671 = vmatmul.mubr.msk.bf16.gmra.mrb[16].mxu1 %vm1057_vm3, %v4880_v15  ;;  %3829 = vmatmul.mubr.msk.bf16.gmra.mrb[4].mxu0 %vm1057_vm3, %v4984_v52 }
 0x19c   : > { %3674 = vmatprep.mubr.msk.bf16.mxu1 %vm1057_vm3, %v4949_v24  ;;  %3832 = vmatprep.mubr.msk.bf16.mxu0 %vm1057_vm3, %v5041_v13 }
 0x1a3   : > { %3675 = vmatmul.mubr.msk.bf16.gmra.mrb[20].mxu1 %vm1057_vm3, %v4982_v37  ;;  %3833 = vmatmul.mubr.msk.bf16.gmra.mrb[8].mxu0 %vm1057_vm3, %v5043_v20 }
 0x1a4   : > { %3678 = vmatprep.mubr.msk.bf16.mxu1 %vm1057_vm3, %v5049_v61  ;;  %3836 = vmatprep.mubr.msk.bf16.mxu0 %vm1057_vm3, %v5104_v26 }
 0x1ab   : > { %3679 = vmatmul.mubr.msk.bf16.gmra.mrb[24].mxu1 %vm1057_vm3, %v5082_v57  ;;  %3837 = vmatmul.mubr.msk.bf16.gmra.mrb[12].mxu0 %vm1057_vm3, %v5113_v9  ;;  %v5481_v9 = vld [vmem:[%s5592_s5] ss:$0 sm:$0xff] }
 0x1ac   : > { %3682 = vmatprep.mubr.msk.bf16.mxu1 %vm1057_vm3, %v5141_v1  ;;  %3840 = vmatprep.mubr.msk.bf16.mxu0 %vm1057_vm3, %v5158_v62 }
 0x1b3   : > { %3683 = vmatmul.mubr.msk.bf16.gmra.mrb[28].mxu1 %vm1057_vm3, %v5322_v30  ;;  %3841 = vmatmul.mubr.msk.bf16.gmra.mrb[16].mxu0 %vm1057_vm3, %v5163_v44 }
 0x1b4   : > { %3704 = vmatprep.mubr.msk.bf16.mxu1 %vm1057_vm3, %v5680_v6  ;;  %3844 = vmatprep.mubr.msk.bf16.mxu0 %vm1057_vm3, %v5194_v17 }
 0x1bb   : > { %3705 = vmatmul.mubr.msk.bf16.vlgmr.msra.gmra.mrb[16].mxu1 %vm1057_vm3, %v5681_v41  ;;  %3845 = vmatmul.mubr.msk.bf16.gmra.mrb[20].mxu0 %vm1057_vm3, %v5200_v25 }
 0x1bc   : > { %3708 = vmatprep.mubr.msk.bf16.mxu1 %vm1057_vm3, %v4973_v43  ;;  %3848 = vmatprep.mubr.msk.bf16.mxu0 %vm1057_vm3, %v5233_v23 }
 0x1c3   : > { %3709 = vmatmul.mubr.msk.bf16.gmra.mrb[20].mxu1 %vm1057_vm3, %v5039_v27  ;;  %3849 = vmatmul.mubr.msk.bf16.gmra.mrb[24].mxu0 %vm1057_vm3, %v5235_v49 }
 0x1c4   : > { %3712 = vmatprep.mubr.msk.bf16.mxu1 %vm1057_vm3, %v5073_v4  ;;  %3852 = vmatprep.mubr.msk.bf16.mxu0 %vm1057_vm3, %v5249_v48 }
 0x1cb   : > { %3713 = vmatmul.mubr.msk.bf16.gmra.mrb[24].mxu1 %vm1057_vm3, %v5132_v29  ;;  %3853 = vmatmul.mubr.msk.bf16.gmra.mrb[28].mxu0 %vm1057_vm3, %v2902_v58 }
 0x1cc   : > { %3716 = vmatprep.mubr.msk.bf16.mxu1 %vm1057_vm3, %v5156_v60 }
 0x1d3   : > { %3717 = vmatmul.mubr.msk.bf16.gmra.mrb[28].mxu1 %vm1057_vm3, %v5196_v55 }
 0x24e   : > { %v3656_v50 = vpop.f32.mrb[0].mxu1 }
 0x24f   : > { %v1901_v15 = vpop.f32.mrb[1].mxu1 }
 0x250   : > { %v3657_v24 = vpop.f32.mrb[2].mxu1 }
 0x251   : > { %v1904_v43 = vpop.f32.mrb[3].mxu1 }
 0x256   : > { %v3660_v7 = vpop.f32.mrb[4].mxu1 }
 0x257   : > { %v1917_v37 = vpop.f32.mrb[5].mxu1 }
 0x258   : > { %v3661_v52 = vpop.f32.mrb[6].mxu1 }
 0x259   : > { %v1920_v27 = vpop.f32.mrb[7].mxu1 }
 0x25e   : > { %v3664_v13 = vpop.f32.mrb[8].mxu1 }
 0x25f   : > { %v1933_v20 = vpop.f32.mrb[9].mxu1 }
 0x260   : > { %v3665_v61 = vpop.f32.mrb[10].mxu1 }
 0x261   : > { %v1936_v4 = vpop.f32.mrb[11].mxu1 }
 0x266   : > { %v3668_v57 = vpop.f32.mrb[12].mxu1  ;;  %v3826_v26 = vpop.f32.mrb[0].mxu0 }
 0x267   : > { %v3858_v29 = vadd.f32 %v3826_v26, %v3656_v50  ;;  %v1949_v1 = vpop.f32.mrb[13].mxu1  ;;  %v2945_v60 = vpop.f32.mrb[1].mxu0 }
 0x268   : > { %v3859_v62 = vadd.f32 %v2945_v60, %v1901_v15  ;;  %v3669_v44 = vpop.f32.mrb[14].mxu1  ;;  %v3827_v5 = vpop.f32.mrb[2].mxu0 }
 0x269   : > { %v3113_v22 = vadd.f32 %v3858_v29, %v5481_v9  ;;  %v3860_v17 = vadd.f32 %v3827_v5, %v3657_v24  ;;  %v1952_v55 = vpop.f32.mrb[15].mxu1  ;;  %v2948_v25 = vpop.f32.mrb[3].mxu0 }
 0x26a   : > { %v3111_v63 = vadd.f32 %v3859_v62, %v5481_v9  ;;  %v3861_v28 = vadd.f32 %v2948_v25, %v1904_v43 }
 0x26b   : > { %3146 = vst.msk [vmem:[%s5486_s10 + $0x10] sm:$0xff] %vm3143_vm4, %v3113_v22  ;;  %v3114_v58 = vadd.f32 %v3860_v17, %v5481_v9 }
 0x26c   : > { %3144 = vst.msk [vmem:[%s5486_s10] sm:$0xff] %vm3143_vm4, %v3111_v63  ;;  %v3112_v23 = vadd.f32 %v3861_v28, %v5481_v9 }
 0x26d   : > { %3147 = vst.msk [vmem:[%s5486_s10 + $0x18] sm:$0xff] %vm3143_vm4, %v3114_v58 }
 0x26e   : > { %3145 = vst.msk [vmem:[%s5486_s10 + $0x8] sm:$0xff] %vm3143_vm4, %v3112_v23  ;;  %v3830_v49 = vpop.f32.mrb[4].mxu0 }
 0x26f   : > { %v3862_v18 = vadd.f32 %v3830_v49, %v3660_v7  ;;  %v2961_v48 = vpop.f32.mrb[5].mxu0 }
 0x270   : > { %v3863_v3 = vadd.f32 %v2961_v48, %v1917_v37  ;;  %v3831_v14 = vpop.f32.mrb[6].mxu0 }
 0x271   : > { %v3117_v45 = vadd.f32 %v3862_v18, %v5481_v9  ;;  %v3864_v51 = vadd.f32 %v3831_v14, %v3661_v52  ;;  %v2964_v56 = vpop.f32.mrb[7].mxu0 }
 0x272   : > { %v3115_v19 = vadd.f32 %v3863_v3, %v5481_v9  ;;  %v3865_v11 = vadd.f32 %v2964_v56, %v1920_v27 }
 0x273   : > { %3150 = vst.msk [vmem:[%s5486_s10 + $0x30] sm:$0xff] %vm3143_vm4, %v3117_v45  ;;  %v3118_v42 = vadd.f32 %v3864_v51, %v5481_v9 }
 0x274   : > { %3148 = vst.msk [vmem:[%s5486_s10 + $0x20] sm:$0xff] %vm3143_vm4, %v3115_v19  ;;  %v3116_v10 = vadd.f32 %v3865_v11, %v5481_v9 }
 0x275   : > { %3151 = vst.msk [vmem:[%s5486_s10 + $0x38] sm:$0xff] %vm3143_vm4, %v3118_v42 }
 0x276   : > { %3149 = vst.msk [vmem:[%s5486_s10 + $0x28] sm:$0xff] %vm3143_vm4, %v3116_v10  ;;  %v3834_v31 = vpop.f32.mrb[8].mxu0 }
 0x277   : > { %v3866_v39 = vadd.f32 %v3834_v31, %v3664_v13  ;;  %v2977_v32 = vpop.f32.mrb[9].mxu0 }
 0x278   : > { %v3867_v30 = vadd.f32 %v2977_v32, %v1933_v20  ;;  %v3835_v53 = vpop.f32.mrb[10].mxu0 }
 0x279   : > { %v3121_v46 = vadd.f32 %v3866_v39, %v5481_v9  ;;  %v3868_v2 = vadd.f32 %v3835_v53, %v3665_v61  ;;  %v2980_v16 = vpop.f32.mrb[11].mxu0 }
 0x27a   : > { %v3119_v8 = vadd.f32 %v3867_v30, %v5481_v9  ;;  %v3869_v0 = vadd.f32 %v2980_v16, %v1936_v4 }
 0x27b   : > { %3154 = vst.msk [vmem:[%s5486_s10 + $0x50] sm:$0xff] %vm3143_vm4, %v3121_v46  ;;  %v3122_v59 = vadd.f32 %v3868_v2, %v5481_v9 }
 0x27c   : > { %3152 = vst.msk [vmem:[%s5486_s10 + $0x40] sm:$0xff] %vm3143_vm4, %v3119_v8  ;;  %v3120_v33 = vadd.f32 %v3869_v0, %v5481_v9 }
 0x27d   : > { %3155 = vst.msk [vmem:[%s5486_s10 + $0x58] sm:$0xff] %vm3143_vm4, %v3122_v59 }
 0x27e   : > { %3153 = vst.msk [vmem:[%s5486_s10 + $0x48] sm:$0xff] %vm3143_vm4, %v3120_v33  ;;  %v3838_v40 = vpop.f32.mrb[12].mxu0 }
 0x27f   : > { %v3870_v54 = vadd.f32 %v3838_v40, %v3668_v57  ;;  %v2993_v6 = vpop.f32.mrb[13].mxu0 }
 0x280   : > { %v3871_v41 = vadd.f32 %v2993_v6, %v1949_v1  ;;  %v3839_v21 = vpop.f32.mrb[14].mxu0 }
 0x281   : > { %v3125_v35 = vadd.f32 %v3870_v54, %v5481_v9  ;;  %v3872_v12 = vadd.f32 %v3839_v21, %v3669_v44  ;;  %v2996_v34 = vpop.f32.mrb[15].mxu0 }
 0x282   : > { %v3123_v47 = vadd.f32 %v3871_v41, %v5481_v9  ;;  %v3873_v38 = vadd.f32 %v2996_v34, %v1952_v55 }
 0x283   : > { %3158 = vst.msk [vmem:[%s5486_s10 + $0x70] sm:$0xff] %vm3143_vm4, %v3125_v35  ;;  %v3126_v36 = vadd.f32 %v3872_v12, %v5481_v9 }
 0x284   : > { %3156 = vst.msk [vmem:[%s5486_s10 + $0x60] sm:$0xff] %vm3143_vm4, %v3123_v47  ;;  %v3124_v50 = vadd.f32 %v3873_v38, %v5481_v9 }
 0x285   : > { %3159 = vst.msk [vmem:[%s5486_s10 + $0x78] sm:$0xff] %vm3143_vm4, %v3126_v36 }
 0x286   : > { %3157 = vst.msk [vmem:[%s5486_s10 + $0x68] sm:$0xff] %vm3143_vm4, %v3124_v50  ;;  %v3842_v15 = vpop.f32.mrb[16].mxu0 }
 0x287   : > { %v3009_v24 = vpop.f32.mrb[17].mxu0 }
 0x288   : > { %v3843_v43 = vpop.f32.mrb[18].mxu0 }
 0x289   : > { %v3012_v7 = vpop.f32.mrb[19].mxu0 }
 0x28e   : > { %v3706_v37 = vpop.f32.mrb[16].mxu1  ;;  %v3846_v52 = vpop.f32.mrb[20].mxu0 }
 0x28f   : > { %v3874_v27 = vadd.f32 %v3842_v15, %v3706_v37  ;;  %v2177_v13 = vpop.f32.mrb[17].mxu1  ;;  %v3025_v20 = vpop.f32.mrb[21].mxu0 }
 0x290   : > { %v3875_v61 = vadd.f32 %v3009_v24, %v2177_v13  ;;  %v3707_v4 = vpop.f32.mrb[18].mxu1  ;;  %v3847_v57 = vpop.f32.mrb[22].mxu0 }
 0x291   : > { %v3129_v26 = vadd.f32 %v3874_v27, %v5481_v9  ;;  %v3876_v29 = vadd.f32 %v3843_v43, %v3707_v4  ;;  %v2180_v1 = vpop.f32.mrb[19].mxu1  ;;  %v3028_v60 = vpop.f32.mrb[23].mxu0 }
 0x292   : > { %v3127_v62 = vadd.f32 %v3875_v61, %v5481_v9  ;;  %v3877_v44 = vadd.f32 %v3012_v7, %v2180_v1 }
 0x293   : > { %3162 = vst.msk [vmem:[%s5486_s10 + $0x90] sm:$0xff] %vm3143_vm4, %v3129_v26  ;;  %v3130_v5 = vadd.f32 %v3876_v29, %v5481_v9 }
 0x294   : > { %3160 = vst.msk [vmem:[%s5486_s10 + $0x80] sm:$0xff] %vm3143_vm4, %v3127_v62  ;;  %v3128_v22 = vadd.f32 %v3877_v44, %v5481_v9 }
 0x295   : > { %3163 = vst.msk [vmem:[%s5486_s10 + $0x98] sm:$0xff] %vm3143_vm4, %v3130_v5 }
 0x296   : > { %3161 = vst.msk [vmem:[%s5486_s10 + $0x88] sm:$0xff] %vm3143_vm4, %v3128_v22  ;;  %v3710_v17 = vpop.f32.mrb[20].mxu1  ;;  %v3850_v55 = vpop.f32.mrb[24].mxu0 }
 0x297   : > { %v3878_v25 = vadd.f32 %v3846_v52, %v3710_v17  ;;  %v2193_v63 = vpop.f32.mrb[21].mxu1  ;;  %v3041_v28 = vpop.f32.mrb[25].mxu0 }
 0x298   : > { %v3879_v58 = vadd.f32 %v3025_v20, %v2193_v63  ;;  %v3711_v23 = vpop.f32.mrb[22].mxu1  ;;  %v3851_v49 = vpop.f32.mrb[26].mxu0 }
 0x299   : > { %v3133_v18 = vadd.f32 %v3878_v25, %v5481_v9  ;;  %v3880_v48 = vadd.f32 %v3847_v57, %v3711_v23  ;;  %v2196_v3 = vpop.f32.mrb[23].mxu1  ;;  %v3044_v14 = vpop.f32.mrb[27].mxu0 }
 0x29a   : > { %v3131_v45 = vadd.f32 %v3879_v58, %v5481_v9  ;;  %v3881_v51 = vadd.f32 %v3028_v60, %v2196_v3 }
 0x29b   : > { %3166 = vst.msk [vmem:[%s5486_s10 + $0xb0] sm:$0xff] %vm3143_vm4, %v3133_v18  ;;  %v3134_v56 = vadd.f32 %v3880_v48, %v5481_v9 }
 0x29c   : > { %3164 = vst.msk [vmem:[%s5486_s10 + $0xa0] sm:$0xff] %vm3143_vm4, %v3131_v45  ;;  %v3132_v19 = vadd.f32 %v3881_v51, %v5481_v9 }
 0x29d   : > { %3167 = vst.msk [vmem:[%s5486_s10 + $0xb8] sm:$0xff] %vm3143_vm4, %v3134_v56 }
 0x29e   : > { %3165 = vst.msk [vmem:[%s5486_s10 + $0xa8] sm:$0xff] %vm3143_vm4, %v3132_v19  ;;  %v3714_v11 = vpop.f32.mrb[24].mxu1  ;;  %v3854_v42 = vpop.f32.mrb[28].mxu0 }
 0x29f   : > { %v3882_v10 = vadd.f32 %v3850_v55, %v3714_v11  ;;  %v2209_v31 = vpop.f32.mrb[25].mxu1  ;;  %v3057_v39 = vpop.f32.mrb[29].mxu0 }
 0x2a0   : > { %v3883_v32 = vadd.f32 %v3041_v28, %v2209_v31  ;;  %v3715_v30 = vpop.f32.mrb[26].mxu1  ;;  %v3855_v53 = vpop.f32.mrb[30].mxu0 }
 0x2a1   : > { %v3137_v46 = vadd.f32 %v3882_v10, %v5481_v9  ;;  %v3884_v2 = vadd.f32 %v3851_v49, %v3715_v30  ;;  %v2212_v16 = vpop.f32.mrb[27].mxu1  ;;  %v3060_v8 = vpop.f32.mrb[31].mxu0 }
 0x2a2   : > { %v3135_v0 = vadd.f32 %v3883_v32, %v5481_v9  ;;  %v3885_v59 = vadd.f32 %v3044_v14, %v2212_v16 }
 0x2a3   : > { %3170 = vst.msk [vmem:[%s5486_s10 + $0xd0] sm:$0xff] %vm3143_vm4, %v3137_v46  ;;  %v3138_v33 = vadd.f32 %v3884_v2, %v5481_v9 }
 0x2a4   : > { %3168 = vst.msk [vmem:[%s5486_s10 + $0xc0] sm:$0xff] %vm3143_vm4, %v3135_v0  ;;  %v3136_v40 = vadd.f32 %v3885_v59, %v5481_v9 }
 0x2a5   : > { %3171 = vst.msk [vmem:[%s5486_s10 + $0xd8] sm:$0xff] %vm3143_vm4, %v3138_v33 }
 0x2a6   : > { %3169 = vst.msk [vmem:[%s5486_s10 + $0xc8] sm:$0xff] %vm3143_vm4, %v3136_v40  ;;  %v3718_v54 = vpop.f32.mrb[28].mxu1 }
 0x2a7   : > { %v3886_v6 = vadd.f32 %v3854_v42, %v3718_v54  ;;  %v2225_v41 = vpop.f32.mrb[29].mxu1 }
 0x2a8   : > { %v3887_v21 = vadd.f32 %v3057_v39, %v2225_v41  ;;  %v3719_v35 = vpop.f32.mrb[30].mxu1 }
 0x2a9   : > { %v3141_v12 = vadd.f32 %v3886_v6, %v5481_v9  ;;  %v3888_v34 = vadd.f32 %v3855_v53, %v3719_v35  ;;  %v2228_v47 = vpop.f32.mrb[31].mxu1 }
 0x2aa   : > { %v3139_v38 = vadd.f32 %v3887_v21, %v5481_v9  ;;  %v3889_v36 = vadd.f32 %v3060_v8, %v2228_v47 }
 0x2ab   : > { %3174 = vst.msk [vmem:[%s5486_s10 + $0xf0] sm:$0xff] %vm3143_vm4, %v3141_v12  ;;  %v3142_v50 = vadd.f32 %v3888_v34, %v5481_v9 }
 0x2ac   : > { %3172 = vst.msk [vmem:[%s5486_s10 + $0xe0] sm:$0xff] %vm3143_vm4, %v3139_v38  ;;  %v3140_v15 = vadd.f32 %v3889_v36, %v5481_v9 }
 0x2ad   : > { %3175 = vst.msk [vmem:[%s5486_s10 + $0xf8] sm:$0xff] %vm3143_vm4, %v3142_v50 }
 0x2ae   : > { %3173 = vst.msk [vmem:[%s5486_s10 + $0xe8] sm:$0xff] %vm3143_vm4, %v3140_v15 }
 0x2af PF: > { %s16_s21 = sadd.s32 1, %s4144_s21  }
 0x2b0   : > { %p13_p4 = scmp.ge.s32.totalorder %s16_s21, 4  }
 0x2b2   :  { %15 = sbr.rel (!%p13_p4) target bundleno = 1 (0x1), region = 82 }

// kernel: dense_block_apply.7
= control target key start
LH: loop header
LB: loop body
LE: loop exit
PB: predicated region body
PF: predicated region fallthrough
CT: control target
= control target key end

     0   :  { %s4261_s21 = smov 0   ;;  %s5670_s0 = inlined_call_operand.vmem [shape: f32[2,18,18,12], index: 0, kind: input, shape index: {}]   ;;  %s5671_s1 = inlined_call_operand.vmem [shape: f32[1,12], index: 1, kind: input, shape index: {}]   ;;  %s5672_s2 = inlined_call_operand.vmem [shape: f32[1,12], index: 2, kind: input, shape index: {}]   ;;  %s5673_s3 = inlined_call_operand.vmem [shape: f32[18,18,1], index: 3, kind: input, shape index: {}]   ;;  %s5674_s4 = inlined_call_operand.vmem [shape: bf16[9,12,8], index: 4, kind: input, shape index: {}]   ;;  %s5675_s5 = inlined_call_operand.vmem [shape: f32[1,8], index: 5, kind: input, shape index: {}]   ;;  %s5676_s6 = inlined_call_operand.vmem [shape: f32[2,16,16,8], index: 6, kind: output, shape index: {}]  }
   0x1 LB: > { %s3284_s22 = sadd.s32 4294967295, %s4223_s21   ;;  %p3288_p0 = scmp.ge.s32.totalorder %s4223_s21, 1  ;;  %s4223_s21 = sphi %s4261_s21, %s16_s21  }
   0x2   : > { %p212_p1 = scmp.lt.s32.totalorder %s4223_s21, 3 }
   0x4   : > { %p213_p2 = pnand %p3288_p0, %p212_p1 }
   0x6   : > { %216 = sbr.rel (%p213_p2) target bundleno = 687 (0x2af), region = 44 }
   0xd   : > { %v485_v0 = vld [vmem:[%s5673_s3 + $0x10] sm:$0x3]  ;;  %v483_v1 = vld [vmem:[%s5673_s3] sm:$0xff]  ;;  %v4225_v2 = vmov 0   ;;  %v486_v3 = vld [vmem:[%s5673_s3 + $0x18] sm:$0xff]  ;;  %vm1113_vm0 = vcmask 1045504  }
   0xe   : > { %4205 = vset.pattern.permute.xlu1 %v4225_v2  ;;  %4204 = vset.pattern.permute.xlu0 %v4225_v2  ;;  %v484_v4 = vld [vmem:[%s5673_s3 + $0x8] sm:$0xff]  ;;  %v487_v6 = vld [vmem:[%s5673_s3 + $0x20] sm:$0xff]  ;;  %v490_v7 = vld [vmem:[%s5673_s3 + $0x38] sm:$0xff]  ;;  %p242_p3 = scmp.lt.s32.totalorder %s3284_s22, 1  ;;  %vm927_vm1 = vcmask 1046528   ;;  %vm1064_vm2 = vcmask 97280  }
   0xf   : > { %549 = vperm.xlu1 %4205, %v485_v0   ;;  %539 = vperm.xlu0 %4204, %v483_v1   ;;  %v488_v5 = vld [vmem:[%s5673_s3 + $0x28] sm:$0x3]  ;;  %v489_v8 = vld [vmem:[%s5673_s3 + $0x30] sm:$0xff]  ;;  %v491_v10 = vld [vmem:[%s5673_s3 + $0x40] sm:$0x3]  ;;  %vm3196_vm3 = vcmask 64512  }
  0x10   : > { %v492_v9 = vld [vmem:[%s5673_s3 + $0x48] sm:$0xff]  ;;  %v494_v11 = vld [vmem:[%s5673_s3 + $0x58] sm:$0x3]  ;;  %v493_v12 = vld [vmem:[%s5673_s3 + $0x50] sm:$0xff]  ;;  %s5767_s22 = smov (!%p242_p3, %s3284_s22), 1 }
  0x11   : > { %v4206_v13 = vld [vmem:[%s5674_s4 + $0x8] sm:$0x3f]   ;;  %v495_v15 = vld [vmem:[%s5673_s3 + $0x60] sm:$0xff]  ;;  %v498_v18 = vld [vmem:[%s5673_s3 + $0x78] sm:$0xff]  ;;  %s4194_s29 = smul.u32 432, %s5767_s22 }
  0x12   : > { %v496_v14 = vld [vmem:[%s5673_s3 + $0x68] sm:$0xff]  ;;  %4184 = vmatprep.subr.msk.bf16.mxu1 %vm1113_vm0, %v4206_v13  ;;  %v4207_v16 = vld [vmem:[%s5674_s4 + $0x20] sm:$0x3f]   ;;  %v1115_v17 = vsel %vm1113_vm0, %v4206_v13, 0  ;;  %v497_v20 = vld [vmem:[%s5673_s3 + $0x70] sm:$0x3] }
  0x13   : > { %554 = vperm.xlu1 %4205, %v486_v3   ;;  %544 = vperm.xlu0 %4204, %v484_v4   ;;  %v4323_v19 = vsel %vm1113_vm0, %v4207_v16, 0  ;;  %v500_v21 = vld [vmem:[%s5673_s3 + $0x88] sm:$0x3]  ;;  %v499_v22 = vld [vmem:[%s5673_s3 + $0x80] sm:$0xff]  ;;  %v502_v23 = vld [vmem:[%s5673_s3 + $0x98] sm:$0xff]  ;;  %s4468_s8 = scalar_lea.vmem %s5670_s0, %s4194_s29  ;;  %s3466_s29 = sshll.u32 %s5767_s22, 8 }
  0x14   : > { %5702 = vst [vmem:[#allocation2_spill] sm:$0xff] %v4323_v19  ;;  %3621 = vmatpush3.bf16.msra.mxu1 %v1115_v17  ;;  %4188 = vmatprep.subr.msk.bf16.mxu0 %vm1113_vm0, %v4207_v16  ;;  %v501_v24 = vld [vmem:[%s5673_s3 + $0x90] sm:$0xff]  ;;  %v504_v25 = vld [vmem:[%s5673_s3 + $0xa8] sm:$0xff]  ;;  %v503_v26 = vld [vmem:[%s5673_s3 + $0xa0] sm:$0x3]  ;;  %s5569_s10 = scalar_lea.vmem %s5676_s6, %s3466_s29 }
  0x15   : > { %3757 = vmatpush3.bf16.msra.mxu0 %v4323_v19  ;;  %v506_v27 = vld [vmem:[%s5673_s3 + $0xb8] sm:$0x3]  ;;  %v505_v28 = vld [vmem:[%s5673_s3 + $0xb0] sm:$0xff]  ;;  %v4357_v29 = vld [vmem:[%s5674_s4] sm:$0x3f]  }
  0x16   : > { %v4362_v30 = vld [vmem:[%s5674_s4 + $0x28] sm:$0x3f]   ;;  %v507_v32 = vld [vmem:[%s5673_s3 + $0xc0] sm:$0xff]  ;;  %4185 = vmatprep.subr.msk.bf16.mxu1 %vm1113_vm0, %v4357_v29  ;;  %v510_v33 = vld [vmem:[%s5673_s3 + $0xd8] sm:$0xff] }
  0x17   : > { %564 = vperm.xlu1 %4205, %v488_v5   ;;  %559 = vperm.xlu0 %4204, %v487_v6   ;;  %v508_v31 = vld [vmem:[%s5673_s3 + $0xc8] sm:$0xff]  ;;  %v509_v34 = vld [vmem:[%s5673_s3 + $0xd0] sm:$0x3]  ;;  %v511_v36 = vld [vmem:[%s5673_s3 + $0xe0] sm:$0xff] }
  0x18   : > { %4190 = vmatprep.subr.msk.bf16.mxu0 %vm1113_vm0, %v4362_v30  ;;  %v512_v35 = vld [vmem:[%s5673_s3 + $0xe8] sm:$0x3]  ;;  %v514_v37 = vld [vmem:[%s5673_s3 + $0xf8] sm:$0xff]  ;;  %v513_v38 = vld [vmem:[%s5673_s3 + $0xf0] sm:$0xff] }
  0x19   : > { %v516_v39 = vld [vmem:[%s5673_s3 + $0x108] sm:$0xff]  ;;  %v515_v40 = vld [vmem:[%s5673_s3 + $0x100] sm:$0x3]  ;;  %v518_v41 = vld [vmem:[%s5673_s3 + $0x118] sm:$0x3] }
  0x1a   : > { %v517_v42 = vld [vmem:[%s5673_s3 + $0x110] sm:$0xff]  ;;  %v520_v43 = vld [vmem:[%s5673_s3 + $0x128] sm:$0xff]  ;;  %v519_v44 = vld [vmem:[%s5673_s3 + $0x120] sm:$0xff] }
  0x1b   : > { %574 = vperm.xlu1 %4205, %v490_v7   ;;  %569 = vperm.xlu0 %4204, %v489_v8   ;;  %v522_v45 = vld [vmem:[%s5673_s3 + $0x138] sm:$0xff]  ;;  %v521_v46 = vld [vmem:[%s5673_s3 + $0x130] sm:$0x3]  ;;  %v524_v47 = vld [vmem:[%s5673_s3 + $0x148] sm:$0x3] }
  0x1c   : > { %v523_v48 = vld [vmem:[%s5673_s3 + $0x140] sm:$0xff]  ;;  %v526_v49 = vld [vmem:[%s5673_s3 + $0x158] sm:$0xff]  ;;  %v525_v50 = vld [vmem:[%s5673_s3 + $0x150] sm:$0xff] }
  0x1d   : > { %v528_v51 = vld [vmem:[%s5673_s3 + $0x168] sm:$0xff]  ;;  %v527_v52 = vld [vmem:[%s5673_s3 + $0x160] sm:$0x3]  ;;  %v530_v53 = vld [vmem:[%s5673_s3 + $0x178] sm:$0x3] }
  0x1e   : > { %v529_v54 = vld [vmem:[%s5673_s3 + $0x170] sm:$0xff]  ;;  %v532_v55 = vld [vmem:[%s5673_s3 + $0x188] sm:$0xff]  ;;  %v531_v56 = vld [vmem:[%s5673_s3 + $0x180] sm:$0xff] }
  0x1f   : > { %584 = vperm.xlu1 %4205, %v492_v9   ;;  %579 = vperm.xlu0 %4204, %v491_v10   ;;  %v534_v57 = vld [vmem:[%s5673_s3 + $0x198] sm:$0xff]  ;;  %v533_v58 = vld [vmem:[%s5673_s3 + $0x190] sm:$0x3]  ;;  %v536_v59 = vld [vmem:[%s5673_s3 + $0x1a8] sm:$0x3] }
  0x20   : > { %v535_v60 = vld [vmem:[%s5673_s3 + $0x1a0] sm:$0xff]  ;;  %v255_v61 = vld [vmem:[%s4468_s8 + $0x10] sm:$0x3]  ;;  %v254_v1 = vld [vmem:[%s4468_s8 + $0x8] sm:$0xff] }
  0x21   : > { %v4474_v62 = vld [vmem:[%s5671_s1] ss:$0 sm:$0xff]  ;;  %v256_v4 = vld [vmem:[%s4468_s8 + $0x18] sm:$0xff]  ;;  %v258_v6 = vld [vmem:[%s4468_s8 + $0x28] sm:$0x3] }
  0x22   : > { %v253_v63 = vld [vmem:[%s4468_s8] sm:$0xff]  ;;  %v317_v0 = vmul.f32 %v4474_v62, %v255_v61  ;;  %v316_v5 = vmul.f32 %v4474_v62, %v254_v1  ;;  %v260_v9 = vld [vmem:[%s4468_s8 + $0x38] sm:$0xff]  ;;  %v320_v13 = vmul.f32 %v4474_v62, %v258_v6 }
  0x23   : > { %594 = vperm.xlu1 %4205, %v494_v11   ;;  %589 = vperm.xlu0 %4204, %v493_v12   ;;  %v4482_v2 = vld [vmem:[%s5672_s2] ss:$0 sm:$0xff]  ;;  %v315_v3 = vmul.f32 %v4474_v62, %v253_v63  ;;  %v318_v11 = vmul.f32 %v4474_v62, %v256_v4  ;;  %v259_v12 = vld [vmem:[%s4468_s8 + $0x30] sm:$0xff]  ;;  %v322_v16 = vmul.f32 %v4474_v62, %v260_v9 }
  0x24   : > { %v257_v7 = vld [vmem:[%s4468_s8 + $0x20] sm:$0xff]  ;;  %v377_v8 = vadd.f32 %v4482_v2, %v317_v0 }
  0x25   : > { %v375_v10 = vadd.f32 %v4482_v2, %v315_v3 }
  0x26   : > { %v431_v17 = vmax.f32 %v377_v8, 0.0 }
  0x27   : > { %604 = vperm.xlu1 %4205, %v496_v14   ;;  %599 = vperm.xlu0 %4204, %v495_v15   ;;  %v319_v14 = vmul.f32 %v4474_v62, %v257_v7  ;;  %v376_v15 = vadd.f32 %v4482_v2, %v316_v5 }
  0x2b   : > { %614 = vperm.xlu1 %4205, %v498_v18   ;;  %609 = vperm.xlu0 %4204, %v497_v20   ;;  %v321_v18 = vmul.f32 %v4474_v62, %v259_v12  ;;  %v429_v20 = vmax.f32 %v375_v10, 0.0 }
  0x2f   : > { %624 = vperm.xlu1 %4205, %v500_v21   ;;  %619 = vperm.xlu0 %4204, %v499_v22   ;;  %v378_v21 = vadd.f32 %v4482_v2, %v318_v11  ;;  %v262_v22 = vld [vmem:[%s4468_s8 + $0x48] sm:$0xff] }
  0x33   : > { %634 = vperm.xlu1 %4205, %v502_v23   ;;  %629 = vperm.xlu0 %4204, %v501_v24  }
  0x37   : > { %644 = vperm.xlu1 %4205, %v504_v25   ;;  %639 = vperm.xlu0 %4204, %v503_v26   ;;  %v380_v25 = vadd.f32 %v4482_v2, %v320_v13  ;;  %v379_v26 = vadd.f32 %v4482_v2, %v319_v14  ;;  %v268_v14 = vld [vmem:[%s4468_s8 + $0x78] sm:$0xff] }
  0x3b   : > { %654 = vperm.xlu1 %4205, %v506_v27   ;;  %649 = vperm.xlu0 %4204, %v505_v28   ;;  %v430_v27 = vmax.f32 %v376_v15, 0.0  ;;  %v382_v28 = vadd.f32 %v4482_v2, %v322_v16 }
  0x3f   : > { %664 = vperm.xlu1 %4205, %v508_v31   ;;  %659 = vperm.xlu0 %4204, %v507_v32   ;;  %v261_v31 = vld [vmem:[%s4468_s8 + $0x40] sm:$0x3] }
  0x43   : > { %674 = vperm.xlu1 %4205, %v510_v33   ;;  %669 = vperm.xlu0 %4204, %v509_v34   ;;  %v381_v33 = vadd.f32 %v4482_v2, %v321_v18  ;;  %v324_v34 = vmul.f32 %v4474_v62, %v262_v22 }
  0x47   : > { %684 = vperm.xlu1 %4205, %v512_v35   ;;  %679 = vperm.xlu0 %4204, %v511_v36   ;;  %v264_v35 = vld [vmem:[%s4468_s8 + $0x58] sm:$0x3]  ;;  %v263_v36 = vld [vmem:[%s4468_s8 + $0x50] sm:$0xff] }
  0x4b   : > { %694 = vperm.xlu1 %4205, %v514_v37   ;;  %689 = vperm.xlu0 %4204, %v513_v38   ;;  %v432_v38 = vmax.f32 %v378_v21, 0.0  ;;  %v267_v21 = vld [vmem:[%s4468_s8 + $0x70] sm:$0x3] }
  0x4f   : > { %704 = vperm.xlu1 %4205, %v516_v39   ;;  %699 = vperm.xlu0 %4204, %v515_v40   ;;  %v266_v39 = vld [vmem:[%s4468_s8 + $0x68] sm:$0xff] }
  0x53   : > { %714 = vperm.xlu1 %4205, %v518_v41   ;;  %709 = vperm.xlu0 %4204, %v517_v42   ;;  %v434_v42 = vmax.f32 %v380_v25, 0.0 }
  0x57   : > { %724 = vperm.xlu1 %4205, %v520_v43   ;;  %719 = vperm.xlu0 %4204, %v519_v44   ;;  %v433_v43 = vmax.f32 %v379_v26, 0.0  ;;  %v323_v44 = vmul.f32 %v4474_v62, %v261_v31 }
  0x59   : > { %v383_v0 = vadd.f32 %v4482_v2, %v323_v44 }
  0x5b   : > { %734 = vperm.xlu1 %4205, %v522_v45   ;;  %729 = vperm.xlu0 %4204, %v521_v46   ;;  %v436_v46 = vmax.f32 %v382_v28, 0.0 }
  0x5f   : > { %744 = vperm.xlu1 %4205, %v524_v47   ;;  %739 = vperm.xlu0 %4204, %v523_v48   ;;  %v326_v47 = vmul.f32 %v4474_v62, %v264_v35  ;;  %v325_v48 = vmul.f32 %v4474_v62, %v263_v36 }
  0x61   : > { %v386_v18 = vadd.f32 %v4482_v2, %v326_v47 }
  0x63   : > { %754 = vperm.xlu1 %4205, %v526_v49   ;;  %749 = vperm.xlu0 %4204, %v525_v50   ;;  %v435_v50 = vmax.f32 %v381_v33, 0.0  ;;  %v1332_v33 = vsel %vm1113_vm0, %v4357_v29, 0 }
  0x67   : > { %764 = vperm.xlu1 %4205, %v528_v51   ;;  %759 = vperm.xlu0 %4204, %v527_v52   ;;  %v4518_v51 = vadd.f32 %v4482_v2, %v324_v34  ;;  %v328_v52 = vmul.f32 %v4474_v62, %v266_v39  ;;  %v4572_v34 = vld [vmem:[%s5674_s4 + $0x10] sm:$0x3f]   ;;  %v329_v39 = vmul.f32 %v4474_v62, %v267_v21 }
  0x69   : > { %v388_v31 = vadd.f32 %v4482_v2, %v328_v52  ;;  %v438_v36 = vmax.f32 %v4518_v51, 0.0 }
  0x6b   : > { %774 = vperm.xlu1 %4205, %v530_v53   ;;  %769 = vperm.xlu0 %4204, %v529_v54   ;;  %v442_v51 = vmax.f32 %v388_v31, 0.0 }
  0x6f   : > { %784 = vperm.xlu1 %4205, %v532_v55   ;;  %779 = vperm.xlu0 %4204, %v531_v56   ;;  %v290_v55 = vld [vmem:[%s4468_s8 + $0x128] sm:$0xff] }
  0x73   : > { %794 = vperm.xlu1 %4205, %v534_v57   ;;  %789 = vperm.xlu0 %4204, %v533_v58   ;;  %v265_v57 = vld [vmem:[%s4468_s8 + $0x60] sm:$0xff] }
  0x74   : > { %v327_v7 = vmul.f32 %v4474_v62, %v265_v57 }
  0x77   : > { %804 = vperm.xlu1 %4205, %v536_v59   ;;  %799 = vperm.xlu0 %4204, %v535_v60  }
  0x8e   : > { %v550_v23 = vpop.permute.xlu1 %549  ;;  %v540_v24 = vpop.permute.xlu0 %539 }
  0x8f   : > { %v809_v32 = vmul.f32 %v550_v23, %v431_v17  ;;  %v4509_v37 = vmul.f32 %v540_v24, %v429_v20  ;;  %v437_v17 = vmax.f32 %v383_v0, 0.0  ;;  %v385_v20 = vadd.f32 %v4482_v2, %v325_v48  ;;  %v269_v48 = vld [vmem:[%s4468_s8 + $0x80] sm:$0xff] }
  0x91   : > { %v931_v49 = vrot.slane %v809_v32, 1  ;;  %v928_v53 = vrot.slane %v4509_v37, 1  ;;  %v1498_v58 = vrot.slane %v809_v32, 2  ;;  %v1495_v59 = vrot.slane %v4509_v37, 2 }
  0x92   : > { %v555_v40 = vpop.permute.xlu1 %554  ;;  %v545_v41 = vpop.permute.xlu0 %544  ;;  %v330_v32 = vmul.f32 %v4474_v62, %v268_v14  ;;  %v439_v47 = vmax.f32 %v385_v20, 0.0 }
  0x93   : > { %v4513_v45 = vmul.f32 %v545_v41, %v430_v27  ;;  %v4522_v54 = vmul.f32 %v555_v40, %v432_v38  ;;  %v270_v27 = vld [vmem:[%s4468_s8 + $0x88] sm:$0x3]  ;;  %v387_v38 = vadd.f32 %v4482_v2, %v327_v7  ;;  %v440_v41 = vmax.f32 %v386_v18, 0.0  ;;  %v4623_v18 = vld [vmem:[%s5674_s4 + $0x30] sm:$0x3f]  }
  0x94   : > { %v4592_v52 = vadd.f32 %v4482_v2, %v330_v32 }
  0x95   : > { %v929_v56 = vrot.slane %v4513_v45, 1  ;;  %v1496_v60 = vrot.slane %v4513_v45, 2  ;;  %v933_v10 = vrot.slane %v4522_v54, 1  ;;  %v441_v57 = vmax.f32 %v387_v38, 0.0  ;;  %v275_v38 = vld [vmem:[%s4468_s8 + $0xb0] sm:$0xff] }
  0x96   : > { %v565_v61 = vpop.permute.xlu1 %564  ;;  %v560_v63 = vpop.permute.xlu0 %559 }
  0x97   : > { %v4531_v1 = vmul.f32 %v565_v61, %v434_v42  ;;  %v4533_v3 = vmul.f32 %v560_v63, %v433_v43  ;;  %v930_v4 = vsel %vm927_vm1, %v928_v53, %v929_v56  ;;  %v932_v5 = vsel %vm927_vm1, %v929_v56, %v931_v49  ;;  %v272_v49 = vld [vmem:[%s4468_s8 + $0x98] sm:$0xff] }
  0x98   : > { %v1040_v6 = vpack.c.bf16 %v932_v5, %v930_v4  ;;  %v4539_v8 = vsel %vm1113_vm0, %v1495_v59, %v1496_v60  ;;  %v4542_v9 = vsel %vm1113_vm0, %v1496_v60, %v1498_v58  ;;  %v332_v42 = vmul.f32 %v4474_v62, %v270_v27  ;;  %v274_v59 = vld [vmem:[%s4468_s8 + $0xa8] sm:$0xff]  ;;  %v273_v60 = vld [vmem:[%s4468_s8 + $0xa0] sm:$0x3]  ;;  %v276_v27 = vld [vmem:[%s4468_s8 + $0xb8] sm:$0x3] }
  0x99   : > { %5703 = vst [vmem:[#allocation3_spill] sm:$0xff] %v4539_v8  ;;  %5704 = vst [vmem:[#allocation4_spill] sm:$0xff] %v4542_v9  ;;  %v936_v11 = vrot.slane %v4531_v1, 1  ;;  %v4548_v12 = vpack.c.bf16 %v4533_v3, %v4522_v54  ;;  %v934_v13 = vrot.slane %v4533_v3, 1  ;;  %v389_v58 = vadd.f32 %v4482_v2, %v329_v39  ;;  %v278_v39 = vld [vmem:[%s4468_s8 + $0xc8] sm:$0xff] }
  0x9a   : > { %v575_v15 = vpop.permute.xlu1 %574  ;;  %v570_v16 = vpop.permute.xlu0 %569  ;;  %3622 = vmatprep.mubr.msk.bf16.mxu1 %vm1064_vm2, %v1040_v6  ;;  %v4603_v0 = vadd.f32 %v4482_v2, %v332_v42  ;;  %v331_v4 = vmul.f32 %v4474_v62, %v269_v48  ;;  %v334_v5 = vmul.f32 %v4474_v62, %v272_v49  ;;  %v338_v49 = vmul.f32 %v4474_v62, %v276_v27 }
  0x9b   : > { %v4558_v23 = vmul.f32 %v575_v15, %v436_v46  ;;  %v4560_v24 = vmul.f32 %v570_v16, %v435_v50  ;;  %v935_v25 = vsel %vm927_vm1, %v933_v10, %v934_v13  ;;  %v937_v26 = vsel %vm927_vm1, %v934_v13, %v936_v11  ;;  %v271_v50 = vld [vmem:[%s4468_s8 + $0x90] sm:$0xff] }
  0x9c   : > { %v1041_v28 = vpack.c.bf16 %v937_v26, %v935_v25  ;;  %v333_v6 = vmul.f32 %v4474_v62, %v271_v50  ;;  %v336_v15 = vmul.f32 %v4474_v62, %v274_v59  ;;  %v335_v16 = vmul.f32 %v4474_v62, %v273_v60 }
  0x9d   : > { %v4576_v35 = vpack.c.bf16 %v4558_v23, %v4560_v24  ;;  %v939_v43 = vrot.slane %v4558_v23, 1  ;;  %v938_v44 = vrot.slane %v4560_v24, 1  ;;  %v443_v31 = vmax.f32 %v389_v58, 0.0 }
  0x9e   : > { %v585_v40 = vpop.permute.xlu1 %584  ;;  %v580_v29 = vpop.permute.xlu0 %579  ;;  %3623 = vmatmul.mubr.msk.bf16.vlgmr.msra.gmra.mrb[0].mxu1 %vm1064_vm2, %v1041_v28  ;;  %3758 = vmatprep.mubr.msk.bf16.mxu0 %vm1064_vm2, %v1041_v28  ;;  %v391_v32 = vadd.f32 %v4482_v2, %v331_v4  ;;  %v4659_v48 = vadd.f32 %v4482_v2, %v335_v16  ;;  %v446_v60 = vmax.f32 %v4603_v0, 0.0  ;;  %v280_v4 = vld [vmem:[%s4468_s8 + $0xd8] sm:$0xff] }
  0x9f   : > { %v4586_v46 = vmul.f32 %v580_v29, %v437_v17  ;;  %3655 = vmatpush3.bf16.msra.mxu1 %v1332_v33  ;;  %v4596_v53 = vmul.f32 %v585_v40, %v438_v36  ;;  %v940_v13 = vsel %vm927_vm1, %v938_v44, %v939_v43  ;;  %v2321_v17 = vsel %vm1113_vm0, %v4362_v30, 0 }
  0xa0   : > { %4186 = vmatprep.subr.msk.bf16.mxu1 %vm1113_vm0, %v4572_v34  ;;  %v4639_v33 = vadd.f32 %v4482_v2, %v334_v5  ;;  %v4642_v36 = vadd.f32 %v4482_v2, %v333_v6 }
  0xa1   : > { %v941_v56 = vrot.slane %v4586_v46, 1  ;;  %v943_v20 = vrot.slane %v4596_v53, 1 }
  0xa2   : > { %v595_v61 = vpop.permute.xlu1 %594  ;;  %v590_v63 = vpop.permute.xlu0 %589  ;;  %v447_v16 = vmax.f32 %v4642_v36, 0.0 }
  0xa3   : > { %v942_v7 = vsel %vm927_vm1, %v939_v43, %v941_v56  ;;  %v4609_v10 = vmul.f32 %v595_v61, %v440_v41  ;;  %v4611_v11 = vmul.f32 %v590_v63, %v439_v47  ;;  %v277_v43 = vld [vmem:[%s4468_s8 + $0xc0] sm:$0xff]  ;;  %v4656_v47 = vadd.f32 %v4482_v2, %v336_v15  ;;  %v282_v15 = vld [vmem:[%s4468_s8 + $0xe8] sm:$0x3] }
  0xa4   : > { %v4614_v14 = vpack.c.bf16 %v942_v7, %v940_v13  ;;  %v337_v56 = vmul.f32 %v4474_v62, %v275_v38  ;;  %v445_v61 = vmax.f32 %v391_v32, 0.0  ;;  %v448_v63 = vmax.f32 %v4639_v33, 0.0  ;;  %v279_v13 = vld [vmem:[%s4468_s8 + $0xd0] sm:$0x3] }
  0xa5   : > { %v946_v21 = vrot.slane %v4609_v10, 1  ;;  %v4629_v25 = vpack.c.bf16 %v4611_v11, %v4596_v53  ;;  %v944_v26 = vrot.slane %v4611_v11, 1  ;;  %v283_v32 = vld [vmem:[%s4468_s8 + $0xf0] sm:$0xff]  ;;  %v5713_v19 = vmax.f32 %v4656_v47, 0.0 }
  0xa6   : > { %5705 = vst [vmem:[#allocation5_spill] sm:$0xff] %v4614_v14  ;;  %v605_v28 = vpop.permute.xlu1 %604  ;;  %v600_v30 = vpop.permute.xlu0 %599  ;;  %3626 = vmatprep.mubr.msk.bf16.mxu1 %vm1064_vm2, %v4614_v14  ;;  %3759 = vmatmul.mubr.msk.bf16.vlgmr.msra.gmra.mrb[0].mxu0 %vm1064_vm2, %v4614_v14  ;;  %v4695_v27 = vadd.f32 %v4482_v2, %v337_v56  ;;  %v286_v56 = vld [vmem:[%s4468_s8 + $0x108] sm:$0xff]  ;;  %v352_v47 = vmul.f32 %v4474_v62, %v290_v55 }
  0xa7   : > { %5706 = vst [vmem:[#allocation6_spill] sm:$0xff] %v4629_v25  ;;  %v4646_v40 = vmul.f32 %v605_v28, %v442_v51  ;;  %v4648_v29 = vmul.f32 %v600_v30, %v441_v57  ;;  %v945_v41 = vsel %vm927_vm1, %v943_v20, %v944_v26  ;;  %v947_v42 = vsel %vm927_vm1, %v944_v26, %v946_v21  ;;  %v281_v30 = vld [vmem:[%s4468_s8 + $0xe0] sm:$0xff] }
  0xa8   : > { %3791 = vmatpush3.bf16.msra.mxu0 %v2321_v17  ;;  %v4653_v44 = vpack.c.bf16 %v947_v42, %v945_v41  ;;  %v444_v51 = vmax.f32 %v4592_v52, 0.0  ;;  %v340_v57 = vmul.f32 %v4474_v62, %v278_v39  ;;  %v339_v52 = vmul.f32 %v4474_v62, %v277_v43 }
  0xa9   : > { %4191 = vmatprep.subr.msk.bf16.mxu0 %vm1113_vm0, %v4623_v18  ;;  %v4666_v50 = vpack.c.bf16 %v4646_v40, %v4648_v29  ;;  %v949_v5 = vrot.slane %v4646_v40, 1  ;;  %v948_v6 = vrot.slane %v4648_v29, 1  ;;  %v449_v17 = vmax.f32 %v4659_v48, 0.0 }
  0xaa   : > { %5707 = vst [vmem:[#allocation7_spill] sm:$0xff] %v4653_v44  ;;  %v615_v58 = vpop.permute.xlu1 %614  ;;  %v610_v59 = vpop.permute.xlu0 %609  ;;  %3627 = vmatmul.mubr.msk.bf16.gmra.mrb[4].mxu1 %vm1064_vm2, %v4653_v44  ;;  %3762 = vmatprep.mubr.msk.bf16.mxu0 %vm1064_vm2, %v4653_v44  ;;  %v4689_v20 = vadd.f32 %v4482_v2, %v338_v49  ;;  %v4698_v28 = vadd.f32 %v4482_v2, %v340_v57  ;;  %v291_v44 = vld [vmem:[%s4468_s8 + $0x130] sm:$0x3] }
  0xab   : > { %5708 = vst [vmem:[#allocation8_spill] sm:$0xff] %v4666_v50  ;;  %v4681_v7 = vmul.f32 %v610_v59, %v443_v31  ;;  %v4691_v21 = vmul.f32 %v615_v58, %v444_v51  ;;  %v284_v31 = vld [vmem:[%s4468_s8 + $0xf8] sm:$0xff]  ;;  %v4704_v38 = vadd.f32 %v4482_v2, %v339_v52  ;;  %v342_v39 = vmul.f32 %v4474_v62, %v280_v4 }
  0xac   : > { %v341_v41 = vmul.f32 %v4474_v62, %v279_v13  ;;  %v344_v42 = vmul.f32 %v4474_v62, %v282_v15  ;;  %v950_v51 = vsel %vm927_vm1, %v948_v6, %v949_v5  ;;  %v343_v58 = vmul.f32 %v4474_v62, %v281_v30 }
  0xad   : > { %v951_v26 = vrot.slane %v4681_v7, 1  ;;  %v346_v59 = vmul.f32 %v4474_v62, %v284_v31  ;;  %v345_v52 = vmul.f32 %v4474_v62, %v283_v32  ;;  %v953_v4 = vrot.slane %v4691_v21, 1  ;;  %v285_v32 = vld [vmem:[%s4468_s8 + $0x100] sm:$0x3] }
  0xae   : > { %v625_v33 = vpop.permute.xlu1 %624  ;;  %v620_v36 = vpop.permute.xlu0 %619  ;;  %v452_v15 = vmax.f32 %v4689_v20, 0.0  ;;  %v4737_v30 = vadd.f32 %v4482_v2, %v341_v41  ;;  %v348_v31 = vmul.f32 %v4474_v62, %v286_v56  ;;  %v4750_v20 = vadd.f32 %v4482_v2, %v344_v42 }
  0xaf   : > { %v952_v43 = vsel %vm927_vm1, %v949_v5, %v951_v26  ;;  %v4710_v48 = vmul.f32 %v625_v33, %v446_v60  ;;  %v4712_v49 = vmul.f32 %v620_v36, %v445_v61  ;;  %v4734_v26 = vadd.f32 %v4482_v2, %v342_v39 }
  0xb0   : > { %v4716_v57 = vpack.c.bf16 %v952_v43, %v950_v51  ;;  %v4753_v39 = vadd.f32 %v4482_v2, %v343_v58  ;;  %v4756_v41 = vadd.f32 %v4482_v2, %v346_v59  ;;  %v4764_v56 = vadd.f32 %v4482_v2, %v345_v52 }
  0xb1   : > { %v956_v13 = vrot.slane %v4710_v48, 1  ;;  %v4725_v60 = vpack.c.bf16 %v4712_v49, %v4691_v21  ;;  %v954_v61 = vrot.slane %v4712_v49, 1  ;;  %v347_v42 = vmul.f32 %v4474_v62, %v285_v32 }
  0xb2   : > { %5709 = vst [vmem:[#allocation9_spill] sm:$0xff] %v4716_v57  ;;  %v635_v5 = vpop.permute.xlu1 %634  ;;  %v630_v6 = vpop.permute.xlu0 %629  ;;  %3630 = vmatprep.mubr.msk.bf16.mxu1 %vm1064_vm2, %v4716_v57  ;;  %3763 = vmatmul.mubr.msk.bf16.gmra.mrb[4].mxu0 %vm1064_vm2, %v4716_v57  ;;  %v454_v59 = vmax.f32 %v4698_v28, 0.0  ;;  %v289_v28 = vld [vmem:[%s4468_s8 + $0x120] sm:$0xff]  ;;  %v292_v57 = vld [vmem:[%s4468_s8 + $0x138] sm:$0xff] }
  0xb3   : > { %5710 = vst [vmem:[#allocation10_spill] sm:$0xff] %v4725_v60  ;;  %v4741_v33 = vmul.f32 %v635_v5, %v448_v63  ;;  %v4743_v36 = vmul.f32 %v630_v6, %v447_v16  ;;  %v955_v43 = vsel %vm927_vm1, %v953_v4, %v954_v61  ;;  %v957_v51 = vsel %vm927_vm1, %v954_v61, %v956_v13  ;;  %v288_v4 = vld [vmem:[%s4468_s8 + $0x118] sm:$0x3] }
  0xb4   : > { %v4747_v22 = vpack.c.bf16 %v957_v51, %v955_v43  ;;  %v451_v16 = vmax.f32 %v4695_v27, 0.0  ;;  %v453_v27 = vmax.f32 %v4704_v38, 0.0  ;;  %v4776_v61 = vadd.f32 %v4482_v2, %v348_v31  ;;  %v287_v51 = vld [vmem:[%s4468_s8 + $0x110] sm:$0xff] }
  0xb5   : > { %v4760_v63 = vpack.c.bf16 %v4741_v33, %v4743_v36  ;;  %v959_v5 = vrot.slane %v4741_v33, 1  ;;  %v958_v6 = vrot.slane %v4743_v36, 1  ;;  %v350_v0 = vmul.f32 %v4474_v62, %v288_v4 }
  0xb6   : > { %5711 = vst [vmem:[#allocation11_spill] sm:$0xff] %v4747_v22  ;;  %v645_v58 = vpop.permute.xlu1 %644  ;;  %v640_v13 = vpop.permute.xlu0 %639  ;;  %3631 = vmatmul.mubr.msk.bf16.gmra.mrb[8].mxu1 %vm1064_vm2, %v4747_v22  ;;  %3766 = vmatprep.mubr.msk.bf16.mxu0 %vm1064_vm2, %v4747_v22  ;;  %v4797_v43 = vadd.f32 %v4482_v2, %v347_v42  ;;  %v349_v4 = vmul.f32 %v4474_v62, %v287_v51 }
  0xb7   : > { %5712 = vst [vmem:[#allocation12_spill] sm:$0xff] %v4760_v63  ;;  %v4780_v32 = vmul.f32 %v640_v13, %v449_v17  ;;  %v4792_v22 = vmul.f32 %v645_v58, %v5713_v19  ;;  %v351_v19 = vmul.f32 %v4474_v62, %v289_v28  ;;  %v960_v42 = vsel %vm927_vm1, %v958_v6, %v959_v5  ;;  %v296_v63 = vld [vmem:[%s4468_s8 + $0x158] sm:$0xff] }
  0xb8   : > { %v4814_v9 = vadd.f32 %v4482_v2, %v350_v0  ;;  %v354_v52 = vmul.f32 %v4474_v62, %v292_v57  ;;  %v353_v51 = vmul.f32 %v4474_v62, %v291_v44  ;;  %v4832_v57 = vadd.f32 %v4482_v2, %v349_v4 }
  0xb9   : > { %v961_v17 = vrot.slane %v4780_v32, 1  ;;  %v963_v55 = vrot.slane %v4792_v22, 1  ;;  %v4835_v6 = vadd.f32 %v4482_v2, %v352_v47 }
  0xba   : > { %v655_v38 = vpop.permute.xlu1 %654  ;;  %v650_v14 = vpop.permute.xlu0 %649  ;;  %v4851_v4 = vadd.f32 %v4482_v2, %v354_v52  ;;  %v4854_v47 = vadd.f32 %v4482_v2, %v353_v51  ;;  %v358_v51 = vmul.f32 %v4474_v62, %v296_v63 }
  0xbb   : > { %v962_v58 = vsel %vm927_vm1, %v959_v5, %v961_v17  ;;  %v4806_v31 = vmul.f32 %v655_v38, %v452_v15  ;;  %v4808_v13 = vmul.f32 %v650_v14, %v451_v16  ;;  %v294_v16 = vld [vmem:[%s4468_s8 + $0x148] sm:$0x3]  ;;  %v4838_v38 = vadd.f32 %v4482_v2, %v351_v19 }
  0xbc   : > { %v4811_v8 = vpack.c.bf16 %v962_v58, %v960_v42  ;;  %v356_v19 = vmul.f32 %v4474_v62, %v294_v16  ;;  %v1500_v16 = vrot.slane %v4522_v54, 2  ;;  %v5719_v54 = vmax.f32 %v4734_v26, 0.0 }
  0xbd   : > { %v966_v28 = vrot.slane %v4806_v31, 1  ;;  %v4822_v14 = vpack.c.bf16 %v4808_v13, %v4792_v22  ;;  %v964_v15 = vrot.slane %v4808_v13, 1  ;;  %v4902_v26 = vadd.f32 %v4482_v2, %v358_v51 }
  0xbe   : > { %5714 = vst [vmem:[#allocation13_spill] sm:$0xff] %v4811_v8  ;;  %v665_v5 = vpop.permute.xlu1 %664  ;;  %v660_v0 = vpop.permute.xlu0 %659  ;;  %3634 = vmatprep.mubr.msk.bf16.mxu1 %vm1064_vm2, %v4811_v8  ;;  %3767 = vmatmul.mubr.msk.bf16.gmra.mrb[8].mxu0 %vm1064_vm2, %v4811_v8  ;;  %v293_v8 = vld [vmem:[%s4468_s8 + $0x140] sm:$0xff] }
  0xbf   : > { %5715 = vst [vmem:[#allocation14_spill] sm:$0xff] %v4822_v14  ;;  %v4840_v17 = vmul.f32 %v665_v5, %v454_v59  ;;  %v4842_v58 = vmul.f32 %v660_v0, %v453_v27  ;;  %v965_v42 = vsel %vm927_vm1, %v963_v55, %v964_v15  ;;  %v967_v14 = vsel %vm927_vm1, %v964_v15, %v966_v28 }
  0xc0   : > { %v4848_v44 = vpack.c.bf16 %v967_v14, %v965_v42  ;;  %v1503_v59 = vrot.slane %v4531_v1, 2  ;;  %v1501_v27 = vrot.slane %v4533_v3, 2  ;;  %v355_v3 = vmul.f32 %v4474_v62, %v293_v8 }
  0xc1   : > { %v4861_v55 = vpack.c.bf16 %v4840_v17, %v4842_v58  ;;  %v969_v5 = vrot.slane %v4840_v17, 1  ;;  %v968_v0 = vrot.slane %v4842_v58, 1  ;;  %v5718_v42 = vmax.f32 %v4737_v30, 0.0 }
  0xc2   : > { %5716 = vst [vmem:[#allocation15_spill] sm:$0xff] %v4848_v44  ;;  %v675_v14 = vpop.permute.xlu1 %674  ;;  %v670_v15 = vpop.permute.xlu0 %669  ;;  %3635 = vmatmul.mubr.msk.bf16.gmra.mrb[12].mxu1 %vm1064_vm2, %v4848_v44  ;;  %3770 = vmatprep.mubr.msk.bf16.mxu0 %vm1064_vm2, %v4848_v44  ;;  %v295_v44 = vld [vmem:[%s4468_s8 + $0x150] sm:$0xff]  ;;  %v4884_v8 = vadd.f32 %v4482_v2, %v356_v19  ;;  %v1502_v30 = vsel %vm1113_vm0, %v1500_v16, %v1501_v27  ;;  %v4896_v1 = vsel %vm1113_vm0, %v4623_v18, 0 }
  0xc3   : > { %5717 = vst [vmem:[#allocation16_spill] sm:$0xff] %v4861_v55  ;;  %v4877_v28 = vmul.f32 %v670_v15, %v5718_v42  ;;  %v4888_v63 = vmul.f32 %v675_v14, %v5719_v54  ;;  %v1504_v15 = vsel %vm1113_vm0, %v1501_v27, %v1503_v59  ;;  %v298_v42 = vld [vmem:[%s4468_s8 + $0x168] sm:$0xff]  ;;  %v4899_v19 = vadd.f32 %v4482_v2, %v355_v3 }
  0xc4   : > { %v357_v14 = vmul.f32 %v4474_v62, %v295_v44  ;;  %v5720_v59 = vmax.f32 %v4750_v20, 0.0  ;;  %v5721_v54 = vmax.f32 %v4753_v39, 0.0  ;;  %v970_v18 = vsel %vm927_vm1, %v968_v0, %v969_v5 }
  0xc5   : > { %v971_v60 = vrot.slane %v4877_v28, 1  ;;  %v1508_v3 = vrot.slane %v4586_v46, 2  ;;  %v4918_v51 = vpack.c.bf16 %v1504_v15, %v1502_v30  ;;  %v360_v44 = vmul.f32 %v4474_v62, %v298_v42 }
  0xc6   : > { %v685_v50 = vpop.permute.xlu1 %684  ;;  %v680_v52 = vpop.permute.xlu0 %679  ;;  %v1505_v46 = vrot.slane %v4560_v24, 2  ;;  %v1513_v0 = vrot.slane %v4609_v10, 2  ;;  %v1511_v30 = vrot.slane %v4611_v11, 2  ;;  %v1510_v11 = vrot.slane %v4596_v53, 2 }
  0xc7   : > { %v972_v16 = vsel %vm927_vm1, %v969_v5, %v971_v60  ;;  %v4908_v27 = vmul.f32 %v685_v50, %v5720_v59  ;;  %v4912_v55 = vmul.f32 %v680_v52, %v5721_v54  ;;  %5723 = vst [vmem:[#allocation18_spill] sm:$0xff] %v4918_v51  ;;  %v973_v60 = vrot.slane %v4888_v63, 1  ;;  %v297_v52 = vld [vmem:[%s4468_s8 + $0x160] sm:$0x3] }
  0xc8   : > { %v4916_v25 = vpack.c.bf16 %v972_v16, %v970_v18  ;;  %v1506_v5 = vrot.slane %v4558_v23, 2  ;;  %v5724_v16 = vmax.f32 %v4756_v41, 0.0  ;;  %v5725_v23 = vmax.f32 %v4764_v56, 0.0 }
  0xc9   : > { %v976_v20 = vrot.slane %v4908_v27, 1  ;;  %v4925_v50 = vpack.c.bf16 %v4912_v55, %v4888_v63  ;;  %v974_v39 = vrot.slane %v4912_v55, 1  ;;  %v359_v41 = vmul.f32 %v4474_v62, %v297_v52 }
  0xca   : > { %5722 = vst [vmem:[#allocation17_spill] sm:$0xff] %v4916_v25  ;;  %v695_v15 = vpop.permute.xlu1 %694  ;;  %v690_v42 = vpop.permute.xlu0 %689  ;;  %3638 = vmatprep.mubr.msk.bf16.mxu1 %vm1064_vm2, %v4916_v25  ;;  %3771 = vmatmul.mubr.msk.bf16.gmra.mrb[12].mxu0 %vm1064_vm2, %v4916_v25  ;;  %v4953_v25 = vadd.f32 %v4482_v2, %v357_v14  ;;  %v1509_v56 = vsel %vm1113_vm0, %v1506_v5, %v1508_v3  ;;  %v5729_v52 = vmax.f32 %v4776_v61, 0.0  ;;  %v1523_v61 = vrot.slane %v4710_v48, 2  ;;  %v299_v48 = vld [vmem:[%s4468_s8 + $0x170] sm:$0xff] }
  0xcb   : > { %v4939_v59 = vmul.f32 %v695_v15, %v5724_v16  ;;  %v4943_v54 = vmul.f32 %v690_v42, %v5725_v23  ;;  %3792 = vmatprep.mubr.msk.bf16.mxu0 %vm1064_vm2, %v4918_v51  ;;  %v975_v24 = vsel %vm927_vm1, %v973_v60, %v974_v39  ;;  %v977_v10 = vsel %vm927_vm1, %v974_v39, %v976_v20  ;;  %v301_v51 = vld [vmem:[%s4468_s8 + $0x180] sm:$0xff] }
  0xcc   : > { %v4950_v18 = vpack.c.bf16 %v977_v10, %v975_v24  ;;  %v4963_v60 = vadd.f32 %v4482_v2, %v360_v44  ;;  %v1512_v14 = vsel %vm1113_vm0, %v1510_v11, %v1511_v30  ;;  %v1514_v39 = vsel %vm1113_vm0, %v1511_v30, %v1513_v0 }
  0xcd   : > { %v4959_v15 = vpack.c.bf16 %v4939_v59, %v4943_v54  ;;  %v1507_v16 = vsel %vm1113_vm0, %v1505_v46, %v1506_v5  ;;  %v979_v23 = vrot.slane %v4939_v59, 1  ;;  %v978_v44 = vrot.slane %v4943_v54, 1 }
  0xce   : > { %5726 = vst [vmem:[#allocation19_spill] sm:$0xff] %v4950_v18  ;;  %v705_v20 = vpop.permute.xlu1 %704  ;;  %v700_v53 = vpop.permute.xlu0 %699  ;;  %3639 = vmatmul.mubr.msk.bf16.gmra.mrb[16].mxu1 %vm1064_vm2, %v4950_v18  ;;  %v5727_v24 = vmax.f32 %v4797_v43, 0.0  ;;  %v4978_v42 = vpack.c.bf16 %v1509_v56, %v1507_v16  ;;  %v1518_v11 = vrot.slane %v4681_v7, 2  ;;  %v4983_v30 = vadd.f32 %v4482_v2, %v359_v41  ;;  %v300_v56 = vld [vmem:[%s4468_s8 + $0x178] sm:$0x3] }
  0xcf   : > { %v4987_v5 = vmul.f32 %v705_v20, %v5729_v52  ;;  %v4990_v3 = vpack.c.bf16 %v1514_v39, %v1512_v14  ;;  %v4997_v7 = vld [vmem:[%s5674_s4 + $0x38] sm:$0x3f]   ;;  %v1516_v41 = vrot.slane %v4646_v40, 2  ;;  %v1521_v20 = vrot.slane %v4712_v49, 2 }
  0xd0   : > { %v4976_v10 = vmul.f32 %v700_v53, %v5727_v24  ;;  %5728 = vst [vmem:[#allocation20_spill] sm:$0xff] %v4978_v42  ;;  %v1515_v53 = vrot.slane %v4648_v29, 2  ;;  %v5731_v16 = vmax.f32 %v4814_v9, 0.0  ;;  %v5732_v40 = vmax.f32 %v4832_v57, 0.0 }
  0xd1   : > { %5730 = vst [vmem:[#allocation21_spill] sm:$0xff] %v4990_v3  ;;  %v980_v29 = vsel %vm927_vm1, %v978_v44, %v979_v23  ;;  %v1520_v49 = vrot.slane %v4691_v21, 2  ;;  %v1519_v0 = vsel %vm1113_vm0, %v1516_v41, %v1518_v11  ;;  %v362_v9 = vmul.f32 %v4474_v62, %v300_v56  ;;  %v302_v21 = vld [vmem:[%s4468_s8 + $0x188] sm:$0xff] }
  0xd2   : > { %v981_v46 = vrot.slane %v4976_v10, 1  ;;  %v715_v52 = vpop.permute.xlu1 %714  ;;  %v710_v14 = vpop.permute.xlu0 %709  ;;  %3793 = vmatmul.mubr.msk.bf16.vlgmr.msra.gmra.mrb[0].mxu0 %vm1064_vm2, %v4978_v42  ;;  %v983_v57 = vrot.slane %v4987_v5, 1 }
  0xd3   : > { %v5008_v24 = vmul.f32 %v715_v52, %v5731_v16  ;;  %v5012_v43 = vmul.f32 %v710_v14, %v5732_v40  ;;  %3796 = vmatprep.mubr.msk.bf16.mxu0 %vm1064_vm2, %v4990_v3  ;;  %3825 = vmatpush3.bf16.msra.mxu0 %v4896_v1  ;;  %v1517_v1 = vsel %vm1113_vm0, %v1515_v53, %v1516_v41  ;;  %v5734_v16 = vmax.f32 %v4835_v6, 0.0 }
  0xd4   : > { %v982_v39 = vsel %vm927_vm1, %v979_v23, %v981_v46  ;;  %4192 = vmatprep.subr.msk.bf16.mxu0 %vm1113_vm0, %v4997_v7  ;;  %v1522_v56 = vsel %vm1113_vm0, %v1520_v49, %v1521_v20  ;;  %v1524_v14 = vsel %vm1113_vm0, %v1521_v20, %v1523_v61  ;;  %v1528_v41 = vrot.slane %v4780_v32, 2 }
  0xd5   : > { %v5020_v18 = vpack.c.bf16 %v982_v39, %v980_v29  ;;  %v986_v46 = vrot.slane %v5008_v24, 1  ;;  %v5028_v52 = vpack.c.bf16 %v5012_v43, %v4987_v5  ;;  %v984_v23 = vrot.slane %v5012_v43, 1 }
  0xd6   : > { %v725_v44 = vpop.permute.xlu1 %724  ;;  %v720_v11 = vpop.permute.xlu0 %719  ;;  %v361_v39 = vmul.f32 %v4474_v62, %v299_v48  ;;  %v5735_v29 = vmax.f32 %v4838_v38, 0.0  ;;  %v5054_v61 = vpack.c.bf16 %v1519_v0, %v1517_v1  ;;  %v364_v20 = vmul.f32 %v4474_v62, %v302_v21  ;;  %v304_v21 = vld [vmem:[%s4468_s8 + $0x198] sm:$0xff] }
  0xd7   : > { %5733 = vst [vmem:[#allocation22_spill] sm:$0xff] %v5020_v18  ;;  %3642 = vmatprep.mubr.msk.bf16.mxu1 %vm1064_vm2, %v5020_v18  ;;  %v5042_v40 = vmul.f32 %v725_v44, %v5734_v16  ;;  %v985_v42 = vsel %vm927_vm1, %v983_v57, %v984_v23  ;;  %v987_v18 = vsel %vm927_vm1, %v984_v23, %v986_v46  ;;  %v1533_v6 = vrot.slane %v4806_v31, 2  ;;  %v303_v44 = vld [vmem:[%s4468_s8 + $0x190] sm:$0x3] }
  0xd8   : > { %v5046_v3 = vmul.f32 %v720_v11, %v5735_v29  ;;  %v5052_v53 = vpack.c.bf16 %v987_v18, %v985_v42  ;;  %v1531_v48 = vrot.slane %v4808_v13, 2  ;;  %v5063_v49 = vpack.c.bf16 %v1524_v14, %v1522_v56 }
  0xd9   : > { %v1526_v32 = vrot.slane %v4741_v33, 2  ;;  %v1525_v18 = vrot.slane %v4743_v36, 2  ;;  %v473_v31 = vmax.f32 %v4983_v30, 0.0  ;;  %v363_v13 = vmul.f32 %v4474_v62, %v301_v51 }
  0xda   : > { %v5061_v38 = vpack.c.bf16 %v5042_v40, %v5046_v3  ;;  %v735_v42 = vpop.permute.xlu1 %734  ;;  %v730_v0 = vpop.permute.xlu0 %729  ;;  %3643 = vmatmul.mubr.msk.bf16.gmra.mrb[20].mxu1 %vm1064_vm2, %v5052_v53  ;;  %3797 = vmatmul.mubr.msk.bf16.gmra.mrb[4].mxu0 %vm1064_vm2, %v5054_v61  ;;  %v1530_v57 = vrot.slane %v4792_v22, 2  ;;  %v989_v46 = vrot.slane %v5042_v40, 1  ;;  %v988_v33 = vrot.slane %v5046_v3, 1 }
  0xdb   : > { %v5736_v36 = vmax.f32 %v4854_v47, 0.0  ;;  %3800 = vmatprep.mubr.msk.bf16.mxu0 %vm1064_vm2, %v5063_v49  ;;  %v1529_v11 = vsel %vm1113_vm0, %v1526_v32, %v1528_v41  ;;  %v5086_v1 = vadd.f32 %v4482_v2, %v362_v9  ;;  %v5089_v22 = vadd.f32 %v4482_v2, %v361_v39 }
  0xdc   : > { %v5092_v51 = vadd.f32 %v4482_v2, %v364_v20  ;;  %v5737_v47 = vmax.f32 %v4851_v4, 0.0  ;;  %v1532_v16 = vsel %vm1113_vm0, %v1530_v57, %v1531_v48  ;;  %v1534_v29 = vsel %vm1113_vm0, %v1531_v48, %v1533_v6 }
  0xdd   : > { %v5078_v23 = vmul.f32 %v730_v0, %v5736_v36  ;;  %v1527_v9 = vsel %vm1113_vm0, %v1525_v18, %v1526_v32  ;;  %v5103_v39 = vadd.f32 %v4482_v2, %v363_v13  ;;  %v366_v20 = vmul.f32 %v4474_v62, %v304_v21 }
  0xde   : > { %v5096_v56 = vmul.f32 %v735_v42, %v5737_v47  ;;  %v745_v41 = vpop.permute.xlu1 %744  ;;  %v740_v0 = vpop.permute.xlu0 %739  ;;  %v365_v36 = vmul.f32 %v4474_v62, %v303_v44  ;;  %v5738_v42 = vmax.f32 %v4884_v8, 0.0  ;;  %v5739_v57 = vmax.f32 %v4899_v19, 0.0 }
  0xdf   : > { %v991_v14 = vrot.slane %v5078_v23, 1  ;;  %v990_v48 = vsel %vm927_vm1, %v988_v33, %v989_v46  ;;  %v1538_v32 = vrot.slane %v4877_v28, 2  ;;  %v5120_v13 = vpack.c.bf16 %v1529_v11, %v1527_v9 }
  0xe0   : > { %v5110_v47 = vmul.f32 %v745_v41, %v5738_v42  ;;  %v5114_v6 = vmul.f32 %v740_v0, %v5739_v57  ;;  %v5122_v21 = vpack.c.bf16 %v1534_v29, %v1532_v16  ;;  %v993_v44 = vrot.slane %v5096_v56, 1 }
  0xe1   : > { %v992_v4 = vsel %vm927_vm1, %v989_v46, %v991_v14  ;;  %v1536_v46 = vrot.slane %v4840_v17, 2  ;;  %v1535_v28 = vrot.slane %v4842_v58, 2  ;;  %v1543_v33 = vrot.slane %v4908_v27, 2 }
  0xe2   : > { %v5118_v18 = vpack.c.bf16 %v992_v4, %v990_v48  ;;  %v996_v8 = vrot.slane %v5110_v47, 1  ;;  %v5128_v14 = vpack.c.bf16 %v5114_v6, %v5096_v56  ;;  %v994_v19 = vrot.slane %v5114_v6, 1  ;;  %v755_v16 = vpop.permute.xlu1 %754  ;;  %v750_v29 = vpop.permute.xlu0 %749  ;;  %3801 = vmatmul.mubr.msk.bf16.gmra.mrb[8].mxu0 %vm1064_vm2, %v5120_v13 }
  0xe3   : > { %v1541_v11 = vrot.slane %v4912_v55, 2  ;;  %v5740_v41 = vmax.f32 %v4902_v26, 0.0  ;;  %v5741_v17 = vmax.f32 %v4953_v25, 0.0  ;;  %3804 = vmatprep.mubr.msk.bf16.mxu0 %vm1064_vm2, %v5122_v21  ;;  %v1540_v9 = vrot.slane %v4888_v63, 2 }
  0xe4   : > { %3646 = vmatprep.mubr.msk.bf16.mxu1 %vm1064_vm2, %v5118_v18  ;;  %v995_v55 = vsel %vm927_vm1, %v993_v44, %v994_v19  ;;  %v997_v27 = vsel %vm927_vm1, %v994_v19, %v996_v8  ;;  %v476_v26 = vmax.f32 %v5086_v1, 0.0  ;;  %v5156_v42 = vadd.f32 %v4482_v2, %v365_v36  ;;  %v306_v8 = vld [vmem:[%s4468_s8 + $0x1a8] sm:$0x3] }
  0xe5   : > { %v5141_v0 = vmul.f32 %v755_v16, %v5740_v41  ;;  %v5145_v58 = vmul.f32 %v750_v29, %v5741_v17  ;;  %v5152_v4 = vpack.c.bf16 %v997_v27, %v995_v55  ;;  %v1539_v25 = vsel %vm1113_vm0, %v1536_v46, %v1538_v32  ;;  %v305_v29 = vld [vmem:[%s4468_s8 + $0x1a0] sm:$0xff] }
  0xe6   : > { %v475_v48 = vmax.f32 %v5089_v22, 0.0  ;;  %v478_v44 = vmax.f32 %v5092_v51, 0.0  ;;  %v765_v63 = vpop.permute.xlu1 %764  ;;  %v760_v19 = vpop.permute.xlu0 %759  ;;  %v1542_v1 = vsel %vm1113_vm0, %v1540_v9, %v1541_v11  ;;  %v1544_v36 = vsel %vm1113_vm0, %v1541_v11, %v1543_v33 }
  0xe7   : > { %v5161_v57 = vpack.c.bf16 %v5141_v0, %v5145_v58  ;;  %3647 = vmatmul.mubr.msk.bf16.gmra.mrb[24].mxu1 %vm1064_vm2, %v5152_v4  ;;  %v477_v32 = vmax.f32 %v5103_v39, 0.0  ;;  %v5172_v16 = vadd.f32 %v4482_v2, %v366_v20  ;;  %v999_v22 = vrot.slane %v5141_v0, 1 }
  0xe8   : > { %v998_v51 = vrot.slane %v5145_v58, 1  ;;  %v5179_v41 = vmul.f32 %v760_v19, %v473_v31  ;;  %v1537_v17 = vsel %vm1113_vm0, %v1535_v28, %v1536_v46  ;;  %v1548_v55 = vrot.slane %v4976_v10, 2 }
  0xe9   : > { %v5183_v27 = vpack.c.bf16 %v1539_v25, %v1537_v17  ;;  %v479_v39 = vmax.f32 %v5156_v42, 0.0  ;;  %v368_v2 = vmul.f32 %v4474_v62, %v306_v8  ;;  %v5742_v20 = vmax.f32 %v4963_v60, 0.0 }
  0xea   : > { %v1001_v11 = vrot.slane %v5179_v41, 1  ;;  %v5192_v9 = vpack.c.bf16 %v1544_v36, %v1542_v1  ;;  %v367_v30 = vmul.f32 %v4474_v62, %v305_v29  ;;  %v1546_v31 = vrot.slane %v4939_v59, 2  ;;  %v775_v42 = vpop.permute.xlu1 %774  ;;  %v770_v25 = vpop.permute.xlu0 %769 }
  0xeb   : > { %v5189_v33 = vmul.f32 %v765_v63, %v5742_v20  ;;  %v1545_v10 = vrot.slane %v4943_v54, 2  ;;  %v1553_v46 = vrot.slane %v5008_v24, 2  ;;  %v1551_v28 = vrot.slane %v5012_v43, 2  ;;  %3805 = vmatmul.mubr.msk.bf16.gmra.mrb[12].mxu0 %vm1064_vm2, %v5183_v27  ;;  %v4215_v24 = vld [vmem:[%s5672_s2] ss:$0 sm:$0xff] }
  0xec   : > { %v1002_v60 = vsel %vm927_vm1, %v999_v22, %v1001_v11  ;;  %v5202_v8 = vmul.f32 %v775_v42, %v476_v26  ;;  %v5204_v63 = vmul.f32 %v770_v25, %v475_v48  ;;  %3808 = vmatprep.mubr.msk.bf16.mxu0 %vm1064_vm2, %v5192_v9  ;;  %v1000_v62 = vsel %vm927_vm1, %v998_v51, %v999_v22 }
  0xed   : > { %v1550_v59 = vrot.slane %v4987_v5, 2  ;;  %v1549_v54 = vsel %vm1113_vm0, %v1546_v31, %v1548_v55  ;;  %v5211_v43 = vpack.c.bf16 %v1002_v60, %v1000_v62  ;;  %v428_v19 = vadd.f32 %v4215_v24, %v368_v2 }
  0xee   : > { %v1003_v26 = vrot.slane %v5189_v33, 1  ;;  %v1006_v48 = vrot.slane %v5202_v8, 1  ;;  %v5220_v1 = vpack.c.bf16 %v5204_v63, %v5189_v33  ;;  %v1004_v36 = vrot.slane %v5204_v63, 1  ;;  %v785_v5 = vpop.permute.xlu1 %784  ;;  %v780_v29 = vpop.permute.xlu0 %779 }
  0xef   : > { %3650 = vmatprep.mubr.msk.bf16.mxu1 %vm1064_vm2, %v5211_v43  ;;  %v1547_v22 = vsel %vm1113_vm0, %v1545_v10, %v1546_v31  ;;  %v1552_v51 = vsel %vm1113_vm0, %v1550_v59, %v1551_v28  ;;  %v1554_v17 = vsel %vm1113_vm0, %v1551_v28, %v1553_v46  ;;  %v427_v55 = vadd.f32 %v4215_v24, %v367_v30 }
  0xf0   : > { %v5228_v2 = vmul.f32 %v785_v5, %v478_v44  ;;  %v5230_v20 = vmul.f32 %v780_v29, %v477_v32  ;;  %v1005_v11 = vsel %vm927_vm1, %v1003_v26, %v1004_v36  ;;  %v1007_v42 = vsel %vm927_vm1, %v1004_v36, %v1006_v48 }
  0xf1   : > { %v480_v25 = vmax.f32 %v5172_v16, 0.0  ;;  %v5235_v60 = vpack.c.bf16 %v1007_v42, %v1005_v11  ;;  %v5237_v62 = vpack.c.bf16 %v1549_v54, %v1547_v22  ;;  %v1558_v31 = vrot.slane %v5078_v23, 2 }
  0xf2   : > { %v2087_v10 = vrot.slane %v5228_v2, 1  ;;  %v2086_v30 = vrot.slane %v5230_v20, 1  ;;  %v5242_v44 = vpack.c.bf16 %v1554_v17, %v1552_v51  ;;  %v1563_v32 = vrot.slane %v5110_v47, 2  ;;  %v795_v28 = vpop.permute.xlu1 %794  ;;  %v790_v59 = vpop.permute.xlu0 %789 }
  0xf3   : > { %v1561_v46 = vrot.slane %v5114_v6, 2  ;;  %3651 = vmatmul.mubr.msk.bf16.gmra.mrb[28].mxu1 %vm1064_vm2, %v5235_v60  ;;  %3809 = vmatmul.mubr.msk.bf16.gmra.mrb[16].mxu0 %vm1064_vm2, %v5237_v62  ;;  %v482_v16 = vmax.f32 %v428_v19, 0.0  ;;  %v481_v23 = vmax.f32 %v427_v55, 0.0  ;;  %v1556_v54 = vrot.slane %v5042_v40, 2  ;;  %v5278_v55 = vld [vmem:[%s5674_s4 + $0x18] sm:$0x3f]  }
  0xf4   : > { %v1555_v24 = vrot.slane %v5046_v3, 2  ;;  %v857_v26 = vmul.f32 %v790_v59, %v479_v39  ;;  %v5743_v47 = vpack.c.bf16 %v4513_v45, %v4509_v37  ;;  %3812 = vmatprep.mubr.msk.bf16.mxu0 %vm1064_vm2, %v5242_v44  ;;  %v2088_v6 = vsel %vm927_vm1, %v2086_v30, %v2087_v10 }
  0xf5   : > { %v1560_v48 = vrot.slane %v5096_v56, 2  ;;  %v1559_v19 = vsel %vm1113_vm0, %v1556_v54, %v1558_v31  ;;  %v5261_v5 = vmul.f32 %v795_v28, %v480_v25  ;;  %v1564_v37 = vsel %vm1113_vm0, %v1561_v46, %v1563_v32 }
  0xf6   : > { %3656 = vmatprep.mubr.msk.bf16.mxu1 %vm1064_vm2, %v5743_v47  ;;  %v2089_v36 = vrot.slane %v857_v26, 1  ;;  %v805_v40 = vpop.permute.xlu1 %804  ;;  %v800_v3 = vpop.permute.xlu0 %799  ;;  %v1557_v51 = vsel %vm1113_vm0, %v1555_v24, %v1556_v54  ;;  %v1680_v56 = vsel %vm1113_vm0, %v4572_v34, 0  ;;  %v1568_v42 = vrot.slane %v5179_v41, 2  ;;  %v5744_v47 = vld [vmem:[#allocation6_spill] sm:$0xff] }
  0xf7   : > { %v1562_v39 = vsel %vm1113_vm0, %v1560_v48, %v1561_v46  ;;  %v5266_v29 = vmul.f32 %v805_v40, %v482_v16  ;;  %v5268_v22 = vmul.f32 %v800_v3, %v481_v23  ;;  %v5273_v17 = vpack.c.bf16 %v1559_v19, %v1557_v51  ;;  %v5745_v19 = vld [vmem:[#allocation8_spill] sm:$0xff]  ;;  %v5746_v3 = vld [vmem:[#allocation10_spill] sm:$0xff] }
  0xf8   : > { %v2090_v45 = vsel %vm927_vm1, %v2087_v10, %v2089_v36  ;;  %v5284_v31 = vpack.c.bf16 %v1564_v37, %v1562_v39  ;;  %v1573_v10 = vrot.slane %v5202_v8, 2  ;;  %v1571_v30 = vrot.slane %v5204_v63, 2  ;;  %v5747_v39 = vld [vmem:[#allocation12_spill] sm:$0xff]  ;;  %v5748_v51 = vld [vmem:[#allocation14_spill] sm:$0xff] }
  0xf9   : > { %v5280_v11 = vpack.c.bf16 %v2090_v45, %v2088_v6  ;;  %v2945_v25 = vrot.slane %v5266_v29, 2  ;;  %v2942_v34 = vrot.slane %v5261_v5, 2  ;;  %v2943_v32 = vrot.slane %v5268_v22, 2  ;;  %v4214_v45 = vld [vmem:[%s5674_s4 + $0x40] sm:$0x3f]  }
  0xfa   : > { %v1566_v41 = vrot.slane %v5141_v0, 2  ;;  %v1565_v46 = vrot.slane %v5145_v58, 2  ;;  %v1570_v8 = vrot.slane %v5189_v33, 2  ;;  %v1574_v33 = vsel %vm1113_vm0, %v1571_v30, %v1573_v10 }
  0xfb   : > { %3657 = vmatmul.mubr.msk.bf16.vlgmr.msra.gmra.mrb[0].mxu1 %vm1064_vm2, %v4548_v12  ;;  %3813 = vmatmul.mubr.msk.bf16.gmra.mrb[20].mxu0 %vm1064_vm2, %v5273_v17  ;;  %v5304_v63 = vsel %vm1113_vm0, %v2942_v34, %v2943_v32  ;;  %v5307_v28 = vsel %vm1113_vm0, %v2943_v32, %v2945_v25  ;;  %v2304_v54 = vrot.slane %v857_v26, 2  ;;  %v2302_v6 = vrot.slane %v5228_v2, 2  ;;  %v5754_v34 = vld [vmem:[#allocation20_spill] sm:$0xff]  ;;  %v4216_v32 = vld [vmem:[%s5674_s4 + $0x20] sm:$0x3f]  }
  0xfc   : > { %3689 = vmatpush3.bf16.msra.mxu1 %v1680_v56  ;;  %3660 = vmatprep.mubr.msk.bf16.mxu1 %vm1064_vm2, %v4576_v35  ;;  %v1569_v0 = vsel %vm1113_vm0, %v1566_v41, %v1568_v42  ;;  %v2949_v58 = vpack.c.bf16 %v5307_v28, %v5304_v63  ;;  %v1572_v59 = vsel %vm1113_vm0, %v1570_v8, %v1571_v30  ;;  %v2301_v48 = vrot.slane %v5230_v20, 2  ;;  %v5749_v56 = vld [vmem:[#allocation16_spill] sm:$0xff]  ;;  %v5751_v42 = vld [vmem:[#allocation3_spill] sm:$0xff]  ;;  %v5753_v30 = vld [vmem:[#allocation18_spill] sm:$0xff] }
  0xfd   : > { %3816 = vmatprep.mubr.msk.bf16.mxu0 %vm1064_vm2, %v5284_v31  ;;  %4187 = vmatprep.subr.msk.bf16.mxu1 %vm1113_vm0, %v5278_v55  ;;  %v1567_v16 = vsel %vm1113_vm0, %v1565_v46, %v1566_v41  ;;  %v5317_v24 = vpack.c.bf16 %v1574_v33, %v1572_v59  ;;  %v2305_v26 = vsel %vm1113_vm0, %v2302_v6, %v2304_v54  ;;  %v2747_v37 = vsel %vm1113_vm0, %v4997_v7, 0  ;;  %v5750_v7 = vld [vmem:[#allocation4_spill] sm:$0xff]  ;;  %v5755_v41 = vld [vmem:[#allocation21_spill] sm:$0xff]  ;;  %v5757_v8 = vld [vmem:[#allocation7_spill] sm:$0xff] }
  0xfe   : > { %v5315_v23 = vpack.c.bf16 %v1569_v0, %v1567_v16  ;;  %v2303_v36 = vsel %vm1113_vm0, %v2301_v48, %v2302_v6  ;;  %v5752_v25 = vpack.c.bf16 %v5750_v7, %v5751_v42  ;;  %v1888_v10 = vsel %vm1113_vm0, %v5278_v55, 0  ;;  %v5758_v0 = vld [vmem:[#allocation9_spill] sm:$0xff]  ;;  %v5759_v59 = vld [vmem:[#allocation11_spill] sm:$0xff]  ;;  %v5764_v48 = vld [vmem:[#allocation22_spill] sm:$0xff] }
  0xff   : > { %v5331_v40 = vpack.c.bf16 %v2305_v26, %v2303_v36  ;;  %v5405_v55 = vpack.c.bf16 %v5228_v2, %v5230_v20  ;;  %v2516_v46 = vpack.c.bf16 %v5268_v22, %v5261_v5  ;;  %v5756_v2 = vld [vmem:[#allocation5_spill] sm:$0xff]  ;;  %v2962_v20 = vsel %vm1113_vm0, %v4214_v45, 0  ;;  %v5761_v16 = vld [vmem:[#allocation15_spill] sm:$0xff]  ;;  %v5765_v26 = vld [vmem:[#allocation2_spill] sm:$0xff] }
 0x100   : > { %v5760_v33 = vld [vmem:[#allocation13_spill] sm:$0xff]  ;;  %v5763_v6 = vld [vmem:[#allocation19_spill] sm:$0xff]  ;;  %v2730_v36 = vrot.slane %v5266_v29, 1 }
 0x101   : > { %v5762_v54 = vld [vmem:[#allocation17_spill] sm:$0xff] }
 0x103   : > { %3661 = vmatmul.mubr.msk.bf16.gmra.mrb[4].mxu1 %vm1064_vm2, %v5744_v47  ;;  %3817 = vmatmul.mubr.msk.bf16.gmra.mrb[24].mxu0 %vm1064_vm2, %v5315_v23 }
 0x104   : > { %3664 = vmatprep.mubr.msk.bf16.mxu1 %vm1064_vm2, %v5745_v19  ;;  %3820 = vmatprep.mubr.msk.bf16.mxu0 %vm1064_vm2, %v5317_v24 }
 0x10b   : > { %3665 = vmatmul.mubr.msk.bf16.gmra.mrb[8].mxu1 %vm1064_vm2, %v5746_v3  ;;  %3821 = vmatmul.mubr.msk.bf16.gmra.mrb[28].mxu0 %vm1064_vm2, %v5331_v40 }
 0x10c   : > { %3668 = vmatprep.mubr.msk.bf16.mxu1 %vm1064_vm2, %v5747_v39  ;;  %3826 = vmatprep.mubr.msk.bf16.mxu0 %vm1064_vm2, %v4576_v35 }
 0x113   : > { %3669 = vmatmul.mubr.msk.bf16.gmra.mrb[12].mxu1 %vm1064_vm2, %v5748_v51  ;;  %3827 = vmatmul.mubr.msk.bf16.vlgmr.msra.gmra.mrb[0].mxu0 %vm1064_vm2, %v5744_v47 }
 0x114   : > { %3672 = vmatprep.mubr.msk.bf16.mxu1 %vm1064_vm2, %v5749_v56  ;;  %3830 = vmatprep.mubr.msk.bf16.mxu0 %vm1064_vm2, %v5745_v19 }
 0x115   : > { %3859 = vmatpush3.bf16.msra.mxu0 %v2747_v37 }
 0x116   : > { %4193 = vmatprep.subr.msk.bf16.mxu0 %vm1113_vm0, %v4214_v45 }
 0x11b   : > { %3673 = vmatmul.mubr.msk.bf16.gmra.mrb[16].mxu1 %vm1064_vm2, %v4925_v50  ;;  %3831 = vmatmul.mubr.msk.bf16.gmra.mrb[4].mxu0 %vm1064_vm2, %v5746_v3 }
 0x11c   : > { %3676 = vmatprep.mubr.msk.bf16.mxu1 %vm1064_vm2, %v4959_v15  ;;  %3834 = vmatprep.mubr.msk.bf16.mxu0 %vm1064_vm2, %v5747_v39 }
 0x123   : > { %3677 = vmatmul.mubr.msk.bf16.gmra.mrb[20].mxu1 %vm1064_vm2, %v5028_v52  ;;  %3835 = vmatmul.mubr.msk.bf16.gmra.mrb[8].mxu0 %vm1064_vm2, %v5748_v51 }
 0x124   : > { %3680 = vmatprep.mubr.msk.bf16.mxu1 %vm1064_vm2, %v5061_v38  ;;  %3838 = vmatprep.mubr.msk.bf16.mxu0 %vm1064_vm2, %v5749_v56 }
 0x12b   : > { %3681 = vmatmul.mubr.msk.bf16.gmra.mrb[24].mxu1 %vm1064_vm2, %v5128_v14  ;;  %3839 = vmatmul.mubr.msk.bf16.gmra.mrb[12].mxu0 %vm1064_vm2, %v4925_v50 }
 0x12c   : > { %3684 = vmatprep.mubr.msk.bf16.mxu1 %vm1064_vm2, %v5161_v57  ;;  %3842 = vmatprep.mubr.msk.bf16.mxu0 %vm1064_vm2, %v4959_v15 }
 0x133   : > { %3685 = vmatmul.mubr.msk.bf16.gmra.mrb[28].mxu1 %vm1064_vm2, %v5220_v1  ;;  %3843 = vmatmul.mubr.msk.bf16.gmra.mrb[16].mxu0 %vm1064_vm2, %v5028_v52 }
 0x134   : > { %3690 = vmatprep.mubr.msk.bf16.mxu1 %vm1064_vm2, %v5752_v25  ;;  %3846 = vmatprep.mubr.msk.bf16.mxu0 %vm1064_vm2, %v5061_v38 }
 0x13b   : > { %3691 = vmatmul.mubr.msk.bf16.vlgmr.msra.gmra.mrb[0].mxu1 %vm1064_vm2, %v5753_v30  ;;  %3847 = vmatmul.mubr.msk.bf16.gmra.mrb[20].mxu0 %vm1064_vm2, %v5128_v14 }
 0x13c   : > { %3723 = vmatpush3.bf16.msra.mxu1 %v1888_v10  ;;  %3694 = vmatprep.mubr.msk.bf16.mxu1 %vm1064_vm2, %v5754_v34 }
 0x13d   : > { %3850 = vmatprep.mubr.msk.bf16.mxu0 %vm1064_vm2, %v5161_v57  ;;  %4189 = vmatprep.subr.msk.bf16.mxu1 %vm1113_vm0, %v4216_v32 }
 0x143   : > { %3695 = vmatmul.mubr.msk.bf16.gmra.mrb[4].mxu1 %vm1064_vm2, %v5755_v41  ;;  %3851 = vmatmul.mubr.msk.bf16.gmra.mrb[24].mxu0 %vm1064_vm2, %v5220_v1 }
 0x144   : > { %3698 = vmatprep.mubr.msk.bf16.mxu1 %vm1064_vm2, %v5054_v61  ;;  %3854 = vmatprep.mubr.msk.bf16.mxu0 %vm1064_vm2, %v5405_v55 }
 0x14b   : > { %3699 = vmatmul.mubr.msk.bf16.gmra.mrb[8].mxu1 %vm1064_vm2, %v5063_v49  ;;  %3855 = vmatmul.mubr.msk.bf16.gmra.mrb[28].mxu0 %vm1064_vm2, %v2516_v46 }
 0x14c   : > { %3702 = vmatprep.mubr.msk.bf16.mxu1 %vm1064_vm2, %v5120_v13  ;;  %3860 = vmatprep.mubr.msk.bf16.mxu0 %vm1064_vm2, %v5756_v2 }
 0x153   : > { %3703 = vmatmul.mubr.msk.bf16.gmra.mrb[12].mxu1 %vm1064_vm2, %v5122_v21  ;;  %3861 = vmatmul.mubr.msk.bf16.vlgmr.msra.gmra.mrb[0].mxu0 %vm1064_vm2, %v5757_v8 }
 0x154   : > { %3706 = vmatprep.mubr.msk.bf16.mxu1 %vm1064_vm2, %v5183_v27  ;;  %3864 = vmatprep.mubr.msk.bf16.mxu0 %vm1064_vm2, %v5758_v0 }
 0x155   : > { %3893 = vmatpush3.bf16.msra.mxu0 %v2962_v20 }
 0x15b   : > { %3707 = vmatmul.mubr.msk.bf16.gmra.mrb[16].mxu1 %vm1064_vm2, %v5192_v9  ;;  %3865 = vmatmul.mubr.msk.bf16.gmra.mrb[4].mxu0 %vm1064_vm2, %v5759_v59 }
 0x15c   : > { %3710 = vmatprep.mubr.msk.bf16.mxu1 %vm1064_vm2, %v5237_v62  ;;  %3868 = vmatprep.mubr.msk.bf16.mxu0 %vm1064_vm2, %v5760_v33 }
 0x163   : > { %3711 = vmatmul.mubr.msk.bf16.gmra.mrb[20].mxu1 %vm1064_vm2, %v5242_v44  ;;  %3869 = vmatmul.mubr.msk.bf16.gmra.mrb[8].mxu0 %vm1064_vm2, %v5761_v16 }
 0x164   : > { %3714 = vmatprep.mubr.msk.bf16.mxu1 %vm1064_vm2, %v5273_v17  ;;  %3872 = vmatprep.mubr.msk.bf16.mxu0 %vm1064_vm2, %v5762_v54 }
 0x16b   : > { %3715 = vmatmul.mubr.msk.bf16.gmra.mrb[24].mxu1 %vm1064_vm2, %v5284_v31  ;;  %3873 = vmatmul.mubr.msk.bf16.gmra.mrb[12].mxu0 %vm1064_vm2, %v5763_v6 }
 0x16c   : > { %3718 = vmatprep.mubr.msk.bf16.mxu1 %vm1064_vm2, %v5315_v23  ;;  %3876 = vmatprep.mubr.msk.bf16.mxu0 %vm1064_vm2, %v5764_v48 }
 0x173   : > { %3719 = vmatmul.mubr.msk.bf16.gmra.mrb[28].mxu1 %vm1064_vm2, %v5317_v24  ;;  %3877 = vmatmul.mubr.msk.bf16.gmra.mrb[16].mxu0 %vm1064_vm2, %v5052_v53 }
 0x174   : > { %3724 = vmatprep.mubr.msk.bf16.mxu1 %vm1064_vm2, %v4548_v12  ;;  %3880 = vmatprep.mubr.msk.bf16.mxu0 %vm1064_vm2, %v5118_v18  ;;  %v2728_v12 = vrot.slane %v5268_v22, 1 }
 0x176   : > { %v2731_v29 = vsel %vm927_vm1, %v2728_v12, %v2730_v36 }
 0x17b   : > { %3725 = vmatmul.mubr.msk.bf16.vlgmr.msra.gmra.mrb[0].mxu1 %vm1064_vm2, %v4576_v35  ;;  %3881 = vmatmul.mubr.msk.bf16.gmra.mrb[20].mxu0 %vm1064_vm2, %v5152_v4  ;;  %v2727_v35 = vrot.slane %v5261_v5, 1 }
 0x17c   : > { %3927 = vmatpush3.bf16.msra.mxu1 %v5765_v26  ;;  %3728 = vmatprep.mubr.msk.bf16.mxu1 %vm1064_vm2, %v5744_v47 }
 0x17d   : > { %3884 = vmatprep.mubr.msk.bf16.mxu0 %vm1064_vm2, %v5211_v43  ;;  %v2729_v47 = vsel %vm927_vm1, %v2727_v35, %v2728_v12 }
 0x17e   : > { %v2734_v37 = vpack.c.bf16 %v2731_v29, %v2729_v47 }
 0x183   : > { %3729 = vmatmul.mubr.msk.bf16.gmra.mrb[4].mxu1 %vm1064_vm2, %v5745_v19  ;;  %3885 = vmatmul.mubr.msk.bf16.gmra.mrb[24].mxu0 %vm1064_vm2, %v5235_v60 }
 0x184   : > { %3732 = vmatprep.mubr.msk.bf16.mxu1 %vm1064_vm2, %v5746_v3  ;;  %3888 = vmatprep.mubr.msk.bf16.mxu0 %vm1064_vm2, %v5280_v11 }
 0x18b   : > { %3733 = vmatmul.mubr.msk.bf16.gmra.mrb[8].mxu1 %vm1064_vm2, %v5747_v39  ;;  %3889 = vmatmul.mubr.msk.bf16.gmra.mrb[28].mxu0 %vm1064_vm2, %v2734_v37 }
 0x18c   : > { %3736 = vmatprep.mubr.msk.bf16.mxu1 %vm1064_vm2, %v5748_v51  ;;  %3894 = vmatprep.mubr.msk.bf16.mxu0 %vm1064_vm2, %v5754_v34 }
 0x193   : > { %3737 = vmatmul.mubr.msk.bf16.gmra.mrb[12].mxu1 %vm1064_vm2, %v5749_v56  ;;  %3895 = vmatmul.mubr.msk.bf16.vlgmr.msra.gmra.mrb[0].mxu0 %vm1064_vm2, %v5755_v41 }
 0x194   : > { %3740 = vmatprep.mubr.msk.bf16.mxu1 %vm1064_vm2, %v4925_v50  ;;  %3898 = vmatprep.mubr.msk.bf16.mxu0 %vm1064_vm2, %v5054_v61 }
 0x19b   : > { %3741 = vmatmul.mubr.msk.bf16.gmra.mrb[16].mxu1 %vm1064_vm2, %v4959_v15  ;;  %3899 = vmatmul.mubr.msk.bf16.gmra.mrb[4].mxu0 %vm1064_vm2, %v5063_v49 }
 0x19c   : > { %3744 = vmatprep.mubr.msk.bf16.mxu1 %vm1064_vm2, %v5028_v52  ;;  %3902 = vmatprep.mubr.msk.bf16.mxu0 %vm1064_vm2, %v5120_v13 }
 0x1a3   : > { %3745 = vmatmul.mubr.msk.bf16.gmra.mrb[20].mxu1 %vm1064_vm2, %v5061_v38  ;;  %3903 = vmatmul.mubr.msk.bf16.gmra.mrb[8].mxu0 %vm1064_vm2, %v5122_v21 }
 0x1a4   : > { %3748 = vmatprep.mubr.msk.bf16.mxu1 %vm1064_vm2, %v5128_v14  ;;  %3906 = vmatprep.mubr.msk.bf16.mxu0 %vm1064_vm2, %v5183_v27 }
 0x1ab   : > { %3749 = vmatmul.mubr.msk.bf16.gmra.mrb[24].mxu1 %vm1064_vm2, %v5161_v57  ;;  %3907 = vmatmul.mubr.msk.bf16.gmra.mrb[12].mxu0 %vm1064_vm2, %v5192_v9  ;;  %v5564_v9 = vld [vmem:[%s5675_s5] ss:$0 sm:$0xff] }
 0x1ac   : > { %3752 = vmatprep.mubr.msk.bf16.mxu1 %vm1064_vm2, %v5220_v1  ;;  %3910 = vmatprep.mubr.msk.bf16.mxu0 %vm1064_vm2, %v5237_v62 }
 0x1b3   : > { %3753 = vmatmul.mubr.msk.bf16.gmra.mrb[28].mxu1 %vm1064_vm2, %v5405_v55  ;;  %3911 = vmatmul.mubr.msk.bf16.gmra.mrb[16].mxu0 %vm1064_vm2, %v5242_v44 }
 0x1b4   : > { %3774 = vmatprep.mubr.msk.bf16.mxu1 %vm1064_vm2, %v5763_v6  ;;  %3914 = vmatprep.mubr.msk.bf16.mxu0 %vm1064_vm2, %v5273_v17 }
 0x1bb   : > { %3775 = vmatmul.mubr.msk.bf16.vlgmr.msra.gmra.mrb[16].mxu1 %vm1064_vm2, %v5764_v48  ;;  %3915 = vmatmul.mubr.msk.bf16.gmra.mrb[20].mxu0 %vm1064_vm2, %v5284_v31 }
 0x1bc   : > { %3778 = vmatprep.mubr.msk.bf16.mxu1 %vm1064_vm2, %v5052_v53  ;;  %3918 = vmatprep.mubr.msk.bf16.mxu0 %vm1064_vm2, %v5315_v23 }
 0x1c3   : > { %3779 = vmatmul.mubr.msk.bf16.gmra.mrb[20].mxu1 %vm1064_vm2, %v5118_v18  ;;  %3919 = vmatmul.mubr.msk.bf16.gmra.mrb[24].mxu0 %vm1064_vm2, %v5317_v24 }
 0x1c4   : > { %3782 = vmatprep.mubr.msk.bf16.mxu1 %vm1064_vm2, %v5152_v4  ;;  %3922 = vmatprep.mubr.msk.bf16.mxu0 %vm1064_vm2, %v5331_v40 }
 0x1cb   : > { %3783 = vmatmul.mubr.msk.bf16.gmra.mrb[24].mxu1 %vm1064_vm2, %v5211_v43  ;;  %3923 = vmatmul.mubr.msk.bf16.gmra.mrb[28].mxu0 %vm1064_vm2, %v2949_v58 }
 0x1cc   : > { %3786 = vmatprep.mubr.msk.bf16.mxu1 %vm1064_vm2, %v5235_v60 }
 0x1d3   : > { %3787 = vmatmul.mubr.msk.bf16.gmra.mrb[28].mxu1 %vm1064_vm2, %v5280_v11 }
 0x24e   : > { %v3726_v50 = vpop.f32.mrb[0].mxu1 }
 0x24f   : > { %v1924_v15 = vpop.f32.mrb[1].mxu1 }
 0x250   : > { %v3727_v52 = vpop.f32.mrb[2].mxu1 }
 0x251   : > { %v1927_v53 = vpop.f32.mrb[3].mxu1 }
 0x256   : > { %v3730_v61 = vpop.f32.mrb[4].mxu1 }
 0x257   : > { %v1940_v38 = vpop.f32.mrb[5].mxu1 }
 0x258   : > { %v3731_v49 = vpop.f32.mrb[6].mxu1 }
 0x259   : > { %v1943_v18 = vpop.f32.mrb[7].mxu1 }
 0x25e   : > { %v3734_v13 = vpop.f32.mrb[8].mxu1 }
 0x25f   : > { %v1956_v21 = vpop.f32.mrb[9].mxu1 }
 0x260   : > { %v3735_v14 = vpop.f32.mrb[10].mxu1 }
 0x261   : > { %v1959_v4 = vpop.f32.mrb[11].mxu1 }
 0x266   : > { %v3738_v57 = vpop.f32.mrb[12].mxu1  ;;  %v3896_v27 = vpop.f32.mrb[0].mxu0 }
 0x267   : > { %v3928_v43 = vadd.f32 %v3896_v27, %v3726_v50  ;;  %v1972_v1 = vpop.f32.mrb[13].mxu1  ;;  %v2998_v60 = vpop.f32.mrb[1].mxu0 }
 0x268   : > { %v3929_v62 = vadd.f32 %v2998_v60, %v1924_v15  ;;  %v3739_v44 = vpop.f32.mrb[14].mxu1  ;;  %v3897_v5 = vpop.f32.mrb[2].mxu0 }
 0x269   : > { %v3166_v22 = vadd.f32 %v3928_v43, %v5564_v9  ;;  %v3930_v17 = vadd.f32 %v3897_v5, %v3727_v52  ;;  %v1975_v11 = vpop.f32.mrb[15].mxu1  ;;  %v3001_v31 = vpop.f32.mrb[3].mxu0 }
 0x26a   : > { %v3164_v63 = vadd.f32 %v3929_v62, %v5564_v9  ;;  %v3931_v28 = vadd.f32 %v3001_v31, %v1927_v53 }
 0x26b   : > { %3199 = vst.msk [vmem:[%s5569_s10 + $0x10] sm:$0xff] %vm3196_vm3, %v3166_v22  ;;  %v3167_v58 = vadd.f32 %v3930_v17, %v5564_v9 }
 0x26c   : > { %3197 = vst.msk [vmem:[%s5569_s10] sm:$0xff] %vm3196_vm3, %v3164_v63  ;;  %v3165_v23 = vadd.f32 %v3931_v28, %v5564_v9 }
 0x26d   : > { %3200 = vst.msk [vmem:[%s5569_s10 + $0x18] sm:$0xff] %vm3196_vm3, %v3167_v58 }
 0x26e   : > { %3198 = vst.msk [vmem:[%s5569_s10 + $0x8] sm:$0xff] %vm3196_vm3, %v3165_v23  ;;  %v3900_v24 = vpop.f32.mrb[4].mxu0 }
 0x26f   : > { %v3932_v19 = vadd.f32 %v3900_v24, %v3730_v61  ;;  %v3014_v40 = vpop.f32.mrb[5].mxu0 }
 0x270   : > { %v3933_v3 = vadd.f32 %v3014_v40, %v1940_v38  ;;  %v3901_v39 = vpop.f32.mrb[6].mxu0 }
 0x271   : > { %v3170_v45 = vadd.f32 %v3932_v19, %v5564_v9  ;;  %v3934_v51 = vadd.f32 %v3901_v39, %v3731_v49  ;;  %v3017_v56 = vpop.f32.mrb[7].mxu0 }
 0x272   : > { %v3168_v7 = vadd.f32 %v3933_v3, %v5564_v9  ;;  %v3935_v42 = vadd.f32 %v3017_v56, %v1943_v18 }
 0x273   : > { %3203 = vst.msk [vmem:[%s5569_s10 + $0x30] sm:$0xff] %vm3196_vm3, %v3170_v45  ;;  %v3171_v25 = vadd.f32 %v3934_v51, %v5564_v9 }
 0x274   : > { %3201 = vst.msk [vmem:[%s5569_s10 + $0x20] sm:$0xff] %vm3196_vm3, %v3168_v7  ;;  %v3169_v10 = vadd.f32 %v3935_v42, %v5564_v9 }
 0x275   : > { %3204 = vst.msk [vmem:[%s5569_s10 + $0x38] sm:$0xff] %vm3196_vm3, %v3171_v25 }
 0x276   : > { %3202 = vst.msk [vmem:[%s5569_s10 + $0x28] sm:$0xff] %vm3196_vm3, %v3169_v10  ;;  %v3904_v30 = vpop.f32.mrb[8].mxu0 }
 0x277   : > { %v3936_v34 = vadd.f32 %v3904_v30, %v3734_v13  ;;  %v3030_v32 = vpop.f32.mrb[9].mxu0 }
 0x278   : > { %v3937_v55 = vadd.f32 %v3030_v32, %v1956_v21  ;;  %v3905_v41 = vpop.f32.mrb[10].mxu0 }
 0x279   : > { %v3174_v46 = vadd.f32 %v3936_v34, %v5564_v9  ;;  %v3938_v2 = vadd.f32 %v3905_v41, %v3735_v14  ;;  %v3033_v20 = vpop.f32.mrb[11].mxu0 }
 0x27a   : > { %v3172_v8 = vadd.f32 %v3937_v55, %v5564_v9  ;;  %v3939_v0 = vadd.f32 %v3033_v20, %v1959_v4 }
 0x27b   : > { %3207 = vst.msk [vmem:[%s5569_s10 + $0x50] sm:$0xff] %vm3196_vm3, %v3174_v46  ;;  %v3175_v59 = vadd.f32 %v3938_v2, %v5564_v9 }
 0x27c   : > { %3205 = vst.msk [vmem:[%s5569_s10 + $0x40] sm:$0xff] %vm3196_vm3, %v3172_v8  ;;  %v3173_v33 = vadd.f32 %v3939_v0, %v5564_v9 }
 0x27d   : > { %3208 = vst.msk [vmem:[%s5569_s10 + $0x58] sm:$0xff] %vm3196_vm3, %v3175_v59 }
 0x27e   : > { %3206 = vst.msk [vmem:[%s5569_s10 + $0x48] sm:$0xff] %vm3196_vm3, %v3173_v33  ;;  %v3908_v16 = vpop.f32.mrb[12].mxu0 }
 0x27f   : > { %v3940_v54 = vadd.f32 %v3908_v16, %v3738_v57  ;;  %v3046_v6 = vpop.f32.mrb[13].mxu0 }
 0x280   : > { %v3941_v48 = vadd.f32 %v3046_v6, %v1972_v1  ;;  %v3909_v26 = vpop.f32.mrb[14].mxu0 }
 0x281   : > { %v3178_v36 = vadd.f32 %v3940_v54, %v5564_v9  ;;  %v3942_v12 = vadd.f32 %v3909_v26, %v3739_v44  ;;  %v3049_v35 = vpop.f32.mrb[15].mxu0 }
 0x282   : > { %v3176_v47 = vadd.f32 %v3941_v48, %v5564_v9  ;;  %v3943_v29 = vadd.f32 %v3049_v35, %v1975_v11 }
 0x283   : > { %3211 = vst.msk [vmem:[%s5569_s10 + $0x70] sm:$0xff] %vm3196_vm3, %v3178_v36  ;;  %v3179_v37 = vadd.f32 %v3942_v12, %v5564_v9 }
 0x284   : > { %3209 = vst.msk [vmem:[%s5569_s10 + $0x60] sm:$0xff] %vm3196_vm3, %v3176_v47  ;;  %v3177_v50 = vadd.f32 %v3943_v29, %v5564_v9 }
 0x285   : > { %3212 = vst.msk [vmem:[%s5569_s10 + $0x78] sm:$0xff] %vm3196_vm3, %v3179_v37 }
 0x286   : > { %3210 = vst.msk [vmem:[%s5569_s10 + $0x68] sm:$0xff] %vm3196_vm3, %v3177_v50  ;;  %v3912_v15 = vpop.f32.mrb[16].mxu0 }
 0x287   : > { %v3062_v52 = vpop.f32.mrb[17].mxu0 }
 0x288   : > { %v3913_v53 = vpop.f32.mrb[18].mxu0 }
 0x289   : > { %v3065_v61 = vpop.f32.mrb[19].mxu0 }
 0x28e   : > { %v3776_v38 = vpop.f32.mrb[16].mxu1  ;;  %v3916_v49 = vpop.f32.mrb[20].mxu0 }
 0x28f   : > { %v3944_v18 = vadd.f32 %v3912_v15, %v3776_v38  ;;  %v2206_v13 = vpop.f32.mrb[17].mxu1  ;;  %v3078_v21 = vpop.f32.mrb[21].mxu0 }
 0x290   : > { %v3945_v14 = vadd.f32 %v3062_v52, %v2206_v13  ;;  %v3777_v4 = vpop.f32.mrb[18].mxu1  ;;  %v3917_v57 = vpop.f32.mrb[22].mxu0 }
 0x291   : > { %v3182_v27 = vadd.f32 %v3944_v18, %v5564_v9  ;;  %v3946_v43 = vadd.f32 %v3913_v53, %v3777_v4  ;;  %v2209_v1 = vpop.f32.mrb[19].mxu1  ;;  %v3081_v60 = vpop.f32.mrb[23].mxu0 }
 0x292   : > { %v3180_v62 = vadd.f32 %v3945_v14, %v5564_v9  ;;  %v3947_v44 = vadd.f32 %v3065_v61, %v2209_v1 }
 0x293   : > { %3215 = vst.msk [vmem:[%s5569_s10 + $0x90] sm:$0xff] %vm3196_vm3, %v3182_v27  ;;  %v3183_v5 = vadd.f32 %v3946_v43, %v5564_v9 }
 0x294   : > { %3213 = vst.msk [vmem:[%s5569_s10 + $0x80] sm:$0xff] %vm3196_vm3, %v3180_v62  ;;  %v3181_v22 = vadd.f32 %v3947_v44, %v5564_v9 }
 0x295   : > { %3216 = vst.msk [vmem:[%s5569_s10 + $0x98] sm:$0xff] %vm3196_vm3, %v3183_v5 }
 0x296   : > { %3214 = vst.msk [vmem:[%s5569_s10 + $0x88] sm:$0xff] %vm3196_vm3, %v3181_v22  ;;  %v3780_v17 = vpop.f32.mrb[20].mxu1  ;;  %v3920_v11 = vpop.f32.mrb[24].mxu0 }
 0x297   : > { %v3948_v31 = vadd.f32 %v3916_v49, %v3780_v17  ;;  %v2222_v63 = vpop.f32.mrb[21].mxu1  ;;  %v3094_v28 = vpop.f32.mrb[25].mxu0 }
 0x298   : > { %v3949_v58 = vadd.f32 %v3078_v21, %v2222_v63  ;;  %v3781_v23 = vpop.f32.mrb[22].mxu1  ;;  %v3921_v24 = vpop.f32.mrb[26].mxu0 }
 0x299   : > { %v3186_v19 = vadd.f32 %v3948_v31, %v5564_v9  ;;  %v3950_v40 = vadd.f32 %v3917_v57, %v3781_v23  ;;  %v2225_v3 = vpop.f32.mrb[23].mxu1  ;;  %v3097_v39 = vpop.f32.mrb[27].mxu0 }
 0x29a   : > { %v3184_v45 = vadd.f32 %v3949_v58, %v5564_v9  ;;  %v3951_v51 = vadd.f32 %v3081_v60, %v2225_v3 }
 0x29b   : > { %3219 = vst.msk [vmem:[%s5569_s10 + $0xb0] sm:$0xff] %vm3196_vm3, %v3186_v19  ;;  %v3187_v56 = vadd.f32 %v3950_v40, %v5564_v9 }
 0x29c   : > { %3217 = vst.msk [vmem:[%s5569_s10 + $0xa0] sm:$0xff] %vm3196_vm3, %v3184_v45  ;;  %v3185_v7 = vadd.f32 %v3951_v51, %v5564_v9 }
 0x29d   : > { %3220 = vst.msk [vmem:[%s5569_s10 + $0xb8] sm:$0xff] %vm3196_vm3, %v3187_v56 }
 0x29e   : > { %3218 = vst.msk [vmem:[%s5569_s10 + $0xa8] sm:$0xff] %vm3196_vm3, %v3185_v7  ;;  %v3784_v42 = vpop.f32.mrb[24].mxu1  ;;  %v3924_v25 = vpop.f32.mrb[28].mxu0 }
 0x29f   : > { %v3952_v10 = vadd.f32 %v3920_v11, %v3784_v42  ;;  %v2238_v30 = vpop.f32.mrb[25].mxu1  ;;  %v3110_v34 = vpop.f32.mrb[29].mxu0 }
 0x2a0   : > { %v3953_v32 = vadd.f32 %v3094_v28, %v2238_v30  ;;  %v3785_v55 = vpop.f32.mrb[26].mxu1  ;;  %v3925_v41 = vpop.f32.mrb[30].mxu0 }
 0x2a1   : > { %v3190_v46 = vadd.f32 %v3952_v10, %v5564_v9  ;;  %v3954_v2 = vadd.f32 %v3921_v24, %v3785_v55  ;;  %v2241_v20 = vpop.f32.mrb[27].mxu1  ;;  %v3113_v8 = vpop.f32.mrb[31].mxu0 }
 0x2a2   : > { %v3188_v0 = vadd.f32 %v3953_v32, %v5564_v9  ;;  %v3955_v59 = vadd.f32 %v3097_v39, %v2241_v20 }
 0x2a3   : > { %3223 = vst.msk [vmem:[%s5569_s10 + $0xd0] sm:$0xff] %vm3196_vm3, %v3190_v46  ;;  %v3191_v33 = vadd.f32 %v3954_v2, %v5564_v9 }
 0x2a4   : > { %3221 = vst.msk [vmem:[%s5569_s10 + $0xc0] sm:$0xff] %vm3196_vm3, %v3188_v0  ;;  %v3189_v16 = vadd.f32 %v3955_v59, %v5564_v9 }
 0x2a5   : > { %3224 = vst.msk [vmem:[%s5569_s10 + $0xd8] sm:$0xff] %vm3196_vm3, %v3191_v33 }
 0x2a6   : > { %3222 = vst.msk [vmem:[%s5569_s10 + $0xc8] sm:$0xff] %vm3196_vm3, %v3189_v16  ;;  %v3788_v54 = vpop.f32.mrb[28].mxu1 }
 0x2a7   : > { %v3956_v6 = vadd.f32 %v3924_v25, %v3788_v54  ;;  %v2254_v48 = vpop.f32.mrb[29].mxu1 }
 0x2a8   : > { %v3957_v26 = vadd.f32 %v3110_v34, %v2254_v48  ;;  %v3789_v36 = vpop.f32.mrb[30].mxu1 }
 0x2a9   : > { %v3194_v12 = vadd.f32 %v3956_v6, %v5564_v9  ;;  %v3958_v35 = vadd.f32 %v3925_v41, %v3789_v36  ;;  %v2257_v47 = vpop.f32.mrb[31].mxu1 }
 0x2aa   : > { %v3192_v29 = vadd.f32 %v3957_v26, %v5564_v9  ;;  %v3959_v37 = vadd.f32 %v3113_v8, %v2257_v47 }
 0x2ab   : > { %3227 = vst.msk [vmem:[%s5569_s10 + $0xf0] sm:$0xff] %vm3196_vm3, %v3194_v12  ;;  %v3195_v50 = vadd.f32 %v3958_v35, %v5564_v9 }
 0x2ac   : > { %3225 = vst.msk [vmem:[%s5569_s10 + $0xe0] sm:$0xff] %vm3196_vm3, %v3192_v29  ;;  %v3193_v15 = vadd.f32 %v3959_v37, %v5564_v9 }
 0x2ad   : > { %3228 = vst.msk [vmem:[%s5569_s10 + $0xf8] sm:$0xff] %vm3196_vm3, %v3195_v50 }
 0x2ae   : > { %3226 = vst.msk [vmem:[%s5569_s10 + $0xe8] sm:$0xff] %vm3196_vm3, %v3193_v15 }
 0x2af PF: > { %s16_s21 = sadd.s32 1, %s4223_s21  }
 0x2b0   : > { %p13_p4 = scmp.ge.s32.totalorder %s16_s21, 4  }
 0x2b2   :  { %15 = sbr.rel (!%p13_p4) target bundleno = 1 (0x1), region = 82 }

</bundles_post_ra>
